<compile_context>
chip_gen: v7x
topology: tpu7x:2x2x1
jax: 0.10.0
libtpu: 0.0.40
codegen_flags: <defaults>
</compile_context>

<pallas_src>
import jax
import jax.numpy as jnp
import numpy as np
from jax.experimental import pallas as pl
from jax.experimental.pallas import tpu as pltpu

LEAKY_SLOPE = 0.2
BN_EPS = 1e-5


def _lrelu(v):
    return jnp.where(v > 0, v, LEAKY_SLOPE * v)


# --------------------------------------------------------------------------
# Fused kernel: Linear1 -> LeakyReLU -> BN1 -> repeat_interleave -> GRU ->
#               LeakyReLU -> BN2 -> flatten -> Linear2 -> softmax
# --------------------------------------------------------------------------
def _generator_kernel(x_ref, w1t_ref, b1_ref, g1_ref, be1_ref,
                      whh_ref, wirs_ref, bih_ref, bhh_ref,
                      g2_ref, be2_ref, w2q_ref, b2_ref,
                      out_ref, ybuf_ref):
    B = x_ref.shape[0]          # sequence length of the GRU == input batch
    H = whh_ref.shape[1]        # hidden_dim == gru batch == BN2 channels
    M = b2_ref.shape[1]         # max_len

    # ---- Linear1 + LeakyReLU + BN1, lane-dense (B, H) ----
    h = jnp.dot(x_ref[...], w1t_ref[...],
                preferred_element_type=jnp.float32) + b1_ref[...]
    h = _lrelu(h)
    mu1 = jnp.mean(h, axis=0, keepdims=True)
    var1 = jnp.mean((h - mu1) ** 2, axis=0, keepdims=True)
    hbn = (h - mu1) * jax.lax.rsqrt(var1 + BN_EPS) * g1_ref[...] + be1_ref[...]

    # ---- GRU (transposed state G: rows = hidden d, cols = gru-batch c) ----
    whh = whh_ref[...]          # (3H, H)  raw PyTorch w_hh, gate order r,z,n
    wirs = wirs_ref[...]        # (3H, 1)  row-sums of w_ih (repeat_interleave)
    bih = bih_ref[...]          # (3H, 1)
    bhh = bhh_ref[...]          # (3H, 1)

    G = jnp.zeros((H, H), jnp.float32)       # h_0 = 0 (PyTorch default)
    s1 = jnp.zeros((1, H), jnp.float32)      # BN2 running sum per channel
    s2 = jnp.zeros((1, H), jnp.float32)      # BN2 running sum of squares

    # TODO(synk): for large B switch this static unroll to lax.fori_loop
    # (unroll=True for small trip counts) carrying (G, s1, s2).
    for t in range(B):
        h_row = hbn[t:t + 1, :]                              # (1, H) lane-dense
        # input projection: rank-1 (rowsum * scalar) replaces 3 matmuls
        a = wirs * h_row + bih                               # (3H, H)
        # single fused recurrent matmul for all three gates
        b = jnp.dot(whh, G, preferred_element_type=jnp.float32) + bhh  # (3H, H)
        r = jax.nn.sigmoid(a[:H] + b[:H])
        z = jax.nn.sigmoid(a[H:2 * H] + b[H:2 * H])
        n = jnp.tanh(a[2 * H:] + r * b[2 * H:])
        G = (1.0 - z) * n + z * G
        # LeakyReLU applies to the GRU *output*; recurrence carries raw G
        y = _lrelu(G)                                        # (H_d, H_c)
        ybuf_ref[t * H:(t + 1) * H, :] = y                   # row t*H+d = y_t[d,:]
        s1 = s1 + jnp.sum(y, axis=0, keepdims=True)
        s2 = s2 + jnp.sum(y * y, axis=0, keepdims=True)

    # ---- BN2 folded to per-channel scale/shift (channel c on lanes) ----
    cnt = float(B * H)                                       # stats over (seq, hidden)
    mu2 = s1 * (1.0 / cnt)
    var2 = s2 * (1.0 / cnt) - mu2 * mu2                      # biased variance
    scale = g2_ref[...] * jax.lax.rsqrt(var2 + BN_EPS)       # (1, H)
    shift = be2_ref[...] - mu2 * scale                       # (1, H)

    # ---- flatten + Linear2:  logits[t, m] = sum_d (ybn_t[d, :] @ w2q[d]) ----
    logits = jnp.zeros((B, M), jnp.float32)
    for d in range(H):                                       # static unroll
        yd = ybuf_ref[pl.ds(d, B, stride=H), :]              # rows {d, d+H,..}: (B, H)
        ydn = yd * scale + shift                             # BN2 applied lazily
        logits = logits + jnp.dot(ydn, w2q_ref[d],
                                  preferred_element_type=jnp.float32)
    logits = logits + b2_ref[...]

    # ---- softmax (approx reciprocal on the EUP) ----
    mx = jnp.max(logits, axis=-1, keepdims=True)
    e = jnp.exp(logits - mx)
    denom = jnp.sum(e, axis=-1, keepdims=True)
    out_ref[...] = (e * pl.reciprocal(denom, approx=True)).astype(out_ref.dtype)


def _full_spec(shape):
    nd = len(shape)
    return pl.BlockSpec(shape, lambda i, nd=nd: (0,) * nd)


def generator_forward(x, params, hidden_dim, max_len):
    B, latent_dim = x.shape
    H, M = hidden_dim, max_len

    # ---- wrapper-side (free) parameter rearrangements ----
    x32 = jnp.asarray(x, jnp.float32)
    w1t = params["w1"].T                                      # (L, H)
    b1r = params["b1"].reshape(1, H)
    g1r = params["gamma1"].reshape(1, H)
    be1r = params["beta1"].reshape(1, H)
    whh = params["w_hh"]                                      # (3H, H) as-is
    wirs = params["w_ih"].sum(axis=1, keepdims=True)          # (3H, 1) rowsums
    bihc = params["b_ih"].reshape(3 * H, 1)
    bhhc = params["b_hh"].reshape(3 * H, 1)
    g2r = params["gamma2"].reshape(1, H)
    be2r = params["beta2"].reshape(1, H)
    # w2[m, c*H + d]  ->  w2q[d, c, m]
    w2q = params["w2"].reshape(M, H, H).transpose(2, 1, 0)    # (H_d, H_c, M)
    b2r = params["b2"].reshape(1, M)

    ins = [x32, w1t, b1r, g1r, be1r, whh, wirs, bihc, bhhc, g2r, be2r, w2q, b2r]

    return pl.pallas_call(
        _generator_kernel,
        out_shape=jax.ShapeDtypeStruct((B, M), jnp.float32),
        grid=(1,),
        in_specs=[_full_spec(a.shape) for a in ins],
        out_specs=_full_spec((B, M)),
        scratch_shapes=[pltpu.VMEM((B * H, H), jnp.float32)],
        compiler_params=pltpu.CompilerParams(dimension_semantics=("arbitrary",)),
    )(*ins)


# --------------------------------------------------------------------------
# Deterministic parameter init (shapes follow the PyTorch __init__)
# --------------------------------------------------------------------------
def init_params(key, latent_dim, hidden_dim, max_len):
    H, M, L = hidden_dim, max_len, latent_dim
    ks = jax.random.split(key, 12)
    s = 0.1
    return {
        "w1": s * jax.random.normal(ks[0], (H, L), jnp.float32),
        "b1": s * jax.random.normal(ks[1], (H,), jnp.float32),
        "gamma1": 1.0 + s * jax.random.normal(ks[2], (H,), jnp.float32),
        "beta1": s * jax.random.normal(ks[3], (H,), jnp.float32),
        "w_ih": s * jax.random.normal(ks[4], (3 * H, M), jnp.float32),
        "w_hh": s * jax.random.normal(ks[5], (3 * H, H), jnp.float32),
        "b_ih": s * jax.random.normal(ks[6], (3 * H,), jnp.float32),
        "b_hh": s * jax.random.normal(ks[7], (3 * H,), jnp.float32),
        "gamma2": 1.0 + s * jax.random.normal(ks[8], (H,), jnp.float32),
        "beta2": s * jax.random.normal(ks[9], (H,), jnp.float32),
        "w2": s * jax.random.normal(ks[10], (M, H * H), jnp.float32),
        "b2": s * jax.random.normal(ks[11], (M,), jnp.float32),
    }


# --------------------------------------------------------------------------
# Pure-JAX reference mirroring the PyTorch forward (training-mode batchnorm)
# --------------------------------------------------------------------------
def reference_forward(x, params, hidden_dim, max_len):
    H, M = hidden_dim, max_len
    B = x.shape[0]

    h = _lrelu(x @ params["w1"].T + params["b1"])
    mu = h.mean(0)
    var = ((h - mu) ** 2).mean(0)
    h = (h - mu) / jnp.sqrt(var + BN_EPS) * params["gamma1"] + params["beta1"]

    hrep = jnp.repeat(h.reshape(-1), M).reshape(B, H, M)   # repeat_interleave

    w_ih, w_hh = params["w_ih"], params["w_hh"]
    b_ih, b_hh = params["b_ih"], params["b_hh"]
    Wr, Wz, Wn = w_ih[:H], w_ih[H:2 * H], w_ih[2 * H:]
    Ur, Uz, Un = w_hh[:H], w_hh[H:2 * H], w_hh[2 * H:]
    bir, biz, bin_ = b_ih[:H], b_ih[H:2 * H], b_ih[2 * H:]
    bhr, bhz, bhn = b_hh[:H], b_hh[H:2 * H], b_hh[2 * H:]

    ht = jnp.zeros((H, H), jnp.float32)
    outs = []
    for t in range(B):
        xt = hrep[t]
        r = jax.nn.sigmoid(xt @ Wr.T + bir + ht @ Ur.T + bhr)
        z = jax.nn.sigmoid(xt @ Wz.T + biz + ht @ Uz.T + bhz)
        n = jnp.tanh(xt @ Wn.T + bin_ + r * (ht @ Un.T + bhn))
        ht = (1 - z) * n + z * ht
        outs.append(ht)
    g = _lrelu(jnp.stack(outs, 0))                           # (B, H, H)

    mu2 = g.mean(axis=(0, 2), keepdims=True)
    var2 = ((g - mu2) ** 2).mean(axis=(0, 2), keepdims=True)
    g = (g - mu2) / jnp.sqrt(var2 + BN_EPS) * params["gamma2"].reshape(1, H, 1) \
        + params["beta2"].reshape(1, H, 1)

    logits = g.reshape(B, H * H) @ params["w2"].T + params["b2"]
    return jax.nn.softmax(logits, axis=-1)


if __name__ == "__main__":
    latent_dim, hidden_dim, max_len, batch = 8, 32, 16, 2

    key = jax.random.PRNGKey(0)
    kx, kp = jax.random.split(key)
    x = jax.random.normal(kx, (batch, latent_dim), jnp.float32)
    params = init_params(kp, latent_dim, hidden_dim, max_len)

    out = generator_forward(x, params, hidden_dim, max_len)
    out = jax.block_until_ready(out)

    ref = reference_forward(x, params, hidden_dim, max_len)
    assert out.shape == (batch, max_len)
    # tolerances loosened slightly because the softmax denominator uses the
    # approximate (EUP) reciprocal inside the kernel.
    np.testing.assert_allclose(np.asarray(out), np.asarray(ref),
                               rtol=5e-3, atol=5e-3)
    assert np.allclose(np.asarray(out).sum(-1), 1.0, atol=5e-3)

    # TODO(synk): BatchNorm running-stat buffer updates (module state mutation)
    # and the unused nn.Dropout are not emulated; only training-mode batch
    # statistics of the forward pass are reproduced.
    print("KERNEL_OK")
</pallas_src>

<mosaic_0001>
module attributes {stable_mosaic.version = 11 : i64} {
  func.func @_generator_kernel(%arg0: i32, %arg1: memref<2x8xf32, #tpu.memory_space<vmem>>, %arg2: memref<8x32xf32, #tpu.memory_space<vmem>>, %arg3: memref<1x32xf32, #tpu.memory_space<vmem>>, %arg4: memref<1x32xf32, #tpu.memory_space<vmem>>, %arg5: memref<1x32xf32, #tpu.memory_space<vmem>>, %arg6: memref<96x32xf32, #tpu.memory_space<vmem>>, %arg7: memref<96x1xf32, #tpu.memory_space<vmem>>, %arg8: memref<96x1xf32, #tpu.memory_space<vmem>>, %arg9: memref<96x1xf32, #tpu.memory_space<vmem>>, %arg10: memref<1x32xf32, #tpu.memory_space<vmem>>, %arg11: memref<1x32xf32, #tpu.memory_space<vmem>>, %arg12: memref<32x32x16xf32, #tpu.memory_space<vmem>>, %arg13: memref<1x16xf32, #tpu.memory_space<vmem>>, %arg14: memref<2x16xf32, #tpu.memory_space<vmem>>, %arg15: memref<64x32xf32, #tpu.memory_space<vmem>>) attributes {dimension_semantics = [#tpu.dimension_semantics<arbitrary>], iteration_bounds = array<i64: 1>, scalar_prefetch = 0 : i64, scratch_operands = 1 : i64, tpu.core_type = #tpu.core_type<tc>, window_params = [{pipeline_mode = #tpu.pipeline_mode<synchronous>, transform_indices = @transform_0, window_bounds = array<i64: 2, 8>}, {pipeline_mode = #tpu.pipeline_mode<synchronous>, transform_indices = @transform_1, window_bounds = array<i64: 8, 32>}, {pipeline_mode = #tpu.pipeline_mode<synchronous>, transform_indices = @transform_2, window_bounds = array<i64: 1, 32>}, {pipeline_mode = #tpu.pipeline_mode<synchronous>, transform_indices = @transform_3, window_bounds = array<i64: 1, 32>}, {pipeline_mode = #tpu.pipeline_mode<synchronous>, transform_indices = @transform_4, window_bounds = array<i64: 1, 32>}, {pipeline_mode = #tpu.pipeline_mode<synchronous>, transform_indices = @transform_5, window_bounds = array<i64: 96, 32>}, {pipeline_mode = #tpu.pipeline_mode<synchronous>, transform_indices = @transform_6, window_bounds = array<i64: 96, 1>}, {pipeline_mode = #tpu.pipeline_mode<synchronous>, transform_indices = @transform_7, window_bounds = array<i64: 96, 1>}, {pipeline_mode = #tpu.pipeline_mode<synchronous>, transform_indices = @transform_8, window_bounds = array<i64: 96, 1>}, {pipeline_mode = #tpu.pipeline_mode<synchronous>, transform_indices = @transform_9, window_bounds = array<i64: 1, 32>}, {pipeline_mode = #tpu.pipeline_mode<synchronous>, transform_indices = @transform_10, window_bounds = array<i64: 1, 32>}, {pipeline_mode = #tpu.pipeline_mode<synchronous>, transform_indices = @transform_11, window_bounds = array<i64: 32, 32, 16>}, {pipeline_mode = #tpu.pipeline_mode<synchronous>, transform_indices = @transform_12, window_bounds = array<i64: 1, 16>}, {pipeline_mode = #tpu.pipeline_mode<synchronous>, transform_indices = @transform_13, window_bounds = array<i64: 2, 16>}]} {
    %c0 = arith.constant 0 : index
    %c0_0 = arith.constant 0 : index
    %0 = vector.load %arg1[%c0, %c0_0] : memref<2x8xf32, #tpu.memory_space<vmem>>, vector<2x8xf32>
    %c0_1 = arith.constant 0 : index
    %c0_2 = arith.constant 0 : index
    %1 = vector.load %arg2[%c0_1, %c0_2] : memref<8x32xf32, #tpu.memory_space<vmem>>, vector<8x32xf32>
    %cst = arith.constant dense<0.000000e+00> : vector<2x32xf32>
    %2 = tpu.matmul %0, %1, %cst {dimension_numbers = #tpu.dot_dimension_numbers<[1], [0], [0], [1], [0, 0, 1, 1], [], []>} : vector<2x8xf32>, vector<8x32xf32>, vector<2x32xf32> -> vector<2x32xf32>
    %c0_3 = arith.constant 0 : index
    %c0_4 = arith.constant 0 : index
    %3 = vector.load %arg3[%c0_3, %c0_4] : memref<1x32xf32, #tpu.memory_space<vmem>>, vector<1x32xf32>
    %4 = vector.broadcast %3 : vector<1x32xf32> to vector<2x32xf32>
    %5 = arith.addf %2, %4 : vector<2x32xf32>
    %cst_5 = arith.constant 0.000000e+00 : f32
    %6 = vector.broadcast %cst_5 : f32 to vector<2x32xf32>
    %7 = arith.cmpf ogt, %5, %6 : vector<2x32xf32>
    %cst_6 = arith.constant 2.000000e-01 : f32
    %8 = vector.broadcast %cst_6 : f32 to vector<2x32xf32>
    %9 = arith.mulf %8, %5 : vector<2x32xf32>
    %10 = arith.select %7, %5, %9 : vector<2x32xi1>, vector<2x32xf32>
    %cst_7 = arith.constant dense<0.000000e+00> : vector<32xf32>
    %11 = vector.multi_reduction <add>, %10, %cst_7 [0] : vector<2x32xf32> to vector<32xf32>
    %12 = vector.shape_cast %11 : vector<32xf32> to vector<1x32xf32>
    %cst_8 = arith.constant 2.000000e+00 : f32
    %13 = vector.broadcast %cst_8 : f32 to vector<1x32xf32>
    %14 = arith.divf %12, %13 : vector<1x32xf32>
    %15 = vector.broadcast %14 : vector<1x32xf32> to vector<2x32xf32>
    %16 = arith.subf %10, %15 : vector<2x32xf32>
    %17 = arith.mulf %16, %16 : vector<2x32xf32>
    %cst_9 = arith.constant dense<0.000000e+00> : vector<32xf32>
    %18 = vector.multi_reduction <add>, %17, %cst_9 [0] : vector<2x32xf32> to vector<32xf32>
    %19 = vector.shape_cast %18 : vector<32xf32> to vector<1x32xf32>
    %cst_10 = arith.constant 2.000000e+00 : f32
    %20 = vector.broadcast %cst_10 : f32 to vector<1x32xf32>
    %21 = arith.divf %19, %20 : vector<1x32xf32>
    %22 = vector.broadcast %14 : vector<1x32xf32> to vector<2x32xf32>
    %23 = arith.subf %10, %22 : vector<2x32xf32>
    %cst_11 = arith.constant 9.99999974E-6 : f32
    %24 = vector.broadcast %cst_11 : f32 to vector<1x32xf32>
    %25 = arith.addf %21, %24 : vector<1x32xf32>
    %26 = math.rsqrt %25 : vector<1x32xf32>
    %27 = vector.broadcast %26 : vector<1x32xf32> to vector<2x32xf32>
    %28 = arith.mulf %23, %27 : vector<2x32xf32>
    %c0_12 = arith.constant 0 : index
    %c0_13 = arith.constant 0 : index
    %29 = vector.load %arg4[%c0_12, %c0_13] : memref<1x32xf32, #tpu.memory_space<vmem>>, vector<1x32xf32>
    %30 = vector.broadcast %29 : vector<1x32xf32> to vector<2x32xf32>
    %31 = arith.mulf %28, %30 : vector<2x32xf32>
    %c0_14 = arith.constant 0 : index
    %c0_15 = arith.constant 0 : index
    %32 = vector.load %arg5[%c0_14, %c0_15] : memref<1x32xf32, #tpu.memory_space<vmem>>, vector<1x32xf32>
    %33 = vector.broadcast %32 : vector<1x32xf32> to vector<2x32xf32>
    %34 = arith.addf %31, %33 : vector<2x32xf32>
    %c0_16 = arith.constant 0 : index
    %c0_17 = arith.constant 0 : index
    %35 = vector.load %arg6[%c0_16, %c0_17] : memref<96x32xf32, #tpu.memory_space<vmem>>, vector<96x32xf32>
    %c0_18 = arith.constant 0 : index
    %c0_19 = arith.constant 0 : index
    %36 = vector.load %arg7[%c0_18, %c0_19] : memref<96x1xf32, #tpu.memory_space<vmem>>, vector<96x1xf32>
    %c0_20 = arith.constant 0 : index
    %c0_21 = arith.constant 0 : index
    %37 = vector.load %arg8[%c0_20, %c0_21] : memref<96x1xf32, #tpu.memory_space<vmem>>, vector<96x1xf32>
    %c0_22 = arith.constant 0 : index
    %c0_23 = arith.constant 0 : index
    %38 = vector.load %arg9[%c0_22, %c0_23] : memref<96x1xf32, #tpu.memory_space<vmem>>, vector<96x1xf32>
    %cst_24 = arith.constant 0.000000e+00 : f32
    %39 = vector.broadcast %cst_24 : f32 to vector<32x32xf32>
    %cst_25 = arith.constant 0.000000e+00 : f32
    %40 = vector.broadcast %cst_25 : f32 to vector<1x32xf32>
    %cst_26 = arith.constant 0.000000e+00 : f32
    %41 = vector.broadcast %cst_26 : f32 to vector<1x32xf32>
    %42 = vector.extract_strided_slice %34 {offsets = [0, 0], sizes = [1, 32], strides = [1, 1]} : vector<2x32xf32> to vector<1x32xf32>
    %43 = vector.broadcast %36 : vector<96x1xf32> to vector<96x32xf32>
    %44 = vector.broadcast %42 : vector<1x32xf32> to vector<96x32xf32>
    %45 = arith.mulf %43, %44 : vector<96x32xf32>
    %46 = vector.broadcast %37 : vector<96x1xf32> to vector<96x32xf32>
    %47 = arith.addf %45, %46 : vector<96x32xf32>
    %cst_27 = arith.constant dense<0.000000e+00> : vector<96x32xf32>
    %48 = tpu.matmul %35, %39, %cst_27 {dimension_numbers = #tpu.dot_dimension_numbers<[1], [0], [0], [1], [0, 0, 1, 1], [], []>} : vector<96x32xf32>, vector<32x32xf32>, vector<96x32xf32> -> vector<96x32xf32>
    %49 = vector.broadcast %38 : vector<96x1xf32> to vector<96x32xf32>
    %50 = arith.addf %48, %49 : vector<96x32xf32>
    %51 = vector.extract_strided_slice %47 {offsets = [0, 0], sizes = [32, 32], strides = [1, 1]} : vector<96x32xf32> to vector<32x32xf32>
    %52 = vector.extract_strided_slice %50 {offsets = [0, 0], sizes = [32, 32], strides = [1, 1]} : vector<96x32xf32> to vector<32x32xf32>
    %53 = arith.addf %51, %52 : vector<32x32xf32>
    %54 = arith.negf %53 : vector<32x32xf32>
    %55 = math.exp %54 : vector<32x32xf32>
    %cst_28 = arith.constant 1.000000e+00 : f32
    %56 = vector.broadcast %cst_28 : f32 to vector<32x32xf32>
    %57 = arith.addf %56, %55 : vector<32x32xf32>
    %58 = arith.divf %56, %57 : vector<32x32xf32>
    %59 = vector.extract_strided_slice %47 {offsets = [32, 0], sizes = [32, 32], strides = [1, 1]} : vector<96x32xf32> to vector<32x32xf32>
    %60 = vector.extract_strided_slice %50 {offsets = [32, 0], sizes = [32, 32], strides = [1, 1]} : vector<96x32xf32> to vector<32x32xf32>
    %61 = arith.addf %59, %60 : vector<32x32xf32>
    %62 = arith.negf %61 : vector<32x32xf32>
    %63 = math.exp %62 : vector<32x32xf32>
    %cst_29 = arith.constant 1.000000e+00 : f32
    %64 = vector.broadcast %cst_29 : f32 to vector<32x32xf32>
    %65 = arith.addf %64, %63 : vector<32x32xf32>
    %66 = arith.divf %64, %65 : vector<32x32xf32>
    %67 = vector.extract_strided_slice %47 {offsets = [64, 0], sizes = [32, 32], strides = [1, 1]} : vector<96x32xf32> to vector<32x32xf32>
    %68 = vector.extract_strided_slice %50 {offsets = [64, 0], sizes = [32, 32], strides = [1, 1]} : vector<96x32xf32> to vector<32x32xf32>
    %69 = arith.mulf %58, %68 : vector<32x32xf32>
    %70 = arith.addf %67, %69 : vector<32x32xf32>
    %71 = math.tanh %70 : vector<32x32xf32>
    %cst_30 = arith.constant 1.000000e+00 : f32
    %72 = vector.broadcast %cst_30 : f32 to vector<32x32xf32>
    %73 = arith.subf %72, %66 : vector<32x32xf32>
    %74 = arith.mulf %73, %71 : vector<32x32xf32>
    %75 = arith.mulf %66, %39 : vector<32x32xf32>
    %76 = arith.addf %74, %75 : vector<32x32xf32>
    %cst_31 = arith.constant 0.000000e+00 : f32
    %77 = vector.broadcast %cst_31 : f32 to vector<32x32xf32>
    %78 = arith.cmpf ogt, %76, %77 : vector<32x32xf32>
    %cst_32 = arith.constant 2.000000e-01 : f32
    %79 = vector.broadcast %cst_32 : f32 to vector<32x32xf32>
    %80 = arith.mulf %79, %76 : vector<32x32xf32>
    %81 = arith.select %78, %76, %80 : vector<32x32xi1>, vector<32x32xf32>
    %c0_33 = arith.constant 0 : index
    %c0_34 = arith.constant 0 : index
    %82 = vector.load %arg15[%c0_33, %c0_34] : memref<64x32xf32, #tpu.memory_space<vmem>>, vector<32x32xf32>
    tpu.vector_store %arg15[%c0_33, %c0_34], %81 {strides = array<i32>} : memref<64x32xf32, #tpu.memory_space<vmem>>, vector<32x32xf32>,
    %cst_35 = arith.constant dense<0.000000e+00> : vector<32xf32>
    %83 = vector.multi_reduction <add>, %81, %cst_35 [0] : vector<32x32xf32> to vector<32xf32>
    %84 = vector.shape_cast %83 : vector<32xf32> to vector<1x32xf32>
    %85 = arith.addf %40, %84 : vector<1x32xf32>
    %86 = arith.mulf %81, %81 : vector<32x32xf32>
    %cst_36 = arith.constant dense<0.000000e+00> : vector<32xf32>
    %87 = vector.multi_reduction <add>, %86, %cst_36 [0] : vector<32x32xf32> to vector<32xf32>
    %88 = vector.shape_cast %87 : vector<32xf32> to vector<1x32xf32>
    %89 = arith.addf %41, %88 : vector<1x32xf32>
    %90 = vector.extract_strided_slice %34 {offsets = [1, 0], sizes = [1, 32], strides = [1, 1]} : vector<2x32xf32> to vector<1x32xf32>
    %91 = vector.broadcast %36 : vector<96x1xf32> to vector<96x32xf32>
    %92 = vector.broadcast %90 : vector<1x32xf32> to vector<96x32xf32>
    %93 = arith.mulf %91, %92 : vector<96x32xf32>
    %94 = vector.broadcast %37 : vector<96x1xf32> to vector<96x32xf32>
    %95 = arith.addf %93, %94 : vector<96x32xf32>
    %cst_37 = arith.constant dense<0.000000e+00> : vector<96x32xf32>
    %96 = tpu.matmul %35, %76, %cst_37 {dimension_numbers = #tpu.dot_dimension_numbers<[1], [0], [0], [1], [0, 0, 1, 1], [], []>} : vector<96x32xf32>, vector<32x32xf32>, vector<96x32xf32> -> vector<96x32xf32>
    %97 = vector.broadcast %38 : vector<96x1xf32> to vector<96x32xf32>
    %98 = arith.addf %96, %97 : vector<96x32xf32>
    %99 = vector.extract_strided_slice %95 {offsets = [0, 0], sizes = [32, 32], strides = [1, 1]} : vector<96x32xf32> to vector<32x32xf32>
    %100 = vector.extract_strided_slice %98 {offsets = [0, 0], sizes = [32, 32], strides = [1, 1]} : vector<96x32xf32> to vector<32x32xf32>
    %101 = arith.addf %99, %100 : vector<32x32xf32>
    %102 = arith.negf %101 : vector<32x32xf32>
    %103 = math.exp %102 : vector<32x32xf32>
    %cst_38 = arith.constant 1.000000e+00 : f32
    %104 = vector.broadcast %cst_38 : f32 to vector<32x32xf32>
    %105 = arith.addf %104, %103 : vector<32x32xf32>
    %106 = arith.divf %104, %105 : vector<32x32xf32>
    %107 = vector.extract_strided_slice %95 {offsets = [32, 0], sizes = [32, 32], strides = [1, 1]} : vector<96x32xf32> to vector<32x32xf32>
    %108 = vector.extract_strided_slice %98 {offsets = [32, 0], sizes = [32, 32], strides = [1, 1]} : vector<96x32xf32> to vector<32x32xf32>
    %109 = arith.addf %107, %108 : vector<32x32xf32>
    %110 = arith.negf %109 : vector<32x32xf32>
    %111 = math.exp %110 : vector<32x32xf32>
    %cst_39 = arith.constant 1.000000e+00 : f32
    %112 = vector.broadcast %cst_39 : f32 to vector<32x32xf32>
    %113 = arith.addf %112, %111 : vector<32x32xf32>
    %114 = arith.divf %112, %113 : vector<32x32xf32>
    %115 = vector.extract_strided_slice %95 {offsets = [64, 0], sizes = [32, 32], strides = [1, 1]} : vector<96x32xf32> to vector<32x32xf32>
    %116 = vector.extract_strided_slice %98 {offsets = [64, 0], sizes = [32, 32], strides = [1, 1]} : vector<96x32xf32> to vector<32x32xf32>
    %117 = arith.mulf %106, %116 : vector<32x32xf32>
    %118 = arith.addf %115, %117 : vector<32x32xf32>
    %119 = math.tanh %118 : vector<32x32xf32>
    %cst_40 = arith.constant 1.000000e+00 : f32
    %120 = vector.broadcast %cst_40 : f32 to vector<32x32xf32>
    %121 = arith.subf %120, %114 : vector<32x32xf32>
    %122 = arith.mulf %121, %119 : vector<32x32xf32>
    %123 = arith.mulf %114, %76 : vector<32x32xf32>
    %124 = arith.addf %122, %123 : vector<32x32xf32>
    %cst_41 = arith.constant 0.000000e+00 : f32
    %125 = vector.broadcast %cst_41 : f32 to vector<32x32xf32>
    %126 = arith.cmpf ogt, %124, %125 : vector<32x32xf32>
    %cst_42 = arith.constant 2.000000e-01 : f32
    %127 = vector.broadcast %cst_42 : f32 to vector<32x32xf32>
    %128 = arith.mulf %127, %124 : vector<32x32xf32>
    %129 = arith.select %126, %124, %128 : vector<32x32xi1>, vector<32x32xf32>
    %c32 = arith.constant 32 : index
    %c0_43 = arith.constant 0 : index
    %130 = vector.load %arg15[%c32, %c0_43] : memref<64x32xf32, #tpu.memory_space<vmem>>, vector<32x32xf32>
    tpu.vector_store %arg15[%c32, %c0_43], %129 {strides = array<i32>} : memref<64x32xf32, #tpu.memory_space<vmem>>, vector<32x32xf32>,
    %cst_44 = arith.constant dense<0.000000e+00> : vector<32xf32>
    %131 = vector.multi_reduction <add>, %129, %cst_44 [0] : vector<32x32xf32> to vector<32xf32>
    %132 = vector.shape_cast %131 : vector<32xf32> to vector<1x32xf32>
    %133 = arith.addf %85, %132 : vector<1x32xf32>
    %134 = arith.mulf %129, %129 : vector<32x32xf32>
    %cst_45 = arith.constant dense<0.000000e+00> : vector<32xf32>
    %135 = vector.multi_reduction <add>, %134, %cst_45 [0] : vector<32x32xf32> to vector<32xf32>
    %136 = vector.shape_cast %135 : vector<32xf32> to vector<1x32xf32>
    %137 = arith.addf %89, %136 : vector<1x32xf32>
    %cst_46 = arith.constant 1.562500e-02 : f32
    %138 = vector.broadcast %cst_46 : f32 to vector<1x32xf32>
    %139 = arith.mulf %133, %138 : vector<1x32xf32>
    %cst_47 = arith.constant 1.562500e-02 : f32
    %140 = vector.broadcast %cst_47 : f32 to vector<1x32xf32>
    %141 = arith.mulf %137, %140 : vector<1x32xf32>
    %142 = arith.mulf %139, %139 : vector<1x32xf32>
    %143 = arith.subf %141, %142 : vector<1x32xf32>
    %c0_48 = arith.constant 0 : index
    %c0_49 = arith.constant 0 : index
    %144 = vector.load %arg10[%c0_48, %c0_49] : memref<1x32xf32, #tpu.memory_space<vmem>>, vector<1x32xf32>
    %cst_50 = arith.constant 9.99999974E-6 : f32
    %145 = vector.broadcast %cst_50 : f32 to vector<1x32xf32>
    %146 = arith.addf %143, %145 : vector<1x32xf32>
    %147 = math.rsqrt %146 : vector<1x32xf32>
    %148 = arith.mulf %144, %147 : vector<1x32xf32>
    %c0_51 = arith.constant 0 : index
    %c0_52 = arith.constant 0 : index
    %149 = vector.load %arg11[%c0_51, %c0_52] : memref<1x32xf32, #tpu.memory_space<vmem>>, vector<1x32xf32>
    %150 = arith.mulf %139, %148 : vector<1x32xf32>
    %151 = arith.subf %149, %150 : vector<1x32xf32>
    %cst_53 = arith.constant 0.000000e+00 : f32
    %152 = vector.broadcast %cst_53 : f32 to vector<2x16xf32>
    %c0_54 = arith.constant 0 : index
    %c0_55 = arith.constant 0 : index
    %153 = tpu.strided_load %arg15[%c0_54, %c0_55] {strides = array<i32: 32, 1>} : memref<64x32xf32, #tpu.memory_space<vmem>>, vector<2x32xf32>
    %154 = vector.broadcast %148 : vector<1x32xf32> to vector<2x32xf32>
    %155 = arith.mulf %153, %154 : vector<2x32xf32>
    %156 = vector.broadcast %151 : vector<1x32xf32> to vector<2x32xf32>
    %157 = arith.addf %155, %156 : vector<2x32xf32>
    %c0_56 = arith.constant 0 : index
    %c0_57 = arith.constant 0 : index
    %c0_58 = arith.constant 0 : index
    %158 = vector.load %arg12[%c0_56, %c0_57, %c0_58] : memref<32x32x16xf32, #tpu.memory_space<vmem>>, vector<1x32x16xf32>
    %159 = vector.shape_cast %158 : vector<1x32x16xf32> to vector<32x16xf32>
    %cst_59 = arith.constant dense<0.000000e+00> : vector<2x16xf32>
    %160 = tpu.matmul %157, %159, %cst_59 {dimension_numbers = #tpu.dot_dimension_numbers<[1], [0], [0], [1], [0, 0, 1, 1], [], []>} : vector<2x32xf32>, vector<32x16xf32>, vector<2x16xf32> -> vector<2x16xf32>
    %161 = arith.addf %152, %160 : vector<2x16xf32>
    %c1 = arith.constant 1 : index
    %c0_60 = arith.constant 0 : index
    %162 = tpu.strided_load %arg15[%c1, %c0_60] {strides = array<i32: 32, 1>} : memref<64x32xf32, #tpu.memory_space<vmem>>, vector<2x32xf32>
    %163 = vector.broadcast %148 : vector<1x32xf32> to vector<2x32xf32>
    %164 = arith.mulf %162, %163 : vector<2x32xf32>
    %165 = vector.broadcast %151 : vector<1x32xf32> to vector<2x32xf32>
    %166 = arith.addf %164, %165 : vector<2x32xf32>
    %c1_61 = arith.constant 1 : index
    %c0_62 = arith.constant 0 : index
    %c0_63 = arith.constant 0 : index
    %167 = vector.load %arg12[%c1_61, %c0_62, %c0_63] : memref<32x32x16xf32, #tpu.memory_space<vmem>>, vector<1x32x16xf32>
    %168 = vector.shape_cast %167 : vector<1x32x16xf32> to vector<32x16xf32>
    %cst_64 = arith.constant dense<0.000000e+00> : vector<2x16xf32>
    %169 = tpu.matmul %166, %168, %cst_64 {dimension_numbers = #tpu.dot_dimension_numbers<[1], [0], [0], [1], [0, 0, 1, 1], [], []>} : vector<2x32xf32>, vector<32x16xf32>, vector<2x16xf32> -> vector<2x16xf32>
    %170 = arith.addf %161, %169 : vector<2x16xf32>
    %c2 = arith.constant 2 : index
    %c0_65 = arith.constant 0 : index
    %171 = tpu.strided_load %arg15[%c2, %c0_65] {strides = array<i32: 32, 1>} : memref<64x32xf32, #tpu.memory_space<vmem>>, vector<2x32xf32>
    %172 = vector.broadcast %148 : vector<1x32xf32> to vector<2x32xf32>
    %173 = arith.mulf %171, %172 : vector<2x32xf32>
    %174 = vector.broadcast %151 : vector<1x32xf32> to vector<2x32xf32>
    %175 = arith.addf %173, %174 : vector<2x32xf32>
    %c2_66 = arith.constant 2 : index
    %c0_67 = arith.constant 0 : index
    %c0_68 = arith.constant 0 : index
    %176 = vector.load %arg12[%c2_66, %c0_67, %c0_68] : memref<32x32x16xf32, #tpu.memory_space<vmem>>, vector<1x32x16xf32>
    %177 = vector.shape_cast %176 : vector<1x32x16xf32> to vector<32x16xf32>
    %cst_69 = arith.constant dense<0.000000e+00> : vector<2x16xf32>
    %178 = tpu.matmul %175, %177, %cst_69 {dimension_numbers = #tpu.dot_dimension_numbers<[1], [0], [0], [1], [0, 0, 1, 1], [], []>} : vector<2x32xf32>, vector<32x16xf32>, vector<2x16xf32> -> vector<2x16xf32>
    %179 = arith.addf %170, %178 : vector<2x16xf32>
    %c3 = arith.constant 3 : index
    %c0_70 = arith.constant 0 : index
    %180 = tpu.strided_load %arg15[%c3, %c0_70] {strides = array<i32: 32, 1>} : memref<64x32xf32, #tpu.memory_space<vmem>>, vector<2x32xf32>
    %181 = vector.broadcast %148 : vector<1x32xf32> to vector<2x32xf32>
    %182 = arith.mulf %180, %181 : vector<2x32xf32>
    %183 = vector.broadcast %151 : vector<1x32xf32> to vector<2x32xf32>
    %184 = arith.addf %182, %183 : vector<2x32xf32>
    %c3_71 = arith.constant 3 : index
    %c0_72 = arith.constant 0 : index
    %c0_73 = arith.constant 0 : index
    %185 = vector.load %arg12[%c3_71, %c0_72, %c0_73] : memref<32x32x16xf32, #tpu.memory_space<vmem>>, vector<1x32x16xf32>
    %186 = vector.shape_cast %185 : vector<1x32x16xf32> to vector<32x16xf32>
    %cst_74 = arith.constant dense<0.000000e+00> : vector<2x16xf32>
    %187 = tpu.matmul %184, %186, %cst_74 {dimension_numbers = #tpu.dot_dimension_numbers<[1], [0], [0], [1], [0, 0, 1, 1], [], []>} : vector<2x32xf32>, vector<32x16xf32>, vector<2x16xf32> -> vector<2x16xf32>
    %188 = arith.addf %179, %187 : vector<2x16xf32>
    %c4 = arith.constant 4 : index
    %c0_75 = arith.constant 0 : index
    %189 = tpu.strided_load %arg15[%c4, %c0_75] {strides = array<i32: 32, 1>} : memref<64x32xf32, #tpu.memory_space<vmem>>, vector<2x32xf32>
    %190 = vector.broadcast %148 : vector<1x32xf32> to vector<2x32xf32>
    %191 = arith.mulf %189, %190 : vector<2x32xf32>
    %192 = vector.broadcast %151 : vector<1x32xf32> to vector<2x32xf32>
    %193 = arith.addf %191, %192 : vector<2x32xf32>
    %c4_76 = arith.constant 4 : index
    %c0_77 = arith.constant 0 : index
    %c0_78 = arith.constant 0 : index
    %194 = vector.load %arg12[%c4_76, %c0_77, %c0_78] : memref<32x32x16xf32, #tpu.memory_space<vmem>>, vector<1x32x16xf32>
    %195 = vector.shape_cast %194 : vector<1x32x16xf32> to vector<32x16xf32>
    %cst_79 = arith.constant dense<0.000000e+00> : vector<2x16xf32>
    %196 = tpu.matmul %193, %195, %cst_79 {dimension_numbers = #tpu.dot_dimension_numbers<[1], [0], [0], [1], [0, 0, 1, 1], [], []>} : vector<2x32xf32>, vector<32x16xf32>, vector<2x16xf32> -> vector<2x16xf32>
    %197 = arith.addf %188, %196 : vector<2x16xf32>
    %c5 = arith.constant 5 : index
    %c0_80 = arith.constant 0 : index
    %198 = tpu.strided_load %arg15[%c5, %c0_80] {strides = array<i32: 32, 1>} : memref<64x32xf32, #tpu.memory_space<vmem>>, vector<2x32xf32>
    %199 = vector.broadcast %148 : vector<1x32xf32> to vector<2x32xf32>
    %200 = arith.mulf %198, %199 : vector<2x32xf32>
    %201 = vector.broadcast %151 : vector<1x32xf32> to vector<2x32xf32>
    %202 = arith.addf %200, %201 : vector<2x32xf32>
    %c5_81 = arith.constant 5 : index
    %c0_82 = arith.constant 0 : index
    %c0_83 = arith.constant 0 : index
    %203 = vector.load %arg12[%c5_81, %c0_82, %c0_83] : memref<32x32x16xf32, #tpu.memory_space<vmem>>, vector<1x32x16xf32>
    %204 = vector.shape_cast %203 : vector<1x32x16xf32> to vector<32x16xf32>
    %cst_84 = arith.constant dense<0.000000e+00> : vector<2x16xf32>
    %205 = tpu.matmul %202, %204, %cst_84 {dimension_numbers = #tpu.dot_dimension_numbers<[1], [0], [0], [1], [0, 0, 1, 1], [], []>} : vector<2x32xf32>, vector<32x16xf32>, vector<2x16xf32> -> vector<2x16xf32>
    %206 = arith.addf %197, %205 : vector<2x16xf32>
    %c6 = arith.constant 6 : index
    %c0_85 = arith.constant 0 : index
    %207 = tpu.strided_load %arg15[%c6, %c0_85] {strides = array<i32: 32, 1>} : memref<64x32xf32, #tpu.memory_space<vmem>>, vector<2x32xf32>
    %208 = vector.broadcast %148 : vector<1x32xf32> to vector<2x32xf32>
    %209 = arith.mulf %207, %208 : vector<2x32xf32>
    %210 = vector.broadcast %151 : vector<1x32xf32> to vector<2x32xf32>
    %211 = arith.addf %209, %210 : vector<2x32xf32>
    %c6_86 = arith.constant 6 : index
    %c0_87 = arith.constant 0 : index
    %c0_88 = arith.constant 0 : index
    %212 = vector.load %arg12[%c6_86, %c0_87, %c0_88] : memref<32x32x16xf32, #tpu.memory_space<vmem>>, vector<1x32x16xf32>
    %213 = vector.shape_cast %212 : vector<1x32x16xf32> to vector<32x16xf32>
    %cst_89 = arith.constant dense<0.000000e+00> : vector<2x16xf32>
    %214 = tpu.matmul %211, %213, %cst_89 {dimension_numbers = #tpu.dot_dimension_numbers<[1], [0], [0], [1], [0, 0, 1, 1], [], []>} : vector<2x32xf32>, vector<32x16xf32>, vector<2x16xf32> -> vector<2x16xf32>
    %215 = arith.addf %206, %214 : vector<2x16xf32>
    %c7 = arith.constant 7 : index
    %c0_90 = arith.constant 0 : index
    %216 = tpu.strided_load %arg15[%c7, %c0_90] {strides = array<i32: 32, 1>} : memref<64x32xf32, #tpu.memory_space<vmem>>, vector<2x32xf32>
    %217 = vector.broadcast %148 : vector<1x32xf32> to vector<2x32xf32>
    %218 = arith.mulf %216, %217 : vector<2x32xf32>
    %219 = vector.broadcast %151 : vector<1x32xf32> to vector<2x32xf32>
    %220 = arith.addf %218, %219 : vector<2x32xf32>
    %c7_91 = arith.constant 7 : index
    %c0_92 = arith.constant 0 : index
    %c0_93 = arith.constant 0 : index
    %221 = vector.load %arg12[%c7_91, %c0_92, %c0_93] : memref<32x32x16xf32, #tpu.memory_space<vmem>>, vector<1x32x16xf32>
    %222 = vector.shape_cast %221 : vector<1x32x16xf32> to vector<32x16xf32>
    %cst_94 = arith.constant dense<0.000000e+00> : vector<2x16xf32>
    %223 = tpu.matmul %220, %222, %cst_94 {dimension_numbers = #tpu.dot_dimension_numbers<[1], [0], [0], [1], [0, 0, 1, 1], [], []>} : vector<2x32xf32>, vector<32x16xf32>, vector<2x16xf32> -> vector<2x16xf32>
    %224 = arith.addf %215, %223 : vector<2x16xf32>
    %c8 = arith.constant 8 : index
    %c0_95 = arith.constant 0 : index
    %225 = tpu.strided_load %arg15[%c8, %c0_95] {strides = array<i32: 32, 1>} : memref<64x32xf32, #tpu.memory_space<vmem>>, vector<2x32xf32>
    %226 = vector.broadcast %148 : vector<1x32xf32> to vector<2x32xf32>
    %227 = arith.mulf %225, %226 : vector<2x32xf32>
    %228 = vector.broadcast %151 : vector<1x32xf32> to vector<2x32xf32>
    %229 = arith.addf %227, %228 : vector<2x32xf32>
    %c8_96 = arith.constant 8 : index
    %c0_97 = arith.constant 0 : index
    %c0_98 = arith.constant 0 : index
    %230 = vector.load %arg12[%c8_96, %c0_97, %c0_98] : memref<32x32x16xf32, #tpu.memory_space<vmem>>, vector<1x32x16xf32>
    %231 = vector.shape_cast %230 : vector<1x32x16xf32> to vector<32x16xf32>
    %cst_99 = arith.constant dense<0.000000e+00> : vector<2x16xf32>
    %232 = tpu.matmul %229, %231, %cst_99 {dimension_numbers = #tpu.dot_dimension_numbers<[1], [0], [0], [1], [0, 0, 1, 1], [], []>} : vector<2x32xf32>, vector<32x16xf32>, vector<2x16xf32> -> vector<2x16xf32>
    %233 = arith.addf %224, %232 : vector<2x16xf32>
    %c9 = arith.constant 9 : index
    %c0_100 = arith.constant 0 : index
    %234 = tpu.strided_load %arg15[%c9, %c0_100] {strides = array<i32: 32, 1>} : memref<64x32xf32, #tpu.memory_space<vmem>>, vector<2x32xf32>
    %235 = vector.broadcast %148 : vector<1x32xf32> to vector<2x32xf32>
    %236 = arith.mulf %234, %235 : vector<2x32xf32>
    %237 = vector.broadcast %151 : vector<1x32xf32> to vector<2x32xf32>
    %238 = arith.addf %236, %237 : vector<2x32xf32>
    %c9_101 = arith.constant 9 : index
    %c0_102 = arith.constant 0 : index
    %c0_103 = arith.constant 0 : index
    %239 = vector.load %arg12[%c9_101, %c0_102, %c0_103] : memref<32x32x16xf32, #tpu.memory_space<vmem>>, vector<1x32x16xf32>
    %240 = vector.shape_cast %239 : vector<1x32x16xf32> to vector<32x16xf32>
    %cst_104 = arith.constant dense<0.000000e+00> : vector<2x16xf32>
    %241 = tpu.matmul %238, %240, %cst_104 {dimension_numbers = #tpu.dot_dimension_numbers<[1], [0], [0], [1], [0, 0, 1, 1], [], []>} : vector<2x32xf32>, vector<32x16xf32>, vector<2x16xf32> -> vector<2x16xf32>
    %242 = arith.addf %233, %241 : vector<2x16xf32>
    %c10 = arith.constant 10 : index
    %c0_105 = arith.constant 0 : index
    %243 = tpu.strided_load %arg15[%c10, %c0_105] {strides = array<i32: 32, 1>} : memref<64x32xf32, #tpu.memory_space<vmem>>, vector<2x32xf32>
    %244 = vector.broadcast %148 : vector<1x32xf32> to vector<2x32xf32>
    %245 = arith.mulf %243, %244 : vector<2x32xf32>
    %246 = vector.broadcast %151 : vector<1x32xf32> to vector<2x32xf32>
    %247 = arith.addf %245, %246 : vector<2x32xf32>
    %c10_106 = arith.constant 10 : index
    %c0_107 = arith.constant 0 : index
    %c0_108 = arith.constant 0 : index
    %248 = vector.load %arg12[%c10_106, %c0_107, %c0_108] : memref<32x32x16xf32, #tpu.memory_space<vmem>>, vector<1x32x16xf32>
    %249 = vector.shape_cast %248 : vector<1x32x16xf32> to vector<32x16xf32>
    %cst_109 = arith.constant dense<0.000000e+00> : vector<2x16xf32>
    %250 = tpu.matmul %247, %249, %cst_109 {dimension_numbers = #tpu.dot_dimension_numbers<[1], [0], [0], [1], [0, 0, 1, 1], [], []>} : vector<2x32xf32>, vector<32x16xf32>, vector<2x16xf32> -> vector<2x16xf32>
    %251 = arith.addf %242, %250 : vector<2x16xf32>
    %c11 = arith.constant 11 : index
    %c0_110 = arith.constant 0 : index
    %252 = tpu.strided_load %arg15[%c11, %c0_110] {strides = array<i32: 32, 1>} : memref<64x32xf32, #tpu.memory_space<vmem>>, vector<2x32xf32>
    %253 = vector.broadcast %148 : vector<1x32xf32> to vector<2x32xf32>
    %254 = arith.mulf %252, %253 : vector<2x32xf32>
    %255 = vector.broadcast %151 : vector<1x32xf32> to vector<2x32xf32>
    %256 = arith.addf %254, %255 : vector<2x32xf32>
    %c11_111 = arith.constant 11 : index
    %c0_112 = arith.constant 0 : index
    %c0_113 = arith.constant 0 : index
    %257 = vector.load %arg12[%c11_111, %c0_112, %c0_113] : memref<32x32x16xf32, #tpu.memory_space<vmem>>, vector<1x32x16xf32>
    %258 = vector.shape_cast %257 : vector<1x32x16xf32> to vector<32x16xf32>
    %cst_114 = arith.constant dense<0.000000e+00> : vector<2x16xf32>
    %259 = tpu.matmul %256, %258, %cst_114 {dimension_numbers = #tpu.dot_dimension_numbers<[1], [0], [0], [1], [0, 0, 1, 1], [], []>} : vector<2x32xf32>, vector<32x16xf32>, vector<2x16xf32> -> vector<2x16xf32>
    %260 = arith.addf %251, %259 : vector<2x16xf32>
    %c12 = arith.constant 12 : index
    %c0_115 = arith.constant 0 : index
    %261 = tpu.strided_load %arg15[%c12, %c0_115] {strides = array<i32: 32, 1>} : memref<64x32xf32, #tpu.memory_space<vmem>>, vector<2x32xf32>
    %262 = vector.broadcast %148 : vector<1x32xf32> to vector<2x32xf32>
    %263 = arith.mulf %261, %262 : vector<2x32xf32>
    %264 = vector.broadcast %151 : vector<1x32xf32> to vector<2x32xf32>
    %265 = arith.addf %263, %264 : vector<2x32xf32>
    %c12_116 = arith.constant 12 : index
    %c0_117 = arith.constant 0 : index
    %c0_118 = arith.constant 0 : index
    %266 = vector.load %arg12[%c12_116, %c0_117, %c0_118] : memref<32x32x16xf32, #tpu.memory_space<vmem>>, vector<1x32x16xf32>
    %267 = vector.shape_cast %266 : vector<1x32x16xf32> to vector<32x16xf32>
    %cst_119 = arith.constant dense<0.000000e+00> : vector<2x16xf32>
    %268 = tpu.matmul %265, %267, %cst_119 {dimension_numbers = #tpu.dot_dimension_numbers<[1], [0], [0], [1], [0, 0, 1, 1], [], []>} : vector<2x32xf32>, vector<32x16xf32>, vector<2x16xf32> -> vector<2x16xf32>
    %269 = arith.addf %260, %268 : vector<2x16xf32>
    %c13 = arith.constant 13 : index
    %c0_120 = arith.constant 0 : index
    %270 = tpu.strided_load %arg15[%c13, %c0_120] {strides = array<i32: 32, 1>} : memref<64x32xf32, #tpu.memory_space<vmem>>, vector<2x32xf32>
    %271 = vector.broadcast %148 : vector<1x32xf32> to vector<2x32xf32>
    %272 = arith.mulf %270, %271 : vector<2x32xf32>
    %273 = vector.broadcast %151 : vector<1x32xf32> to vector<2x32xf32>
    %274 = arith.addf %272, %273 : vector<2x32xf32>
    %c13_121 = arith.constant 13 : index
    %c0_122 = arith.constant 0 : index
    %c0_123 = arith.constant 0 : index
    %275 = vector.load %arg12[%c13_121, %c0_122, %c0_123] : memref<32x32x16xf32, #tpu.memory_space<vmem>>, vector<1x32x16xf32>
    %276 = vector.shape_cast %275 : vector<1x32x16xf32> to vector<32x16xf32>
    %cst_124 = arith.constant dense<0.000000e+00> : vector<2x16xf32>
    %277 = tpu.matmul %274, %276, %cst_124 {dimension_numbers = #tpu.dot_dimension_numbers<[1], [0], [0], [1], [0, 0, 1, 1], [], []>} : vector<2x32xf32>, vector<32x16xf32>, vector<2x16xf32> -> vector<2x16xf32>
    %278 = arith.addf %269, %277 : vector<2x16xf32>
    %c14 = arith.constant 14 : index
    %c0_125 = arith.constant 0 : index
    %279 = tpu.strided_load %arg15[%c14, %c0_125] {strides = array<i32: 32, 1>} : memref<64x32xf32, #tpu.memory_space<vmem>>, vector<2x32xf32>
    %280 = vector.broadcast %148 : vector<1x32xf32> to vector<2x32xf32>
    %281 = arith.mulf %279, %280 : vector<2x32xf32>
    %282 = vector.broadcast %151 : vector<1x32xf32> to vector<2x32xf32>
    %283 = arith.addf %281, %282 : vector<2x32xf32>
    %c14_126 = arith.constant 14 : index
    %c0_127 = arith.constant 0 : index
    %c0_128 = arith.constant 0 : index
    %284 = vector.load %arg12[%c14_126, %c0_127, %c0_128] : memref<32x32x16xf32, #tpu.memory_space<vmem>>, vector<1x32x16xf32>
    %285 = vector.shape_cast %284 : vector<1x32x16xf32> to vector<32x16xf32>
    %cst_129 = arith.constant dense<0.000000e+00> : vector<2x16xf32>
    %286 = tpu.matmul %283, %285, %cst_129 {dimension_numbers = #tpu.dot_dimension_numbers<[1], [0], [0], [1], [0, 0, 1, 1], [], []>} : vector<2x32xf32>, vector<32x16xf32>, vector<2x16xf32> -> vector<2x16xf32>
    %287 = arith.addf %278, %286 : vector<2x16xf32>
    %c15 = arith.constant 15 : index
    %c0_130 = arith.constant 0 : index
    %288 = tpu.strided_load %arg15[%c15, %c0_130] {strides = array<i32: 32, 1>} : memref<64x32xf32, #tpu.memory_space<vmem>>, vector<2x32xf32>
    %289 = vector.broadcast %148 : vector<1x32xf32> to vector<2x32xf32>
    %290 = arith.mulf %288, %289 : vector<2x32xf32>
    %291 = vector.broadcast %151 : vector<1x32xf32> to vector<2x32xf32>
    %292 = arith.addf %290, %291 : vector<2x32xf32>
    %c15_131 = arith.constant 15 : index
    %c0_132 = arith.constant 0 : index
    %c0_133 = arith.constant 0 : index
    %293 = vector.load %arg12[%c15_131, %c0_132, %c0_133] : memref<32x32x16xf32, #tpu.memory_space<vmem>>, vector<1x32x16xf32>
    %294 = vector.shape_cast %293 : vector<1x32x16xf32> to vector<32x16xf32>
    %cst_134 = arith.constant dense<0.000000e+00> : vector<2x16xf32>
    %295 = tpu.matmul %292, %294, %cst_134 {dimension_numbers = #tpu.dot_dimension_numbers<[1], [0], [0], [1], [0, 0, 1, 1], [], []>} : vector<2x32xf32>, vector<32x16xf32>, vector<2x16xf32> -> vector<2x16xf32>
    %296 = arith.addf %287, %295 : vector<2x16xf32>
    %c16 = arith.constant 16 : index
    %c0_135 = arith.constant 0 : index
    %297 = tpu.strided_load %arg15[%c16, %c0_135] {strides = array<i32: 32, 1>} : memref<64x32xf32, #tpu.memory_space<vmem>>, vector<2x32xf32>
    %298 = vector.broadcast %148 : vector<1x32xf32> to vector<2x32xf32>
    %299 = arith.mulf %297, %298 : vector<2x32xf32>
    %300 = vector.broadcast %151 : vector<1x32xf32> to vector<2x32xf32>
    %301 = arith.addf %299, %300 : vector<2x32xf32>
    %c16_136 = arith.constant 16 : index
    %c0_137 = arith.constant 0 : index
    %c0_138 = arith.constant 0 : index
    %302 = vector.load %arg12[%c16_136, %c0_137, %c0_138] : memref<32x32x16xf32, #tpu.memory_space<vmem>>, vector<1x32x16xf32>
    %303 = vector.shape_cast %302 : vector<1x32x16xf32> to vector<32x16xf32>
    %cst_139 = arith.constant dense<0.000000e+00> : vector<2x16xf32>
    %304 = tpu.matmul %301, %303, %cst_139 {dimension_numbers = #tpu.dot_dimension_numbers<[1], [0], [0], [1], [0, 0, 1, 1], [], []>} : vector<2x32xf32>, vector<32x16xf32>, vector<2x16xf32> -> vector<2x16xf32>
    %305 = arith.addf %296, %304 : vector<2x16xf32>
    %c17 = arith.constant 17 : index
    %c0_140 = arith.constant 0 : index
    %306 = tpu.strided_load %arg15[%c17, %c0_140] {strides = array<i32: 32, 1>} : memref<64x32xf32, #tpu.memory_space<vmem>>, vector<2x32xf32>
    %307 = vector.broadcast %148 : vector<1x32xf32> to vector<2x32xf32>
    %308 = arith.mulf %306, %307 : vector<2x32xf32>
    %309 = vector.broadcast %151 : vector<1x32xf32> to vector<2x32xf32>
    %310 = arith.addf %308, %309 : vector<2x32xf32>
    %c17_141 = arith.constant 17 : index
    %c0_142 = arith.constant 0 : index
    %c0_143 = arith.constant 0 : index
    %311 = vector.load %arg12[%c17_141, %c0_142, %c0_143] : memref<32x32x16xf32, #tpu.memory_space<vmem>>, vector<1x32x16xf32>
    %312 = vector.shape_cast %311 : vector<1x32x16xf32> to vector<32x16xf32>
    %cst_144 = arith.constant dense<0.000000e+00> : vector<2x16xf32>
    %313 = tpu.matmul %310, %312, %cst_144 {dimension_numbers = #tpu.dot_dimension_numbers<[1], [0], [0], [1], [0, 0, 1, 1], [], []>} : vector<2x32xf32>, vector<32x16xf32>, vector<2x16xf32> -> vector<2x16xf32>
    %314 = arith.addf %305, %313 : vector<2x16xf32>
    %c18 = arith.constant 18 : index
    %c0_145 = arith.constant 0 : index
    %315 = tpu.strided_load %arg15[%c18, %c0_145] {strides = array<i32: 32, 1>} : memref<64x32xf32, #tpu.memory_space<vmem>>, vector<2x32xf32>
    %316 = vector.broadcast %148 : vector<1x32xf32> to vector<2x32xf32>
    %317 = arith.mulf %315, %316 : vector<2x32xf32>
    %318 = vector.broadcast %151 : vector<1x32xf32> to vector<2x32xf32>
    %319 = arith.addf %317, %318 : vector<2x32xf32>
    %c18_146 = arith.constant 18 : index
    %c0_147 = arith.constant 0 : index
    %c0_148 = arith.constant 0 : index
    %320 = vector.load %arg12[%c18_146, %c0_147, %c0_148] : memref<32x32x16xf32, #tpu.memory_space<vmem>>, vector<1x32x16xf32>
    %321 = vector.shape_cast %320 : vector<1x32x16xf32> to vector<32x16xf32>
    %cst_149 = arith.constant dense<0.000000e+00> : vector<2x16xf32>
    %322 = tpu.matmul %319, %321, %cst_149 {dimension_numbers = #tpu.dot_dimension_numbers<[1], [0], [0], [1], [0, 0, 1, 1], [], []>} : vector<2x32xf32>, vector<32x16xf32>, vector<2x16xf32> -> vector<2x16xf32>
    %323 = arith.addf %314, %322 : vector<2x16xf32>
    %c19 = arith.constant 19 : index
    %c0_150 = arith.constant 0 : index
    %324 = tpu.strided_load %arg15[%c19, %c0_150] {strides = array<i32: 32, 1>} : memref<64x32xf32, #tpu.memory_space<vmem>>, vector<2x32xf32>
    %325 = vector.broadcast %148 : vector<1x32xf32> to vector<2x32xf32>
    %326 = arith.mulf %324, %325 : vector<2x32xf32>
    %327 = vector.broadcast %151 : vector<1x32xf32> to vector<2x32xf32>
    %328 = arith.addf %326, %327 : vector<2x32xf32>
    %c19_151 = arith.constant 19 : index
    %c0_152 = arith.constant 0 : index
    %c0_153 = arith.constant 0 : index
    %329 = vector.load %arg12[%c19_151, %c0_152, %c0_153] : memref<32x32x16xf32, #tpu.memory_space<vmem>>, vector<1x32x16xf32>
    %330 = vector.shape_cast %329 : vector<1x32x16xf32> to vector<32x16xf32>
    %cst_154 = arith.constant dense<0.000000e+00> : vector<2x16xf32>
    %331 = tpu.matmul %328, %330, %cst_154 {dimension_numbers = #tpu.dot_dimension_numbers<[1], [0], [0], [1], [0, 0, 1, 1], [], []>} : vector<2x32xf32>, vector<32x16xf32>, vector<2x16xf32> -> vector<2x16xf32>
    %332 = arith.addf %323, %331 : vector<2x16xf32>
    %c20 = arith.constant 20 : index
    %c0_155 = arith.constant 0 : index
    %333 = tpu.strided_load %arg15[%c20, %c0_155] {strides = array<i32: 32, 1>} : memref<64x32xf32, #tpu.memory_space<vmem>>, vector<2x32xf32>
    %334 = vector.broadcast %148 : vector<1x32xf32> to vector<2x32xf32>
    %335 = arith.mulf %333, %334 : vector<2x32xf32>
    %336 = vector.broadcast %151 : vector<1x32xf32> to vector<2x32xf32>
    %337 = arith.addf %335, %336 : vector<2x32xf32>
    %c20_156 = arith.constant 20 : index
    %c0_157 = arith.constant 0 : index
    %c0_158 = arith.constant 0 : index
    %338 = vector.load %arg12[%c20_156, %c0_157, %c0_158] : memref<32x32x16xf32, #tpu.memory_space<vmem>>, vector<1x32x16xf32>
    %339 = vector.shape_cast %338 : vector<1x32x16xf32> to vector<32x16xf32>
    %cst_159 = arith.constant dense<0.000000e+00> : vector<2x16xf32>
    %340 = tpu.matmul %337, %339, %cst_159 {dimension_numbers = #tpu.dot_dimension_numbers<[1], [0], [0], [1], [0, 0, 1, 1], [], []>} : vector<2x32xf32>, vector<32x16xf32>, vector<2x16xf32> -> vector<2x16xf32>
    %341 = arith.addf %332, %340 : vector<2x16xf32>
    %c21 = arith.constant 21 : index
    %c0_160 = arith.constant 0 : index
    %342 = tpu.strided_load %arg15[%c21, %c0_160] {strides = array<i32: 32, 1>} : memref<64x32xf32, #tpu.memory_space<vmem>>, vector<2x32xf32>
    %343 = vector.broadcast %148 : vector<1x32xf32> to vector<2x32xf32>
    %344 = arith.mulf %342, %343 : vector<2x32xf32>
    %345 = vector.broadcast %151 : vector<1x32xf32> to vector<2x32xf32>
    %346 = arith.addf %344, %345 : vector<2x32xf32>
    %c21_161 = arith.constant 21 : index
    %c0_162 = arith.constant 0 : index
    %c0_163 = arith.constant 0 : index
    %347 = vector.load %arg12[%c21_161, %c0_162, %c0_163] : memref<32x32x16xf32, #tpu.memory_space<vmem>>, vector<1x32x16xf32>
    %348 = vector.shape_cast %347 : vector<1x32x16xf32> to vector<32x16xf32>
    %cst_164 = arith.constant dense<0.000000e+00> : vector<2x16xf32>
    %349 = tpu.matmul %346, %348, %cst_164 {dimension_numbers = #tpu.dot_dimension_numbers<[1], [0], [0], [1], [0, 0, 1, 1], [], []>} : vector<2x32xf32>, vector<32x16xf32>, vector<2x16xf32> -> vector<2x16xf32>
    %350 = arith.addf %341, %349 : vector<2x16xf32>
    %c22 = arith.constant 22 : index
    %c0_165 = arith.constant 0 : index
    %351 = tpu.strided_load %arg15[%c22, %c0_165] {strides = array<i32: 32, 1>} : memref<64x32xf32, #tpu.memory_space<vmem>>, vector<2x32xf32>
    %352 = vector.broadcast %148 : vector<1x32xf32> to vector<2x32xf32>
    %353 = arith.mulf %351, %352 : vector<2x32xf32>
    %354 = vector.broadcast %151 : vector<1x32xf32> to vector<2x32xf32>
    %355 = arith.addf %353, %354 : vector<2x32xf32>
    %c22_166 = arith.constant 22 : index
    %c0_167 = arith.constant 0 : index
    %c0_168 = arith.constant 0 : index
    %356 = vector.load %arg12[%c22_166, %c0_167, %c0_168] : memref<32x32x16xf32, #tpu.memory_space<vmem>>, vector<1x32x16xf32>
    %357 = vector.shape_cast %356 : vector<1x32x16xf32> to vector<32x16xf32>
    %cst_169 = arith.constant dense<0.000000e+00> : vector<2x16xf32>
    %358 = tpu.matmul %355, %357, %cst_169 {dimension_numbers = #tpu.dot_dimension_numbers<[1], [0], [0], [1], [0, 0, 1, 1], [], []>} : vector<2x32xf32>, vector<32x16xf32>, vector<2x16xf32> -> vector<2x16xf32>
    %359 = arith.addf %350, %358 : vector<2x16xf32>
    %c23 = arith.constant 23 : index
    %c0_170 = arith.constant 0 : index
    %360 = tpu.strided_load %arg15[%c23, %c0_170] {strides = array<i32: 32, 1>} : memref<64x32xf32, #tpu.memory_space<vmem>>, vector<2x32xf32>
    %361 = vector.broadcast %148 : vector<1x32xf32> to vector<2x32xf32>
    %362 = arith.mulf %360, %361 : vector<2x32xf32>
    %363 = vector.broadcast %151 : vector<1x32xf32> to vector<2x32xf32>
    %364 = arith.addf %362, %363 : vector<2x32xf32>
    %c23_171 = arith.constant 23 : index
    %c0_172 = arith.constant 0 : index
    %c0_173 = arith.constant 0 : index
    %365 = vector.load %arg12[%c23_171, %c0_172, %c0_173] : memref<32x32x16xf32, #tpu.memory_space<vmem>>, vector<1x32x16xf32>
    %366 = vector.shape_cast %365 : vector<1x32x16xf32> to vector<32x16xf32>
    %cst_174 = arith.constant dense<0.000000e+00> : vector<2x16xf32>
    %367 = tpu.matmul %364, %366, %cst_174 {dimension_numbers = #tpu.dot_dimension_numbers<[1], [0], [0], [1], [0, 0, 1, 1], [], []>} : vector<2x32xf32>, vector<32x16xf32>, vector<2x16xf32> -> vector<2x16xf32>
    %368 = arith.addf %359, %367 : vector<2x16xf32>
    %c24 = arith.constant 24 : index
    %c0_175 = arith.constant 0 : index
    %369 = tpu.strided_load %arg15[%c24, %c0_175] {strides = array<i32: 32, 1>} : memref<64x32xf32, #tpu.memory_space<vmem>>, vector<2x32xf32>
    %370 = vector.broadcast %148 : vector<1x32xf32> to vector<2x32xf32>
    %371 = arith.mulf %369, %370 : vector<2x32xf32>
    %372 = vector.broadcast %151 : vector<1x32xf32> to vector<2x32xf32>
    %373 = arith.addf %371, %372 : vector<2x32xf32>
    %c24_176 = arith.constant 24 : index
    %c0_177 = arith.constant 0 : index
    %c0_178 = arith.constant 0 : index
    %374 = vector.load %arg12[%c24_176, %c0_177, %c0_178] : memref<32x32x16xf32, #tpu.memory_space<vmem>>, vector<1x32x16xf32>
    %375 = vector.shape_cast %374 : vector<1x32x16xf32> to vector<32x16xf32>
    %cst_179 = arith.constant dense<0.000000e+00> : vector<2x16xf32>
    %376 = tpu.matmul %373, %375, %cst_179 {dimension_numbers = #tpu.dot_dimension_numbers<[1], [0], [0], [1], [0, 0, 1, 1], [], []>} : vector<2x32xf32>, vector<32x16xf32>, vector<2x16xf32> -> vector<2x16xf32>
    %377 = arith.addf %368, %376 : vector<2x16xf32>
    %c25 = arith.constant 25 : index
    %c0_180 = arith.constant 0 : index
    %378 = tpu.strided_load %arg15[%c25, %c0_180] {strides = array<i32: 32, 1>} : memref<64x32xf32, #tpu.memory_space<vmem>>, vector<2x32xf32>
    %379 = vector.broadcast %148 : vector<1x32xf32> to vector<2x32xf32>
    %380 = arith.mulf %378, %379 : vector<2x32xf32>
    %381 = vector.broadcast %151 : vector<1x32xf32> to vector<2x32xf32>
    %382 = arith.addf %380, %381 : vector<2x32xf32>
    %c25_181 = arith.constant 25 : index
    %c0_182 = arith.constant 0 : index
    %c0_183 = arith.constant 0 : index
    %383 = vector.load %arg12[%c25_181, %c0_182, %c0_183] : memref<32x32x16xf32, #tpu.memory_space<vmem>>, vector<1x32x16xf32>
    %384 = vector.shape_cast %383 : vector<1x32x16xf32> to vector<32x16xf32>
    %cst_184 = arith.constant dense<0.000000e+00> : vector<2x16xf32>
    %385 = tpu.matmul %382, %384, %cst_184 {dimension_numbers = #tpu.dot_dimension_numbers<[1], [0], [0], [1], [0, 0, 1, 1], [], []>} : vector<2x32xf32>, vector<32x16xf32>, vector<2x16xf32> -> vector<2x16xf32>
    %386 = arith.addf %377, %385 : vector<2x16xf32>
    %c26 = arith.constant 26 : index
    %c0_185 = arith.constant 0 : index
    %387 = tpu.strided_load %arg15[%c26, %c0_185] {strides = array<i32: 32, 1>} : memref<64x32xf32, #tpu.memory_space<vmem>>, vector<2x32xf32>
    %388 = vector.broadcast %148 : vector<1x32xf32> to vector<2x32xf32>
    %389 = arith.mulf %387, %388 : vector<2x32xf32>
    %390 = vector.broadcast %151 : vector<1x32xf32> to vector<2x32xf32>
    %391 = arith.addf %389, %390 : vector<2x32xf32>
    %c26_186 = arith.constant 26 : index
    %c0_187 = arith.constant 0 : index
    %c0_188 = arith.constant 0 : index
    %392 = vector.load %arg12[%c26_186, %c0_187, %c0_188] : memref<32x32x16xf32, #tpu.memory_space<vmem>>, vector<1x32x16xf32>
    %393 = vector.shape_cast %392 : vector<1x32x16xf32> to vector<32x16xf32>
    %cst_189 = arith.constant dense<0.000000e+00> : vector<2x16xf32>
    %394 = tpu.matmul %391, %393, %cst_189 {dimension_numbers = #tpu.dot_dimension_numbers<[1], [0], [0], [1], [0, 0, 1, 1], [], []>} : vector<2x32xf32>, vector<32x16xf32>, vector<2x16xf32> -> vector<2x16xf32>
    %395 = arith.addf %386, %394 : vector<2x16xf32>
    %c27 = arith.constant 27 : index
    %c0_190 = arith.constant 0 : index
    %396 = tpu.strided_load %arg15[%c27, %c0_190] {strides = array<i32: 32, 1>} : memref<64x32xf32, #tpu.memory_space<vmem>>, vector<2x32xf32>
    %397 = vector.broadcast %148 : vector<1x32xf32> to vector<2x32xf32>
    %398 = arith.mulf %396, %397 : vector<2x32xf32>
    %399 = vector.broadcast %151 : vector<1x32xf32> to vector<2x32xf32>
    %400 = arith.addf %398, %399 : vector<2x32xf32>
    %c27_191 = arith.constant 27 : index
    %c0_192 = arith.constant 0 : index
    %c0_193 = arith.constant 0 : index
    %401 = vector.load %arg12[%c27_191, %c0_192, %c0_193] : memref<32x32x16xf32, #tpu.memory_space<vmem>>, vector<1x32x16xf32>
    %402 = vector.shape_cast %401 : vector<1x32x16xf32> to vector<32x16xf32>
    %cst_194 = arith.constant dense<0.000000e+00> : vector<2x16xf32>
    %403 = tpu.matmul %400, %402, %cst_194 {dimension_numbers = #tpu.dot_dimension_numbers<[1], [0], [0], [1], [0, 0, 1, 1], [], []>} : vector<2x32xf32>, vector<32x16xf32>, vector<2x16xf32> -> vector<2x16xf32>
    %404 = arith.addf %395, %403 : vector<2x16xf32>
    %c28 = arith.constant 28 : index
    %c0_195 = arith.constant 0 : index
    %405 = tpu.strided_load %arg15[%c28, %c0_195] {strides = array<i32: 32, 1>} : memref<64x32xf32, #tpu.memory_space<vmem>>, vector<2x32xf32>
    %406 = vector.broadcast %148 : vector<1x32xf32> to vector<2x32xf32>
    %407 = arith.mulf %405, %406 : vector<2x32xf32>
    %408 = vector.broadcast %151 : vector<1x32xf32> to vector<2x32xf32>
    %409 = arith.addf %407, %408 : vector<2x32xf32>
    %c28_196 = arith.constant 28 : index
    %c0_197 = arith.constant 0 : index
    %c0_198 = arith.constant 0 : index
    %410 = vector.load %arg12[%c28_196, %c0_197, %c0_198] : memref<32x32x16xf32, #tpu.memory_space<vmem>>, vector<1x32x16xf32>
    %411 = vector.shape_cast %410 : vector<1x32x16xf32> to vector<32x16xf32>
    %cst_199 = arith.constant dense<0.000000e+00> : vector<2x16xf32>
    %412 = tpu.matmul %409, %411, %cst_199 {dimension_numbers = #tpu.dot_dimension_numbers<[1], [0], [0], [1], [0, 0, 1, 1], [], []>} : vector<2x32xf32>, vector<32x16xf32>, vector<2x16xf32> -> vector<2x16xf32>
    %413 = arith.addf %404, %412 : vector<2x16xf32>
    %c29 = arith.constant 29 : index
    %c0_200 = arith.constant 0 : index
    %414 = tpu.strided_load %arg15[%c29, %c0_200] {strides = array<i32: 32, 1>} : memref<64x32xf32, #tpu.memory_space<vmem>>, vector<2x32xf32>
    %415 = vector.broadcast %148 : vector<1x32xf32> to vector<2x32xf32>
    %416 = arith.mulf %414, %415 : vector<2x32xf32>
    %417 = vector.broadcast %151 : vector<1x32xf32> to vector<2x32xf32>
    %418 = arith.addf %416, %417 : vector<2x32xf32>
    %c29_201 = arith.constant 29 : index
    %c0_202 = arith.constant 0 : index
    %c0_203 = arith.constant 0 : index
    %419 = vector.load %arg12[%c29_201, %c0_202, %c0_203] : memref<32x32x16xf32, #tpu.memory_space<vmem>>, vector<1x32x16xf32>
    %420 = vector.shape_cast %419 : vector<1x32x16xf32> to vector<32x16xf32>
    %cst_204 = arith.constant dense<0.000000e+00> : vector<2x16xf32>
    %421 = tpu.matmul %418, %420, %cst_204 {dimension_numbers = #tpu.dot_dimension_numbers<[1], [0], [0], [1], [0, 0, 1, 1], [], []>} : vector<2x32xf32>, vector<32x16xf32>, vector<2x16xf32> -> vector<2x16xf32>
    %422 = arith.addf %413, %421 : vector<2x16xf32>
    %c30 = arith.constant 30 : index
    %c0_205 = arith.constant 0 : index
    %423 = tpu.strided_load %arg15[%c30, %c0_205] {strides = array<i32: 32, 1>} : memref<64x32xf32, #tpu.memory_space<vmem>>, vector<2x32xf32>
    %424 = vector.broadcast %148 : vector<1x32xf32> to vector<2x32xf32>
    %425 = arith.mulf %423, %424 : vector<2x32xf32>
    %426 = vector.broadcast %151 : vector<1x32xf32> to vector<2x32xf32>
    %427 = arith.addf %425, %426 : vector<2x32xf32>
    %c30_206 = arith.constant 30 : index
    %c0_207 = arith.constant 0 : index
    %c0_208 = arith.constant 0 : index
    %428 = vector.load %arg12[%c30_206, %c0_207, %c0_208] : memref<32x32x16xf32, #tpu.memory_space<vmem>>, vector<1x32x16xf32>
    %429 = vector.shape_cast %428 : vector<1x32x16xf32> to vector<32x16xf32>
    %cst_209 = arith.constant dense<0.000000e+00> : vector<2x16xf32>
    %430 = tpu.matmul %427, %429, %cst_209 {dimension_numbers = #tpu.dot_dimension_numbers<[1], [0], [0], [1], [0, 0, 1, 1], [], []>} : vector<2x32xf32>, vector<32x16xf32>, vector<2x16xf32> -> vector<2x16xf32>
    %431 = arith.addf %422, %430 : vector<2x16xf32>
    %c31 = arith.constant 31 : index
    %c0_210 = arith.constant 0 : index
    %432 = tpu.strided_load %arg15[%c31, %c0_210] {strides = array<i32: 32, 1>} : memref<64x32xf32, #tpu.memory_space<vmem>>, vector<2x32xf32>
    %433 = vector.broadcast %148 : vector<1x32xf32> to vector<2x32xf32>
    %434 = arith.mulf %432, %433 : vector<2x32xf32>
    %435 = vector.broadcast %151 : vector<1x32xf32> to vector<2x32xf32>
    %436 = arith.addf %434, %435 : vector<2x32xf32>
    %c31_211 = arith.constant 31 : index
    %c0_212 = arith.constant 0 : index
    %c0_213 = arith.constant 0 : index
    %437 = vector.load %arg12[%c31_211, %c0_212, %c0_213] : memref<32x32x16xf32, #tpu.memory_space<vmem>>, vector<1x32x16xf32>
    %438 = vector.shape_cast %437 : vector<1x32x16xf32> to vector<32x16xf32>
    %cst_214 = arith.constant dense<0.000000e+00> : vector<2x16xf32>
    %439 = tpu.matmul %436, %438, %cst_214 {dimension_numbers = #tpu.dot_dimension_numbers<[1], [0], [0], [1], [0, 0, 1, 1], [], []>} : vector<2x32xf32>, vector<32x16xf32>, vector<2x16xf32> -> vector<2x16xf32>
    %440 = arith.addf %431, %439 : vector<2x16xf32>
    %c0_215 = arith.constant 0 : index
    %c0_216 = arith.constant 0 : index
    %441 = vector.load %arg13[%c0_215, %c0_216] : memref<1x16xf32, #tpu.memory_space<vmem>>, vector<1x16xf32>
    %442 = vector.broadcast %441 : vector<1x16xf32> to vector<2x16xf32>
    %443 = arith.addf %440, %442 : vector<2x16xf32>
    %cst_217 = arith.constant dense<0xFF800000> : vector<2xf32>
    %444 = vector.multi_reduction <maximumf>, %443, %cst_217 [1] : vector<2x16xf32> to vector<2xf32>
    %445 = vector.shape_cast %444 : vector<2xf32> to vector<2x1xf32>
    %446 = vector.broadcast %445 : vector<2x1xf32> to vector<2x16xf32>
    %447 = arith.subf %443, %446 : vector<2x16xf32>
    %448 = math.exp %447 : vector<2x16xf32>
    %cst_218 = arith.constant dense<0.000000e+00> : vector<2xf32>
    %449 = vector.multi_reduction <add>, %448, %cst_218 [1] : vector<2x16xf32> to vector<2xf32>
    %450 = vector.shape_cast %449 : vector<2xf32> to vector<2x1xf32>
    %451 = tpu.reciprocal %450 {approx = true} : vector<2x1xf32> -> vector<2x1xf32>
    %452 = vector.broadcast %451 : vector<2x1xf32> to vector<2x16xf32>
    %453 = arith.mulf %448, %452 : vector<2x16xf32>
    %c0_219 = arith.constant 0 : index
    %c0_220 = arith.constant 0 : index
    %454 = vector.load %arg14[%c0_219, %c0_220] : memref<2x16xf32, #tpu.memory_space<vmem>>, vector<2x16xf32>
    tpu.vector_store %arg14[%c0_219, %c0_220], %453 {strides = array<i32>} : memref<2x16xf32, #tpu.memory_space<vmem>>, vector<2x16xf32>,
    return
  }
  func.func @transform_0(%arg0: i32) -> (i32, i32) {
    %c0_i32 = arith.constant 0 : i32
    %c0_i32_0 = arith.constant 0 : i32
    %c0_i32_1 = arith.constant 0 : i32
    return %c0_i32, %c0_i32_0 : i32, i32
  }
  func.func @transform_1(%arg0: i32) -> (i32, i32) {
    %c0_i32 = arith.constant 0 : i32
    %c0_i32_0 = arith.constant 0 : i32
    %c0_i32_1 = arith.constant 0 : i32
    return %c0_i32, %c0_i32_0 : i32, i32
  }
  func.func @transform_2(%arg0: i32) -> (i32, i32) {
    %c0_i32 = arith.constant 0 : i32
    %c0_i32_0 = arith.constant 0 : i32
    %c0_i32_1 = arith.constant 0 : i32
    return %c0_i32, %c0_i32_0 : i32, i32
  }
  func.func @transform_3(%arg0: i32) -> (i32, i32) {
    %c0_i32 = arith.constant 0 : i32
    %c0_i32_0 = arith.constant 0 : i32
    %c0_i32_1 = arith.constant 0 : i32
    return %c0_i32, %c0_i32_0 : i32, i32
  }
  func.func @transform_4(%arg0: i32) -> (i32, i32) {
    %c0_i32 = arith.constant 0 : i32
    %c0_i32_0 = arith.constant 0 : i32
    %c0_i32_1 = arith.constant 0 : i32
    return %c0_i32, %c0_i32_0 : i32, i32
  }
  func.func @transform_5(%arg0: i32) -> (i32, i32) {
    %c0_i32 = arith.constant 0 : i32
    %c0_i32_0 = arith.constant 0 : i32
    %c0_i32_1 = arith.constant 0 : i32
    return %c0_i32, %c0_i32_0 : i32, i32
  }
  func.func @transform_6(%arg0: i32) -> (i32, i32) {
    %c0_i32 = arith.constant 0 : i32
    %c0_i32_0 = arith.constant 0 : i32
    %c0_i32_1 = arith.constant 0 : i32
    return %c0_i32, %c0_i32_0 : i32, i32
  }
  func.func @transform_7(%arg0: i32) -> (i32, i32) {
    %c0_i32 = arith.constant 0 : i32
    %c0_i32_0 = arith.constant 0 : i32
    %c0_i32_1 = arith.constant 0 : i32
    return %c0_i32, %c0_i32_0 : i32, i32
  }
  func.func @transform_8(%arg0: i32) -> (i32, i32) {
    %c0_i32 = arith.constant 0 : i32
    %c0_i32_0 = arith.constant 0 : i32
    %c0_i32_1 = arith.constant 0 : i32
    return %c0_i32, %c0_i32_0 : i32, i32
  }
  func.func @transform_9(%arg0: i32) -> (i32, i32) {
    %c0_i32 = arith.constant 0 : i32
    %c0_i32_0 = arith.constant 0 : i32
    %c0_i32_1 = arith.constant 0 : i32
    return %c0_i32, %c0_i32_0 : i32, i32
  }
  func.func @transform_10(%arg0: i32) -> (i32, i32) {
    %c0_i32 = arith.constant 0 : i32
    %c0_i32_0 = arith.constant 0 : i32
    %c0_i32_1 = arith.constant 0 : i32
    return %c0_i32, %c0_i32_0 : i32, i32
  }
  func.func @transform_11(%arg0: i32) -> (i32, i32, i32) {
    %c0_i32 = arith.constant 0 : i32
    %c0_i32_0 = arith.constant 0 : i32
    %c0_i32_1 = arith.constant 0 : i32
    %c0_i32_2 = arith.constant 0 : i32
    return %c0_i32, %c0_i32_0, %c0_i32_1 : i32, i32, i32
  }
  func.func @transform_12(%arg0: i32) -> (i32, i32) {
    %c0_i32 = arith.constant 0 : i32
    %c0_i32_0 = arith.constant 0 : i32
    %c0_i32_1 = arith.constant 0 : i32
    return %c0_i32, %c0_i32_0 : i32, i32
  }
  func.func @transform_13(%arg0: i32) -> (i32, i32) {
    %c0_i32 = arith.constant 0 : i32
    %c0_i32_0 = arith.constant 0 : i32
    %c0_i32_1 = arith.constant 0 : i32
    return %c0_i32, %c0_i32_0 : i32, i32
  }
}

</mosaic_0001>

<bundles_post_ra>
// kernel: tpu_custom_call.1
= control target key start
LH: loop header
LB: loop body
LE: loop exit
PB: predicated region body
PF: predicated region fallthrough
CT: control target
= control target key end

     0   :  { %vm54_vm0 = vcmask 64512   ;;  %v6547_v2 = vmov 0.0   ;;  %vm4894_vm1 = vmmov 0   ;;  %vm426_vm2 = vcmask 261120   ;;  %s6533_s0 = inlined_call_operand.vmem [shape: f32[2,8], index: 0, kind: input, shape index: {}]   ;;  %s6534_s1 = inlined_call_operand.vmem [shape: f32[8,32], index: 1, kind: input, shape index: {}]   ;;  %s6535_s2 = inlined_call_operand.vmem [shape: f32[1,32], index: 2, kind: input, shape index: {}]   ;;  %s6536_s3 = inlined_call_operand.vmem [shape: f32[1,32], index: 3, kind: input, shape index: {}]   ;;  %s6537_s4 = inlined_call_operand.vmem [shape: f32[1,32], index: 4, kind: input, shape index: {}]   ;;  %s6538_s5 = inlined_call_operand.vmem [shape: f32[96,32], index: 5, kind: input, shape index: {}]   ;;  %s6539_s6 = inlined_call_operand.vmem [shape: f32[96,1], index: 6, kind: input, shape index: {}]   ;;  %s6540_s7 = inlined_call_operand.vmem [shape: f32[96,1], index: 7, kind: input, shape index: {}]   ;;  %s6541_s8 = inlined_call_operand.vmem [shape: f32[96,1], index: 8, kind: input, shape index: {}]   ;;  %s6542_s9 = inlined_call_operand.vmem [shape: f32[1,32], index: 9, kind: input, shape index: {}]   ;;  %s6543_s10 = inlined_call_operand.vmem [shape: f32[1,32], index: 10, kind: input, shape index: {}]   ;;  %s6544_s11 = inlined_call_operand.vmem [shape: f32[32,32,16], index: 11, kind: input, shape index: {}]   ;;  %s6545_s12 = inlined_call_operand.vmem [shape: f32[1,16], index: 12, kind: input, shape index: {}]   ;;  %s6546_s13 = inlined_call_operand.hbm [shape: f32[2,16], index: 13, kind: output, shape index: {}]  }
   0x1   :  { %v46_v0 = vld [vmem:[%s6534_s1] sm:$0xff]  ;;  %4171 = vmatprep.subr.mxu1 %v6547_v2  ;;  %4173 = vmatprep.mubr.msk.f32.mxu1 %vm4894_vm1, %v6547_v2  ;;  %v4895_v4 = vmov 0   ;;  %v4986_v5 = vld [vmem:[%s6538_s5 + $0x8] sm:$0xff]  ;;  %v4991_v6 = vld [vmem:[%s6538_s5 + $0x10] sm:$0xff] }
   0x2   :  { %v45_v1 = vld [vmem:[%s6533_s0] sm:$0x3]  ;;  %4172 = vmatpush3.msra.mxu1 %v46_v0  ;;  %4780 = vset.pattern.permute.xlu1 %v4895_v4  ;;  %v195_v9 = vld [vmem:[%s6540_s7 + $0x8] sm:$0xff]  ;;  %v5013_v11 = vld [vmem:[%s6538_s5 + $0x18] sm:$0xff] }
   0x3   :  { %v170_v3 = vld [vmem:[%s6538_s5] sm:$0xff]  ;;  %4174 = vmatmul.mubr.msk.f32.vlgmr.msra.gmra.mrb[0].mxu1 %vm54_vm0, %v45_v1  ;;  %4176 = vmatprep.subr.mxu1 %v6547_v2  ;;  %v183_v10 = vld [vmem:[%s6539_s6 + $0x8] sm:$0xff]  ;;  %v5038_v16 = vld [vmem:[%s6538_s5 + $0x30] sm:$0xff] }
   0x4   :  { %4177 = vmatpush3.msra.mxu1 %v6547_v2  ;;  %4178 = vmatprep.mubr.msk.f32.mxu1 %vm426_vm2, %v170_v3  ;;  %v194_v7 = vld [vmem:[%s6540_s7] sm:$0xff]  ;;  %v207_v13 = vld [vmem:[%s6541_s8 + $0x8] sm:$0xff]  ;;  %v185_v17 = vld [vmem:[%s6539_s6 + $0x18] sm:$0xff] }
   0x5   :  { %4779 = vset.pattern.permute.xlu0 %v4895_v4  ;;  %v182_v8 = vld [vmem:[%s6539_s6] sm:$0xff]  ;;  %4204 = vmatprep.mubr.msk.f32.mxu0 %vm426_vm2, %v170_v3  ;;  %v5033_v15 = vld [vmem:[%s6538_s5 + $0x28] sm:$0xff]  ;;  %v184_v18 = vld [vmem:[%s6539_s6 + $0x10] sm:$0xff] }
   0x6   :  { %296 = vperm.xlu1 %4780, %v194_v7   ;;  %220 = vperm.xlu0 %4779, %v182_v8   ;;  %v5018_v12 = vld [vmem:[%s6538_s5 + $0x20] sm:$0xff]  ;;  %v5053_v19 = vld [vmem:[%s6538_s5 + $0x38] sm:$0xff] }
   0x7   :  { %4179 = vmatmul.mubr.msk.f32.vlgmr.msra.gmra.mrb[2].mxu1 %vm426_vm2, %v4986_v5  ;;  %v206_v14 = vld [vmem:[%s6541_s8] sm:$0xff] }
   0x8   :  { %4181 = vmatprep.mubr.msk.f32.mxu1 %vm426_vm2, %v4991_v6  ;;  %v5058_v20 = vld [vmem:[%s6538_s5 + $0x40] sm:$0xff] }
   0xa   :  { %301 = vperm.xlu1 %4780, %v195_v9   ;;  %225 = vperm.xlu0 %4779, %v183_v10  }
   0xb   :  { %4182 = vmatmul.mubr.msk.f32.gmra.mrb[4].mxu1 %vm426_vm2, %v5013_v11 }
   0xc   :  { %4184 = vmatprep.mubr.msk.f32.mxu1 %vm426_vm2, %v5018_v12 }
   0xe   :  { %373 = vperm.xlu1 %4780, %v207_v13   ;;  %368 = vperm.xlu0 %4779, %v206_v14  }
   0xf   :  { %4185 = vmatmul.mubr.msk.f32.gmra.mrb[6].mxu1 %vm426_vm2, %v5033_v15 }
  0x10   :  { %4187 = vmatprep.mubr.msk.f32.mxu1 %vm426_vm2, %v5038_v16 }
  0x11   :  { %18 = vsyncpa [#allocation4], 0  ;;  %v197_v21 = vld [vmem:[%s6540_s7 + $0x18] sm:$0xff]  ;;  %v196_v22 = vld [vmem:[%s6540_s7 + $0x10] sm:$0xff]  ;;  %vm131_vm4 = vcmask 254976   ;;  %vm3752_vm13 = vcmask 123904  }
  0x12   :  { %235 = vperm.xlu1 %4780, %v185_v17   ;;  %230 = vperm.xlu0 %4779, %v184_v18   ;;  %v5073_v23 = vld [vmem:[%s6538_s5 + $0x48] sm:$0xff]  ;;  %v5078_v24 = vld [vmem:[%s6538_s5 + $0x50] sm:$0xff]  ;;  %v209_v25 = vld [vmem:[%s6541_s8 + $0x18] sm:$0xff]  ;;  %s4897_s19 = smov [#allocation3]  }
  0x13   :  { %4188 = vmatmul.mubr.msk.f32.gmra.mrb[8].mxu1 %vm426_vm2, %v5053_v19  ;;  %v208_v26 = vld [vmem:[%s6541_s8 + $0x10] sm:$0xff]  ;;  %v5093_v27 = vld [vmem:[%s6538_s5 + $0x58] sm:$0xff]  ;;  %v187_v28 = vld [vmem:[%s6539_s6 + $0x28] sm:$0xff]  ;;  %s3771_s20 = sshll.u32 %s4897_s19, 4  ;;  %s3772_s20 = int_to_ptr.vmem [resolvable:$true] %s3771_s20 }
  0x14   :  { %4190 = vmatprep.mubr.msk.f32.mxu1 %vm426_vm2, %v5058_v20  ;;  %v186_v29 = vld [vmem:[%s6539_s6 + $0x20] sm:$0xff]  ;;  %v199_v30 = vld [vmem:[%s6540_s7 + $0x28] sm:$0xff]  ;;  %v189_v34 = vld [vmem:[%s6539_s6 + $0x38] sm:$0xff]  ;;  %p4874_p1 = scmp.lt.s32.totalorder %s3772_s20, %s3772_s20 }
  0x15   :  { %v198_v31 = vld [vmem:[%s6540_s7 + $0x20] sm:$0xff]  ;;  %v211_v32 = vld [vmem:[%s6541_s8 + $0x28] sm:$0xff]  ;;  %v188_v35 = vld [vmem:[%s6539_s6 + $0x30] sm:$0xff] }
  0x16   :  { %311 = vperm.xlu1 %4780, %v197_v21   ;;  %306 = vperm.xlu0 %4779, %v196_v22   ;;  %v210_v33 = vld [vmem:[%s6541_s8 + $0x20] sm:$0xff]  ;;  %v201_v36 = vld [vmem:[%s6540_s7 + $0x38] sm:$0xff]  ;;  %v200_v37 = vld [vmem:[%s6540_s7 + $0x30] sm:$0xff] }
  0x17   :  { %4191 = vmatmul.mubr.msk.f32.gmra.mrb[10].mxu1 %vm426_vm2, %v5073_v23  ;;  %v213_v38 = vld [vmem:[%s6541_s8 + $0x38] sm:$0xff]  ;;  %v212_v39 = vld [vmem:[%s6541_s8 + $0x30] sm:$0xff]  ;;  %v191_v40 = vld [vmem:[%s6539_s6 + $0x48] sm:$0xff] }
  0x18   :  { %4193 = vmatprep.mubr.msk.f32.mxu1 %vm426_vm2, %v5078_v24  ;;  %v190_v41 = vld [vmem:[%s6539_s6 + $0x40] sm:$0xff]  ;;  %v215_v42 = vld [vmem:[%s6541_s8 + $0x48] sm:$0xff]  ;;  %v193_v46 = vld [vmem:[%s6539_s6 + $0x58] sm:$0xff] }
  0x19   :  { %v214_v43 = vld [vmem:[%s6541_s8 + $0x40] sm:$0xff]  ;;  %v203_v44 = vld [vmem:[%s6540_s7 + $0x48] sm:$0xff]  ;;  %v192_v47 = vld [vmem:[%s6539_s6 + $0x50] sm:$0xff] }
  0x1a   :  { %383 = vperm.xlu1 %4780, %v209_v25   ;;  %378 = vperm.xlu0 %4779, %v208_v26   ;;  %v202_v45 = vld [vmem:[%s6540_s7 + $0x40] sm:$0xff]  ;;  %v217_v48 = vld [vmem:[%s6541_s8 + $0x58] sm:$0xff]  ;;  %v216_v49 = vld [vmem:[%s6541_s8 + $0x50] sm:$0xff] }
  0x1b   :  { %4194 = vmatmul.mubr.msk.f32.gmra.mrb[12].mxu1 %vm426_vm2, %v5093_v27  ;;  %v205_v50 = vld [vmem:[%s6540_s7 + $0x58] sm:$0xff]  ;;  %v204_v51 = vld [vmem:[%s6540_s7 + $0x50] sm:$0xff]  ;;  %v3779_v54 = vld [vmem:[%s6535_s2] ss:$0 sm:$0xff] }
  0x1c   :  { %4230 = vmatprep.mubr.msk.f32.mxu1 %vm4894_vm1, %v6547_v2 }
  0x1e   :  { %245 = vperm.xlu1 %4780, %v187_v28   ;;  %240 = vperm.xlu0 %4779, %v186_v29  }
  0x22   :  { %321 = vperm.xlu1 %4780, %v199_v30   ;;  %316 = vperm.xlu0 %4779, %v198_v31  }
  0x26   :  { %393 = vperm.xlu1 %4780, %v211_v32   ;;  %388 = vperm.xlu0 %4779, %v210_v33  }
  0x2a   :  { %255 = vperm.xlu1 %4780, %v189_v34   ;;  %250 = vperm.xlu0 %4779, %v188_v35  }
  0x2e   :  { %331 = vperm.xlu1 %4780, %v201_v36   ;;  %326 = vperm.xlu0 %4779, %v200_v37  }
  0x32   :  { %403 = vperm.xlu1 %4780, %v213_v38   ;;  %398 = vperm.xlu0 %4779, %v212_v39  }
  0x36   :  { %265 = vperm.xlu1 %4780, %v191_v40   ;;  %260 = vperm.xlu0 %4779, %v190_v41  }
  0x3a   :  { %413 = vperm.xlu1 %4780, %v215_v42   ;;  %408 = vperm.xlu0 %4779, %v214_v43  }
  0x3e   :  { %341 = vperm.xlu1 %4780, %v203_v44   ;;  %336 = vperm.xlu0 %4779, %v202_v45  }
  0x42   :  { %275 = vperm.xlu1 %4780, %v193_v46   ;;  %270 = vperm.xlu0 %4779, %v192_v47  }
  0x46   :  { %423 = vperm.xlu1 %4780, %v217_v48   ;;  %418 = vperm.xlu0 %4779, %v216_v49  }
  0x4a   :  { %351 = vperm.xlu1 %4780, %v205_v50   ;;  %346 = vperm.xlu0 %4779, %v204_v51  }
  0x85   :  { %v5171_v52 = vpop.permute.xlu1 %296  ;;  %v5173_v53 = vpop.permute.xlu0 %220 }
  0x89   :  { %v5178_v55 = vpop.permute.xlu1 %301  ;;  %v5180_v56 = vpop.permute.xlu0 %225 }
  0x8d   :  { %v5184_v62 = vpop.permute.xlu1 %373  ;;  %v5188_v1 = vpop.permute.xlu0 %368 }
  0x91   :  { %v5193_v10 = vpop.permute.xlu1 %235  ;;  %v5195_v14 = vpop.permute.xlu0 %230 }
  0x95   :  { %v5201_v26 = vpop.permute.xlu1 %311  ;;  %v5205_v30 = vpop.permute.xlu0 %306 }
  0x99   :  { %v5211_v35 = vpop.permute.xlu1 %383  ;;  %v5213_v37 = vpop.permute.xlu0 %378 }
  0x9d   :  { %v5220_v43 = vpop.permute.xlu1 %245  ;;  %v5222_v44 = vpop.permute.xlu0 %240 }
  0xa1   :  { %v5224_v48 = vpop.permute.xlu1 %321  ;;  %v5226_v49 = vpop.permute.xlu0 %316 }
  0xd6   :  { %v124_v57 = vpop.f32.mrb[0].mxu1 }
  0xd7   :  { %v125_v58 = vadd.f32 %v3779_v54, %v124_v57  ;;  %v4175_v59 = vpop.f32.mrb[1].mxu1  ;;  %v5228_v57 = vpop.permute.xlu1 %393 }
  0xd8   :  { %6584 = vst [vmem:[#allocation6_spill] sm:$0xff] %v5228_v57 }
  0xd9   :  { %vm128_vm3 = vcmp.gt.f32.partialorder %v125_v58, 0.0  ;;  %v129_v60 = vmul.f32 0.2, %v125_v58 }
  0xda   :  { %v5182_v61 = vpop.f32.mrb[2].mxu1 }
  0xdb   :  { %v130_v63 = vsel %vm128_vm3, %v125_v58, %v129_v60  ;;  %v5186_v0 = vpop.f32.mrb[3].mxu1  ;;  %v5230_v58 = vpop.permute.xlu0 %388  ;;  %v278_v60 = vlaneseq }
  0xdc   :  { %v132_v3 = vsel %vm131_vm4, %v130_v63, 0.0  ;;  %6585 = vst [vmem:[#allocation7_spill] sm:$0xff] %v5230_v58  ;;  %v5232_v59 = vpop.permute.xlu1 %255 }
  0xdd   :  { %v133_v4 = vrot.slane %v132_v3, 4 }
  0xde   :  { %v5191_v7 = vpop.f32.mrb[4].mxu1 }
  0xdf   :  { %v134_v8 = vadd.f32 %v133_v4, %v132_v3  ;;  %v539_v9 = vpop.f32.mrb[5].mxu1  ;;  %v279_v3 = vshrl.u32 %v278_v60, 7  ;;  %v530_v60 = vadd.f32 %v5186_v0, %v5188_v1 }
  0xe1   :  { %v135_v13 = vrot.slane %v134_v8, 2 }
  0xe2   :  { %v4186_v17 = vpop.f32.mrb[6].mxu1 }
  0xe3   :  { %v136_v18 = vadd.f32 %v135_v13, %v134_v8  ;;  %v5197_v21 = vpop.f32.mrb[7].mxu1  ;;  %v3781_v8 = vld [vmem:[%s6536_s3] ss:$0 sm:$0xff]  ;;  %v5239_v13 = vpop.permute.xlu1 %331 }
  0xe5   :  { %v137_v22 = vrot.slane %v136_v18, 1 }
  0xe6   :  { %v5199_v25 = vpop.f32.mrb[8].mxu1 }
  0xe7   :  { %v138_v28 = vadd.f32 %v137_v22, %v136_v18  ;;  %v5203_v29 = vpop.f32.mrb[9].mxu1 }
  0xe9   :  { %v140_v31 = vmul.f32 0.5, %v138_v28  ;;  %v3782_v28 = vld [vmem:[%s6537_s4] ss:$0 sm:$0xff] }
  0xea   :  { %v5207_v32 = vpop.f32.mrb[10].mxu1 }
  0xeb   :  { %v141_v33 = vsub.f32 %v130_v63, %v140_v31  ;;  %v5209_v34 = vpop.f32.mrb[11].mxu1  ;;  %v5234_v63 = vpop.permute.xlu0 %250 }
  0xec   :  { %6586 = vst [vmem:[#allocation8_spill] sm:$0xff] %v5234_v63 }
  0xed   :  { %v142_v36 = vmul.f32 %v141_v33, %v141_v33 }
  0xee   :  { %v5215_v38 = vpop.f32.mrb[12].mxu1 }
  0xef   :  { %v143_v39 = vsel %vm131_vm4, %v142_v36, 0.0  ;;  %v5218_v40 = vpop.f32.mrb[13].mxu1  ;;  %v5241_v22 = vpop.permute.xlu0 %326  ;;  %v5246_v36 = vsub.s32 0, %v279_v3 }
  0xf0   :  { %v144_v41 = vrot.slane %v143_v39, 4 }
  0xf1   :  { %6587 = vst [vmem:[#allocation9_spill] sm:$0xff] %v5246_v36 }
  0xf2   :  { %v145_v42 = vadd.f32 %v144_v41, %v143_v39  ;;  %v722_v39 = vsub.s32 1, %v279_v3  ;;  %v545_v3 = vadd.f32 %v5191_v7, %v5211_v35  ;;  %v550_v7 = vadd.f32 %v5197_v21, %v5230_v58 }
  0xf4   :  { %v146_v45 = vrot.slane %v145_v42, 2 }
  0xf6   :  { %v147_v46 = vadd.f32 %v146_v45, %v145_v42 }
  0xf8   :  { %v148_v47 = vrot.slane %v147_v46, 1 }
  0xfa   :  { %v149_v50 = vadd.f32 %v148_v47, %v147_v46  ;;  %v5253_v46 = vpop.permute.xlu1 %403  ;;  %v5255_v47 = vpop.permute.xlu0 %398 }
  0xfb   :  { %6588 = vst [vmem:[#allocation10_spill] sm:$0xff] %v5253_v46 }
  0xfc   :  { %v150_v51 = vmul.f32 0.5, %v149_v50 }
  0xfe   :  { %v151_v54 = vadd.f32 1e-05, %v150_v51 }
 0x100   :  { %4781 = vrsqrt.f32 %v151_v54  ;;  %v535_v54 = vadd.f32 %v5182_v61, %v5184_v62 }
 0x10a   :  { %v4782_v4 = vpop.eup %4781 }
 0x10b   :  { %v153_v18 = vmul.f32 %v4782_v4, %v141_v33  ;;  %v540_v4 = vadd.f32 %v539_v9, %v5213_v37  ;;  %v565_v9 = vadd.f32 %v5199_v25, %v5253_v46 }
 0x10d   :  { %v161_v31 = vmul.f32 %v3781_v8, %v153_v18 }
 0x10f   :  { %v169_v41 = vadd.f32 %v3782_v28, %v161_v31  ;;  %v555_v31 = vadd.f32 %v4186_v17, %v5228_v57 }
 0x111   :  { %v5249_v42 = vrot.slane %v169_v41, %v5246_v36  ;;  %v5251_v45 = vrot.slane %v169_v41, %v722_v39  ;;  %v5274_v39 = vpop.permute.xlu1 %265  ;;  %v5284_v41 = vpop.permute.xlu0 %260 }
 0x113   :  { %v283_v33 = vmul.f32 %v5249_v42, %v5180_v56  ;;  %v282_v50 = vmul.f32 %v5249_v42, %v5173_v53  ;;  %v285_v51 = vmul.f32 %v5249_v42, %v5193_v10  ;;  %v284_v61 = vmul.f32 %v5249_v42, %v5195_v14 }
 0x114   :  { %v287_v0 = vmul.f32 %v5249_v42, %v5220_v43  ;;  %v286_v17 = vmul.f32 %v5249_v42, %v5222_v44  ;;  %v289_v57 = vmul.f32 %v5249_v42, %v5232_v59  ;;  %v288_v21 = vmul.f32 %v5249_v42, %v5234_v63 }
 0x115   :  { %v355_v8 = vadd.f32 %v5178_v55, %v283_v33  ;;  %v354_v18 = vadd.f32 %v5171_v52, %v282_v50  ;;  %v357_v28 = vadd.f32 %v5201_v26, %v285_v51  ;;  %v356_v2 = vadd.f32 %v5205_v30, %v284_v61 }
 0x116   :  { %v359_v36 = vadd.f32 %v5224_v48, %v287_v0  ;;  %v560_v61 = vadd.f32 %v5203_v29, %v5255_v47  ;;  %v5299_v0 = vpop.permute.xlu1 %413 }
 0x117   :  { %v589_v33 = vadd.f32 %v535_v54, %v355_v8  ;;  %v588_v50 = vadd.f32 %v530_v60, %v354_v18  ;;  %v591_v51 = vadd.f32 %v545_v3, %v357_v28  ;;  %v358_v54 = vadd.f32 %v5226_v49, %v286_v17  ;;  %6589 = vst [vmem:[#allocation11_spill] sm:$0xff] %v5299_v0 }
 0x118   :  { %v590_v60 = vadd.f32 %v540_v4, %v356_v2  ;;  %v617_v3 = vadd.f32 %v555_v31, %v359_v36  ;;  %v361_v8 = vadd.f32 %v5239_v13, %v289_v57  ;;  %v360_v18 = vadd.f32 %v5241_v22, %v288_v21 }
 0x119   :  { %v3796_v58 = vmul.f32 -1.442695, %v589_v33  ;;  %v3795_v25 = vmul.f32 -1.442695, %v588_v50  ;;  %v3798_v46 = vmul.f32 -1.442695, %v591_v51  ;;  %v616_v28 = vadd.f32 %v550_v7, %v358_v54  ;;  %v5301_v50 = vpop.permute.xlu0 %408 }
 0x11a   :  { %v3797_v63 = vmul.f32 -1.442695, %v590_v60  ;;  %v619_v33 = vadd.f32 %v565_v9, %v361_v8  ;;  %v618_v51 = vadd.f32 %v560_v61, %v360_v18  ;;  %v3800_v2 = vmul.f32 -1.442695, %v617_v3  ;;  %v5303_v31 = vpop.permute.xlu1 %341 }
 0x11b   :  { %4783 = vpow2.f32 %v3796_v58  ;;  %v3799_v36 = vmul.f32 -1.442695, %v616_v28 }
 0x11c   :  { %4785 = vpow2.f32 %v3795_v25  ;;  %v3802_v57 = vmul.f32 -1.442695, %v619_v33  ;;  %v3801_v4 = vmul.f32 -1.442695, %v618_v51  ;;  %v291_v33 = vmul.f32 %v5249_v42, %v5274_v39 }
 0x11d   :  { %4787 = vpow2.f32 %v3798_v46  ;;  %v5305_v58 = vpop.permute.xlu0 %336 }
 0x11e   :  { %4789 = vpow2.f32 %v3797_v63  ;;  %v5307_v25 = vpop.permute.xlu1 %275 }
 0x11f   :  { %4791 = vpow2.f32 %v3800_v2  ;;  %6590 = vst [vmem:[#allocation12_spill] sm:$0xff] %v5307_v25 }
 0x120   :  { %4793 = vpow2.f32 %v3799_v36  ;;  %v290_v36 = vmul.f32 %v5249_v42, %v5284_v41 }
 0x121   :  { %4795 = vpow2.f32 %v3802_v57  ;;  %v5309_v54 = vpop.permute.xlu0 %270 }
 0x122   :  { %4797 = vpow2.f32 %v3801_v4  ;;  %6591 = vst [vmem:[#allocation13_spill] sm:$0xff] %v5309_v54  ;;  %v5311_v28 = vpop.permute.xlu1 %423  ;;  %v293_v4 = vmul.f32 %v5249_v42, %v5307_v25  ;;  %v362_v25 = vadd.f32 %v5305_v58, %v290_v36 }
 0x125   :  { %v4784_v29 = vpop.eup %4783  ;;  %v5315_v2 = vpop.permute.xlu0 %418 }
 0x126   :  { %v4786_v7 = vpop.eup %4785  ;;  %v605_v9 = vadd.f32 1.0, %v4784_v29 }
 0x127   :  { %v4788_v17 = vpop.eup %4787  ;;  %v604_v21 = vadd.f32 1.0, %v4786_v7  ;;  %v575_v7 = vadd.f32 %v5207_v32, %v5299_v0  ;;  %v5331_v0 = vpop.permute.xlu1 %351 }
 0x128   :  { %v4790_v46 = vpop.eup %4789  ;;  %4799 = vrcp.f32 %v605_v9  ;;  %v607_v63 = vadd.f32 1.0, %v4788_v17  ;;  %v292_v17 = vmul.f32 %v5249_v42, %v5309_v54  ;;  %v580_v42 = vadd.f32 %v5218_v40, %v5315_v2 }
 0x129   :  { %4801 = vrcp.f32 %v604_v21  ;;  %v606_v60 = vadd.f32 1.0, %v4790_v46  ;;  %v4792_v3 = vpop.eup %4791  ;;  %v570_v46 = vadd.f32 %v5209_v34, %v5301_v50 }
 0x12a   :  { %4803 = vrcp.f32 %v607_v63  ;;  %v4794_v8 = vpop.eup %4793  ;;  %v633_v51 = vadd.f32 1.0, %v4792_v3 }
 0x12b   :  { %4805 = vrcp.f32 %v606_v60  ;;  %v4796_v18 = vpop.eup %4795  ;;  %v632_v57 = vadd.f32 1.0, %v4794_v8  ;;  %v363_v60 = vadd.f32 %v5303_v31, %v291_v33  ;;  %v585_v8 = vadd.f32 %v5215_v38, %v5311_v28 }
 0x12c   :  { %v4798_v61 = vpop.eup %4797  ;;  %v635_v29 = vadd.f32 1.0, %v4796_v18  ;;  %4807 = vrcp.f32 %v633_v51  ;;  %v365_v33 = vadd.f32 %v5331_v0, %v293_v4  ;;  %v5336_v51 = vpop.permute.xlu0 %346 }
 0x12d   :  { %v634_v21 = vadd.f32 1.0, %v4798_v61  ;;  %4809 = vrcp.f32 %v632_v57  ;;  %6592 = vst [vmem:[#allocation14_spill] sm:$0xff] %v5336_v51 }
 0x12e   :  { %4811 = vrcp.f32 %v635_v29 }
 0x12f   :  { %4813 = vrcp.f32 %v634_v21 }
 0x132   :  { %v4800_v9 = vpop.eup %4799 }
 0x133   :  { %v4802_v63 = vpop.eup %4801  ;;  %v645_v3 = vmul.f32 %v4800_v9, %v575_v7  ;;  %v364_v7 = vadd.f32 %v5336_v51, %v292_v17 }
 0x134   :  { %v4804_v18 = vpop.eup %4803  ;;  %v644_v32 = vmul.f32 %v4802_v63, %v570_v46 }
 0x135   :  { %v4806_v61 = vpop.eup %4805  ;;  %v649_v34 = vadd.f32 %v645_v3, %v363_v60  ;;  %v647_v54 = vmul.f32 %v4804_v18, %v585_v8 }
 0x136   :  { %v648_v38 = vadd.f32 %v644_v32, %v362_v25  ;;  %v646_v36 = vmul.f32 %v4806_v61, %v580_v42  ;;  %v4808_v40 = vpop.eup %4807 }
 0x137   :  { %4815 = vtanh.f32 %v649_v34  ;;  %v651_v57 = vadd.f32 %v647_v54, %v365_v33  ;;  %v4810_v46 = vpop.eup %4809  ;;  %v657_v60 = vsub.f32 1.0, %v4808_v40  ;;  %v665_v25 = vmul.f32 0.0, %v4808_v40 }
 0x138   :  { %4817 = vtanh.f32 %v648_v38  ;;  %v650_v9 = vadd.f32 %v646_v36, %v364_v7  ;;  %v4812_v29 = vpop.eup %4811  ;;  %v656_v4 = vsub.f32 1.0, %v4810_v46  ;;  %v664_v61 = vmul.f32 0.0, %v4810_v46 }
 0x139   :  { %4819 = vtanh.f32 %v651_v57  ;;  %v4814_v63 = vpop.eup %4813  ;;  %v659_v18 = vsub.f32 1.0, %v4812_v29  ;;  %v667_v34 = vmul.f32 0.0, %v4812_v29 }
 0x13a   :  { %4821 = vtanh.f32 %v650_v9  ;;  %v658_v17 = vsub.f32 1.0, %v4814_v63  ;;  %v666_v7 = vmul.f32 0.0, %v4814_v63 }
 0x141   :  { %v4816_v3 = vpop.eup %4815 }
 0x142   :  { %v4818_v8 = vpop.eup %4817  ;;  %v661_v21 = vmul.f32 %v4816_v3, %v657_v60 }
 0x143   :  { %v4820_v32 = vpop.eup %4819  ;;  %v660_v42 = vmul.f32 %v4818_v8, %v656_v4 }
 0x144   :  { %v4822_v54 = vpop.eup %4821  ;;  %v663_v33 = vmul.f32 %v4820_v32, %v659_v18  ;;  %v5339_v38 = vadd.f32 %v665_v25, %v661_v21 }
 0x145   :  { %v662_v36 = vmul.f32 %v4822_v54, %v658_v17  ;;  %v5341_v57 = vadd.f32 %v664_v61, %v660_v42 }
 0x146   :  { %vm673_vm5 = vcmp.gt.f32.partialorder %v5339_v38, 0.0  ;;  %v677_v9 = vmul.f32 0.2, %v5339_v38  ;;  %v5345_v51 = vadd.f32 %v667_v34, %v663_v33 }
 0x147   :  { %vm672_vm6 = vcmp.gt.f32.partialorder %v5341_v57, 0.0  ;;  %v676_v40 = vmul.f32 0.2, %v5341_v57  ;;  %v4574_v46 = vpack.c.bf16 %v5339_v38, %v5341_v57  ;;  %v5351_v29 = vadd.f32 %v666_v7, %v662_v36 }
 0x148   :  { %v681_v63 = vsel %vm673_vm5, %v5339_v38, %v677_v9  ;;  %vm675_vm7 = vcmp.gt.f32.partialorder %v5345_v51, 0.0  ;;  %v679_v60 = vmul.f32 0.2, %v5345_v51 }
 0x149   :  { %v680_v3 = vsel %vm672_vm6, %v5341_v57, %v676_v40  ;;  %685 = vst.msk [vmem:[#allocation2 + $0x8] sm:$0xff] %vm426_vm2, %v681_v63  ;;  %v689_v4 = vsel %vm426_vm2, %v681_v63, 0.0  ;;  %v703_v8 = vmul.f32 %v681_v63, %v681_v63  ;;  %4575 = vmatprep.subr.bf16.mxu0 %v4574_v46  ;;  %vm674_vm8 = vcmp.gt.f32.partialorder %v5351_v29, 0.0 }
 0x14a   :  { %684 = vst.msk [vmem:[#allocation2] sm:$0xff] %vm426_vm2, %v680_v3  ;;  %v688_v18 = vsel %vm426_vm2, %v680_v3, 0.0  ;;  %v702_v21 = vmul.f32 %v680_v3, %v680_v3  ;;  %4577 = vmatpush3.bf16.msra.mxu0 %v4574_v46  ;;  %v678_v25 = vmul.f32 0.2, %v5351_v29  ;;  %v683_v32 = vsel %vm675_vm7, %v5345_v51, %v679_v60 }
 0x14b   :  { %v690_v17 = vadd.f32 %v689_v4, %v688_v18  ;;  %v707_v42 = vsel %vm426_vm2, %v703_v8, 0.0  ;;  %687 = vst.msk [vmem:[#allocation2 + $0x18] sm:$0xff] %vm426_vm2, %v683_v32  ;;  %v4578_v34 = vpack.c.bf16 %v5345_v51, %v5351_v29  ;;  %v705_v9 = vmul.f32 %v683_v32, %v683_v32  ;;  %v1036_v18 = vld [vmem:[%s6544_s11 + $0x18] sm:$0xff] }
 0x14c   :  { %v706_v61 = vsel %vm426_vm2, %v702_v21, 0.0  ;;  %v682_v54 = vsel %vm674_vm8, %v5351_v29, %v678_v25  ;;  %v693_v46 = vsel %vm426_vm2, %v683_v32, 0.0  ;;  %v725_v32 = vmul.f32 %v5251_v45, %v5180_v56 }
 0x14d   :  { %v708_v33 = vadd.f32 %v707_v42, %v706_v61  ;;  %686 = vst.msk [vmem:[#allocation2 + $0x10] sm:$0xff] %vm426_vm2, %v682_v54  ;;  %v691_v7 = vsel %vm426_vm2, %v682_v54, 0.0  ;;  %v704_v36 = vmul.f32 %v682_v54, %v682_v54  ;;  %4579 = vmatprep.subr.bf16.mxu0 %v4578_v34  ;;  %v711_v4 = vsel %vm426_vm2, %v705_v9, 0.0 }
 0x14e   :  { %v692_v40 = vadd.f32 %v691_v7, %v690_v17  ;;  %4581 = vmatpush3.bf16.msra.mxu0 %v4578_v34  ;;  %v724_v17 = vmul.f32 %v5251_v45, %v5173_v53  ;;  %v737_v61 = vadd.f32 %v725_v32, %v5178_v55  ;;  %v726_v9 = vmul.f32 %v5251_v45, %v5195_v14  ;;  %v6597_v32 = vld [vmem:[#allocation10_spill] sm:$0xff] }
 0x14f   :  { %v709_v63 = vsel %vm426_vm2, %v704_v36, 0.0  ;;  %v728_v14 = vmul.f32 %v5251_v45, %v5222_v44  ;;  %v6596_v44 = vld [vmem:[#allocation8_spill] sm:$0xff] }
 0x150   :  { %v5374_v60 = vadd.f32 %v693_v46, %v692_v40  ;;  %v710_v3 = vadd.f32 %v709_v63, %v708_v33  ;;  %v727_v33 = vmul.f32 %v5251_v45, %v5193_v10  ;;  %v736_v7 = vadd.f32 %v724_v17, %v5171_v52 }
 0x151   :  { %4205 = vmatmul.mubr.msk.f32.vlgmr.msra.gmra.mrb[0].mxu0 %vm426_vm2, %v4986_v5  ;;  %v6593_v5 = vmov 0.0   ;;  %v738_v52 = vadd.f32 %v726_v9, %v5205_v30 }
 0x152   :  { %v5377_v8 = vadd.f32 %v711_v4, %v710_v3  ;;  %4207 = vmatprep.mubr.msk.f32.mxu0 %vm426_vm2, %v4991_v6  ;;  %v3823_v6 = vld [vmem:[%s6544_s11 + $0x20] sm:$0xff]  ;;  %v739_v63 = vadd.f32 %v727_v33, %v5201_v26  ;;  %v729_v3 = vmul.f32 %v5251_v45, %v5220_v43  ;;  %v731_v43 = vmul.f32 %v5251_v45, %v5232_v59 }
 0x155   :  { %4208 = vmatmul.mubr.msk.f32.gmra.mrb[2].mxu0 %vm426_vm2, %v5013_v11  ;;  %v3824_v11 = vld [vmem:[%s6544_s11 + $0x28] sm:$0xff] }
 0x156   :  { %4210 = vmatprep.mubr.msk.f32.mxu0 %vm426_vm2, %v5018_v12  ;;  %v1033_v12 = vld [vmem:[%s6544_s11] sm:$0xff] }
 0x159   :  { %4211 = vmatmul.mubr.msk.f32.gmra.mrb[4].mxu0 %vm426_vm2, %v5033_v15  ;;  %v6559_v15 = vmov 0.0|0.0  }
 0x15a   :  { %4213 = vmatprep.mubr.msk.f32.mxu0 %vm426_vm2, %v5038_v16  ;;  %4582 = vmatprep.subr.bf16.mxu1 %v6559_v15  ;;  %v4583_v16 = vpack.c.bf16 %v3824_v11, %v3823_v6 }
 0x15b   :  { %4588 = vmatprep.subr.bf16.mxu0 %v6559_v15 }
 0x15c   :  { %4584 = vmatpush3.bf16.msra.mxu1 %v4583_v16 }
 0x15d   :  { %4214 = vmatmul.mubr.msk.f32.gmra.mrb[6].mxu0 %vm426_vm2, %v5053_v19  ;;  %v1034_v19 = vld [vmem:[%s6544_s11 + $0x8] sm:$0xff]  ;;  %4585 = vmatprep.subr.bf16.mxu1 %v6559_v15 }
 0x15e   :  { %4216 = vmatprep.mubr.msk.f32.mxu0 %vm426_vm2, %v5058_v20  ;;  %v3825_v20 = vld [vmem:[%s6544_s11 + $0x30] sm:$0xff] }
 0x161   :  { %4217 = vmatmul.mubr.msk.f32.gmra.mrb[8].mxu0 %vm426_vm2, %v5073_v23  ;;  %v3826_v23 = vld [vmem:[%s6544_s11 + $0x38] sm:$0xff] }
 0x162   :  { %4219 = vmatprep.mubr.msk.f32.mxu0 %vm426_vm2, %v5078_v24  ;;  %v4589_v24 = vpack.c.bf16 %v1034_v19, %v1033_v12  ;;  %v4586_v21 = vpack.c.bf16 %v3826_v23, %v3825_v20  ;;  %v6594_v12 = vld [vmem:[#allocation6_spill] sm:$0xff]  ;;  %v6595_v20 = vld [vmem:[#allocation7_spill] sm:$0xff] }
 0x164   :  { %4590 = vmatpush3.bf16.msra.mxu0 %v4589_v24  ;;  %4587 = vmatpush3.bf16.msra.mxu1 %v4586_v21  ;;  %v730_v24 = vmul.f32 %v5251_v45, %v6596_v44 }
 0x165   :  { %4220 = vmatmul.mubr.msk.f32.gmra.mrb[10].mxu0 %vm426_vm2, %v5093_v27  ;;  %v1035_v27 = vld [vmem:[%s6544_s11 + $0x10] sm:$0xff]  ;;  %4591 = vmatprep.subr.bf16.mxu0 %v6559_v15 }
 0x166   :  { %4241 = vmatprep.mubr.msk.f32.mxu0 %vm4894_vm1, %v6593_v5  ;;  %v4592_v25 = vpack.c.bf16 %v1036_v18, %v1035_v27  ;;  %4594 = vmatprep.subr.bf16.mxu1 %v6559_v15 }
 0x168   :  { %4593 = vmatpush3.bf16.msra.mxu0 %v4592_v25  ;;  %v743_v25 = vadd.f32 %v731_v43, %v5239_v13 }
 0x169   :  { %4600 = vmatprep.subr.bf16.mxu0 %v6559_v15 }
 0x224   :  { %v4206_v42 = vpop.f32.mrb[0].mxu0 }
 0x225   :  { %v820_v54 = vadd.f32 %v4206_v42, %v5184_v62  ;;  %v814_v34 = vpop.f32.mrb[1].mxu0 }
 0x226   :  { %v815_v36 = vadd.f32 %v814_v34, %v5188_v1 }
 0x227   :  { %v874_v56 = vadd.f32 %v820_v54, %v737_v61  ;;  %v742_v61 = vadd.f32 %v730_v24, %v5241_v22 }
 0x228   :  { %v873_v40 = vadd.f32 %v815_v36, %v736_v7  ;;  %v4209_v46 = vpop.f32.mrb[2].mxu0 }
 0x229   :  { %v3816_v53 = vmul.f32 -1.442695, %v874_v56  ;;  %v830_v55 = vadd.f32 %v4209_v46, %v5211_v35  ;;  %v824_v62 = vpop.f32.mrb[3].mxu0  ;;  %v741_v35 = vadd.f32 %v729_v3, %v5224_v48 }
 0x22a   :  { %v3815_v10 = vmul.f32 -1.442695, %v873_v40  ;;  %v825_v1 = vadd.f32 %v824_v62, %v5213_v37  ;;  %v740_v37 = vadd.f32 %v728_v14, %v5226_v49 }
 0x22b   :  { %4823 = vpow2.f32 %v3816_v53  ;;  %v876_v4 = vadd.f32 %v830_v55, %v739_v63 }
 0x22c   :  { %4825 = vpow2.f32 %v3815_v10  ;;  %v875_v6 = vadd.f32 %v825_v1, %v738_v52  ;;  %v4212_v11 = vpop.f32.mrb[4].mxu0  ;;  %v733_v52 = vmul.f32 %v5251_v45, %v5274_v39  ;;  %v732_v1 = vmul.f32 %v5251_v45, %v5284_v41  ;;  %v6600_v41 = vld [vmem:[#allocation13_spill] sm:$0xff] }
 0x22d   :  { %v3818_v26 = vmul.f32 -1.442695, %v876_v4  ;;  %v840_v16 = vadd.f32 %v4212_v11, %v6594_v12  ;;  %v834_v19 = vpop.f32.mrb[5].mxu0  ;;  %v6598_v11 = vld [vmem:[#allocation11_spill] sm:$0xff]  ;;  %v734_v44 = vmul.f32 %v5251_v45, %v6600_v41 }
 0x22e   :  { %v3817_v30 = vmul.f32 -1.442695, %v875_v6  ;;  %v835_v23 = vadd.f32 %v834_v19, %v6595_v20  ;;  %v745_v43 = vadd.f32 %v733_v52, %v5303_v31 }
 0x22f   :  { %4827 = vpow2.f32 %v3818_v26  ;;  %v902_v27 = vadd.f32 %v840_v16, %v741_v35 }
 0x230   :  { %4829 = vpow2.f32 %v3817_v30  ;;  %v901_v18 = vadd.f32 %v835_v23, %v740_v37  ;;  %v4215_v21 = vpop.f32.mrb[6].mxu0  ;;  %v6599_v30 = vld [vmem:[#allocation12_spill] sm:$0xff]  ;;  %v744_v23 = vadd.f32 %v732_v1, %v5305_v58 }
 0x231   :  { %v3820_v48 = vmul.f32 -1.442695, %v902_v27  ;;  %v850_v17 = vadd.f32 %v4215_v21, %v6597_v32  ;;  %v844_v42 = vpop.f32.mrb[7].mxu0  ;;  %v735_v37 = vmul.f32 %v5251_v45, %v6599_v30 }
 0x232   :  { %v3819_v59 = vmul.f32 -1.442695, %v901_v18  ;;  %v845_v49 = vadd.f32 %v844_v42, %v5255_v47 }
 0x233   :  { %4831 = vpow2.f32 %v3820_v48  ;;  %v904_v54 = vadd.f32 %v850_v17, %v743_v25  ;;  %v747_v32 = vadd.f32 %v735_v37, %v5331_v0  ;;  %v6601_v17 = vld [vmem:[#allocation14_spill] sm:$0xff] }
 0x234   :  { %4833 = vpow2.f32 %v3819_v59  ;;  %v903_v34 = vadd.f32 %v845_v49, %v742_v61  ;;  %v4218_v33 = vpop.f32.mrb[8].mxu0  ;;  %v746_v42 = vadd.f32 %v734_v44, %v6601_v17 }
 0x235   :  { %v4824_v7 = vpop.eup %4823  ;;  %v3822_v36 = vmul.f32 -1.442695, %v904_v54  ;;  %v854_v9 = vpop.f32.mrb[9].mxu0  ;;  %v860_v26 = vadd.f32 %v4218_v33, %v6598_v11 }
 0x236   :  { %v4826_v56 = vpop.eup %4825  ;;  %v890_v40 = vadd.f32 1.0, %v4824_v7  ;;  %v3821_v46 = vmul.f32 -1.442695, %v903_v34  ;;  %v855_v16 = vadd.f32 %v854_v9, %v5301_v50 }
 0x237   :  { %v889_v13 = vadd.f32 1.0, %v4826_v56  ;;  %4835 = vpow2.f32 %v3822_v36 }
 0x238   :  { %4837 = vrcp.f32 %v890_v40  ;;  %v4221_v53 = vpop.f32.mrb[10].mxu0 }
 0x239   :  { %v4828_v63 = vpop.eup %4827  ;;  %4839 = vrcp.f32 %v889_v13  ;;  %v864_v22 = vpop.f32.mrb[11].mxu0  ;;  %v870_v50 = vadd.f32 %v4221_v53, %v5311_v28 }
 0x23a   :  { %v4830_v55 = vpop.eup %4829  ;;  %v892_v47 = vadd.f32 1.0, %v4828_v63  ;;  %4841 = vpow2.f32 %v3821_v46  ;;  %v865_v48 = vadd.f32 %v864_v22, %v5315_v2 }
 0x23b   :  { %v891_v62 = vadd.f32 1.0, %v4830_v55 }
 0x23c   :  { %4843 = vrcp.f32 %v892_v47 }
 0x23d   :  { %v4832_v3 = vpop.eup %4831  ;;  %4845 = vrcp.f32 %v891_v62 }
 0x23e   :  { %v4834_v10 = vpop.eup %4833  ;;  %v918_v14 = vadd.f32 1.0, %v4832_v3 }
 0x23f   :  { %v917_v6 = vadd.f32 1.0, %v4834_v10 }
 0x240   :  { %4847 = vrcp.f32 %v918_v14 }
 0x241   :  { %v4836_v4 = vpop.eup %4835  ;;  %4849 = vrcp.f32 %v917_v6 }
 0x242   :  { %v4838_v35 = vpop.eup %4837  ;;  %v920_v12 = vadd.f32 1.0, %v4836_v4 }
 0x243   :  { %v4840_v19 = vpop.eup %4839  ;;  %v930_v20 = vmul.f32 %v4838_v35, %v860_v26 }
 0x244   :  { %v4842_v39 = vpop.eup %4841  ;;  %v929_v24 = vmul.f32 %v4840_v19, %v855_v16  ;;  %4851 = vrcp.f32 %v920_v12  ;;  %v713_v12 = vrot.slane %v5377_v8, 4 }
 0x245   :  { %v919_v27 = vadd.f32 1.0, %v4842_v39  ;;  %v934_v18 = vadd.f32 %v930_v20, %v745_v43 }
 0x246   :  { %v4844_v21 = vpop.eup %4843  ;;  %v933_v31 = vadd.f32 %v929_v24, %v744_v23 }
 0x247   :  { %v4846_v25 = vpop.eup %4845  ;;  %4853 = vrcp.f32 %v919_v27  ;;  %v932_v58 = vmul.f32 %v4844_v21, %v870_v50  ;;  %v714_v27 = vadd.f32 %v713_v12, %v5377_v8 }
 0x248   :  { %4855 = vtanh.f32 %v934_v18  ;;  %v931_v45 = vmul.f32 %v4846_v25, %v865_v48 }
 0x249   :  { %4857 = vtanh.f32 %v933_v31  ;;  %v936_v59 = vadd.f32 %v932_v58, %v747_v32  ;;  %v715_v32 = vrot.slane %v714_v27, 2 }
 0x24a   :  { %v935_v61 = vadd.f32 %v931_v45, %v746_v42  ;;  %v4848_v28 = vpop.eup %4847 }
 0x24b   :  { %4859 = vtanh.f32 %v936_v59  ;;  %v4850_v49 = vpop.eup %4849  ;;  %v942_v33 = vsub.f32 1.0, %v4848_v28  ;;  %v950_v0 = vmul.f32 %v4848_v28, %v5339_v38 }
 0x24c   :  { %4861 = vtanh.f32 %v935_v61  ;;  %v941_v7 = vsub.f32 1.0, %v4850_v49  ;;  %v949_v56 = vmul.f32 %v4850_v49, %v5341_v57  ;;  %v695_v57 = vrot.slane %v5374_v60, 4 }
 0x24d   :  { %v716_v61 = vadd.f32 %v715_v32, %v714_v27  ;;  %v5607_v27 = vld [vmem:[#allocation2 + $0x8] ss:$32 sm:$0x1]  ;;  %v5623_v32 = vld [vmem:[#allocation2 + $0x4] ss:$32 sm:$0x1] }
 0x24e   :  { %v4852_v54 = vpop.eup %4851  ;;  %v696_v20 = vadd.f32 %v695_v57, %v5374_v60  ;;  %v5538_v57 = vld [vmem:[%s6544_s11 + $0x70] sm:$0xff] }
 0x24f   :  { %v944_v40 = vsub.f32 1.0, %v4852_v54  ;;  %v952_v55 = vmul.f32 %v4852_v54, %v5345_v51  ;;  %6604 = vst [vmem:[#allocation8_spill] sm:$0xff] %v5538_v57  ;;  %v5752_v57 = vld [vmem:[#allocation2 + $0x1b] ss:$32 sm:$0x1] }
 0x250   :  { %v697_v31 = vrot.slane %v696_v20, 2  ;;  %6623 = vst [vmem:[#allocation28_spill] sm:$0xff] %v5752_v57 }
 0x251   :  { %v4854_v34 = vpop.eup %4853 }
 0x252   :  { %v4856_v2 = vpop.eup %4855  ;;  %v943_v53 = vsub.f32 1.0, %v4854_v34  ;;  %v951_v3 = vmul.f32 %v4854_v34, %v5351_v29  ;;  %v698_v42 = vadd.f32 %v697_v31, %v696_v20 }
 0x253   :  { %v4858_v36 = vpop.eup %4857  ;;  %v946_v9 = vmul.f32 %v4856_v2, %v942_v33  ;;  %v717_v33 = vrot.slane %v716_v61, 1 }
 0x254   :  { %v945_v46 = vmul.f32 %v4858_v36, %v941_v7  ;;  %v699_v8 = vrot.slane %v698_v42, 1 }
 0x255   :  { %v4860_v13 = vpop.eup %4859  ;;  %v954_v63 = vadd.f32 %v950_v0, %v946_v9 }
 0x256   :  { %v4862_v22 = vpop.eup %4861  ;;  %v953_v47 = vadd.f32 %v949_v56, %v945_v46  ;;  %v948_v62 = vmul.f32 %v4860_v13, %v944_v40  ;;  %v700_v36 = vadd.f32 %v699_v8, %v698_v42  ;;  %v718_v56 = vadd.f32 %v717_v33, %v716_v61  ;;  %v5647_v33 = vld [vmem:[#allocation2 + $0x9] ss:$32 sm:$0x1]  ;;  %v5676_v8 = vld [vmem:[#allocation2 + $0xe] ss:$32 sm:$0x1] }
 0x257   :  { %vm958_vm9 = vcmp.gt.f32.partialorder %v954_v63, 0.0  ;;  %v962_v10 = vmul.f32 0.2, %v954_v63  ;;  %v947_v52 = vmul.f32 %v4862_v22, %v943_v53 }
 0x258   :  { %vm957_vm10 = vcmp.gt.f32.partialorder %v953_v47, 0.0  ;;  %v961_v38 = vmul.f32 0.2, %v953_v47  ;;  %v956_v1 = vadd.f32 %v952_v55, %v948_v62  ;;  %v5508_v62 = vld [vmem:[%s6544_s11 + $0x40] sm:$0xff] }
 0x259   :  { %v966_v14 = vsel %vm958_vm9, %v954_v63, %v962_v10  ;;  %v955_v4 = vadd.f32 %v951_v3, %v947_v52  ;;  %v5513_v3 = vld [vmem:[%s6544_s11 + $0x48] sm:$0xff]  ;;  %v5518_v10 = vld [vmem:[%s6544_s11 + $0x60] sm:$0xff] }
 0x25a   :  { %970 = vst.msk [vmem:[#allocation2 + $0x28] sm:$0xff] %vm426_vm2, %v966_v14  ;;  %v974_v6 = vsel %vm426_vm2, %v966_v14, 0.0  ;;  %v988_v11 = vmul.f32 %v966_v14, %v966_v14  ;;  %v965_v51 = vsel %vm957_vm10, %v953_v47, %v961_v38  ;;  %vm960_vm11 = vcmp.gt.f32.partialorder %v956_v1, 0.0  ;;  %v5523_v52 = vld [vmem:[%s6544_s11 + $0x68] sm:$0xff]  ;;  %v5528_v38 = vld [vmem:[%s6544_s11 + $0x50] sm:$0xff]  ;;  %v5543_v14 = vld [vmem:[%s6544_s11 + $0x78] sm:$0xff] }
 0x25b   :  { %969 = vst.msk [vmem:[#allocation2 + $0x20] sm:$0xff] %vm426_vm2, %v965_v51  ;;  %v973_v29 = vsel %vm426_vm2, %v965_v51, 0.0  ;;  %v987_v26 = vmul.f32 %v965_v51, %v965_v51  ;;  %v964_v35 = vmul.f32 0.2, %v956_v1  ;;  %vm959_vm12 = vcmp.gt.f32.partialorder %v955_v4, 0.0  ;;  %6602 = vst [vmem:[#allocation6_spill] sm:$0xff] %v5528_v38 }
 0x25c   :  { %v992_v16 = vsel %vm426_vm2, %v988_v11, 0.0  ;;  %v975_v19 = vadd.f32 %v974_v6, %v973_v29  ;;  %v963_v43 = vmul.f32 0.2, %v955_v4  ;;  %6605 = vst [vmem:[#allocation10_spill] sm:$0xff] %v5543_v14  ;;  %v5553_v6 = vld [vmem:[%s6544_s11 + $0x88] sm:$0xff]  ;;  %v5558_v11 = vld [vmem:[%s6544_s11 + $0xa0] sm:$0xff] }
 0x25d   :  { %v991_v30 = vsel %vm426_vm2, %v987_v26, 0.0  ;;  %v968_v37 = vsel %vm960_vm11, %v956_v1, %v964_v35  ;;  %v5533_v1 = vld [vmem:[%s6544_s11 + $0x58] sm:$0xff]  ;;  %6607 = vst [vmem:[#allocation12_spill] sm:$0xff] %v5553_v6  ;;  %6608 = vst [vmem:[#allocation13_spill] sm:$0xff] %v5558_v11  ;;  %v5563_v51 = vld [vmem:[%s6544_s11 + $0xa8] sm:$0xff] }
 0x25e   :  { %v993_v39 = vadd.f32 %v992_v16, %v991_v30  ;;  %972 = vst.msk [vmem:[#allocation2 + $0x38] sm:$0xff] %vm426_vm2, %v968_v37  ;;  %v967_v23 = vsel %vm959_vm12, %v955_v4, %v963_v43  ;;  %v990_v41 = vmul.f32 %v968_v37, %v968_v37  ;;  %v978_v50 = vsel %vm426_vm2, %v968_v37, 0.0  ;;  %6603 = vst [vmem:[#allocation7_spill] sm:$0xff] %v5533_v1  ;;  %v5548_v4 = vld [vmem:[%s6544_s11 + $0x80] sm:$0xff]  ;;  %v5568_v29 = vld [vmem:[%s6544_s11 + $0x90] sm:$0xff] }
 0x25f   :  { %971 = vst.msk [vmem:[#allocation2 + $0x30] sm:$0xff] %vm426_vm2, %v967_v23  ;;  %v976_v44 = vsel %vm426_vm2, %v967_v23, 0.0  ;;  %v989_v24 = vmul.f32 %v967_v23, %v967_v23  ;;  %6606 = vst [vmem:[#allocation11_spill] sm:$0xff] %v5548_v4  ;;  %v5573_v26 = vld [vmem:[%s6544_s11 + $0x98] sm:$0xff]  ;;  %v5582_v16 = vld [vmem:[%s6544_s11 + $0xb0] sm:$0xff] }
 0x260   :  { %v977_v18 = vadd.f32 %v976_v44, %v975_v19  ;;  %v996_v25 = vsel %vm426_vm2, %v990_v41, 0.0  ;;  %6609 = vst [vmem:[#allocation14_spill] sm:$0xff] %v5563_v51  ;;  %6610 = vst [vmem:[#allocation15_spill] sm:$0xff] %v5568_v29  ;;  %v5587_v19 = vld [vmem:[%s6544_s11 + $0xb8] sm:$0xff] }
 0x261   :  { %v994_v21 = vsel %vm426_vm2, %v989_v24, 0.0  ;;  %6611 = vst [vmem:[#allocation16_spill] sm:$0xff] %v5573_v26  ;;  %6612 = vst [vmem:[#allocation17_spill] sm:$0xff] %v5582_v16  ;;  %v5589_v43 = vld [vmem:[#allocation2 + $0x8] ss:$32 sm:$0x2] }
 0x262   :  { %v979_v48 = vadd.f32 %v978_v50, %v977_v18  ;;  %v995_v60 = vadd.f32 %v994_v21, %v993_v39  ;;  %v5575_v35 = vld [vmem:[#allocation2 + $0x1] ss:$32 sm:$0x2]  ;;  %v5577_v12 = vld [vmem:[#allocation2] ss:$32 sm:$0x2] }
 0x263   :  { %6613 = vst [vmem:[#allocation18_spill] sm:$0xff] %v5587_v19  ;;  %v5591_v30 = vld [vmem:[#allocation2 + $0x2] ss:$32 sm:$0x2] }
 0x264   :  { %v980_v58 = vrot.slane %v979_v48, 4  ;;  %v997_v17 = vadd.f32 %v996_v25, %v995_v60  ;;  %v5593_v37 = vld [vmem:[#allocation2 + $0x3] ss:$32 sm:$0x2] }
 0x265   :  { %v5595_v20 = vld [vmem:[#allocation2 + $0x4] ss:$32 sm:$0x2]  ;;  %v5597_v39 = vld [vmem:[#allocation2 + $0x5] ss:$32 sm:$0x2] }
 0x266   :  { %v981_v45 = vadd.f32 %v980_v58, %v979_v48  ;;  %v998_v59 = vrot.slane %v997_v17, 4  ;;  %v5599_v23 = vld [vmem:[#allocation2 + $0x1] ss:$32 sm:$0x1] }
 0x267   :  { %v5601_v41 = vld [vmem:[#allocation2] ss:$32 sm:$0x1]  ;;  %v5603_v44 = vld [vmem:[#allocation2 + $0x6] ss:$32 sm:$0x2] }
 0x268   :  { %v982_v28 = vrot.slane %v981_v45, 2  ;;  %v999_v49 = vadd.f32 %v998_v59, %v997_v17  ;;  %v5605_v24 = vld [vmem:[#allocation2 + $0x7] ss:$32 sm:$0x2] }
 0x269   :  { %v5609_v18 = vld [vmem:[#allocation2 + $0x9] ss:$32 sm:$0x2]  ;;  %v5611_v50 = vld [vmem:[#allocation2 + $0xa] ss:$32 sm:$0x2] }
 0x26a   :  { %v983_v54 = vadd.f32 %v982_v28, %v981_v45  ;;  %v1000_v34 = vrot.slane %v999_v49, 2  ;;  %v5619_v60 = vld [vmem:[#allocation2 + $0x2] ss:$32 sm:$0x1]  ;;  %v1792_v31 = vor.u32 %v5609_v18, %v5647_v33 }
 0x26b   :  { %v5621_v25 = vld [vmem:[#allocation2 + $0x3] ss:$32 sm:$0x1]  ;;  %v5625_v58 = vld [vmem:[#allocation2 + $0x5] ss:$32 sm:$0x1] }
 0x26c   :  { %v984_v2 = vrot.slane %v983_v54, 1  ;;  %v1001_v7 = vadd.f32 %v1000_v34, %v999_v49  ;;  %v5627_v17 = vld [vmem:[#allocation2 + $0xb] ss:$32 sm:$0x2] }
 0x26d   :  { %v5629_v42 = vld [vmem:[#allocation2 + $0xc] ss:$32 sm:$0x2]  ;;  %v5631_v45 = vld [vmem:[#allocation2 + $0xd] ss:$32 sm:$0x2] }
 0x26e   :  { %v985_v0 = vadd.f32 %v984_v2, %v983_v54  ;;  %v1002_v9 = vrot.slane %v1001_v7, 1  ;;  %v5633_v59 = vld [vmem:[#allocation2 + $0xe] ss:$32 sm:$0x2] }
 0x26f   :  { %v5643_v54 = vld [vmem:[#allocation2 + $0x6] ss:$32 sm:$0x1]  ;;  %v5645_v34 = vld [vmem:[#allocation2 + $0x7] ss:$32 sm:$0x1] }
 0x270   :  { %v986_v40 = vadd.f32 %v985_v0, %v700_v36  ;;  %v1003_v46 = vadd.f32 %v1002_v9, %v1001_v7  ;;  %v5649_v2 = vld [vmem:[#allocation2 + $0xa] ss:$32 sm:$0x1]  ;;  %v5651_v7 = vld [vmem:[#allocation2 + $0xf] ss:$32 sm:$0x2]  ;;  %v1537_v48 = vor.u32 %v5603_v44, %v5643_v54  ;;  %v1622_v15 = vor.u32 %v5605_v24, %v5645_v34 }
 0x271   :  { %v5653_v36 = vld [vmem:[#allocation2 + $0x10] ss:$32 sm:$0x2]  ;;  %v5655_v0 = vld [vmem:[#allocation2 + $0x11] ss:$32 sm:$0x2]  ;;  %v1877_v19 = vor.u32 %v5611_v50, %v5649_v2 }
 0x272   :  { %v1004_v13 = vadd.f32 %v1003_v46, %v718_v56  ;;  %v5501_v53 = vmul.f32 0.015625, %v986_v40  ;;  %v5657_v9 = vld [vmem:[#allocation2 + $0x12] ss:$32 sm:$0x2]  ;;  %v1009_v56 = vld [vmem:[%s6542_s9] sm:$0x1] }
 0x273   :  { %6614 = vst [vmem:[#allocation19_spill] sm:$0xff] %v5657_v9  ;;  %v5678_v49 = vld [vmem:[#allocation2 + $0x13] ss:$32 sm:$0x2]  ;;  %v1013_v9 = vld [vmem:[%s6543_s10] sm:$0x1] }
 0x274   :  { %v1006_v63 = vmul.f32 0.015625, %v1004_v13  ;;  %v1007_v22 = vmul.f32 %v5501_v53, %v5501_v53  ;;  %v5680_v28 = vld [vmem:[#allocation2 + $0x14] ss:$32 sm:$0x2] }
 0x275   :  { %6615 = vst [vmem:[#allocation20_spill] sm:$0xff] %v5680_v28  ;;  %v5682_v61 = vld [vmem:[#allocation2 + $0x15] ss:$32 sm:$0x2] }
 0x276   :  { %v1008_v55 = vsub.f32 %v1006_v63, %v1007_v22  ;;  %v5670_v22 = vld [vmem:[#allocation2 + $0xb] ss:$32 sm:$0x1]  ;;  %6616 = vst [vmem:[#allocation21_spill] sm:$0xff] %v5682_v61  ;;  %v6625_v61 = vld [vmem:[#allocation9_spill] sm:$0xff] }
 0x277   :  { %v5692_v21 = vld [vmem:[#allocation2 + $0xf] ss:$32 sm:$0x1]  ;;  %v5694_v63 = vld [vmem:[#allocation2 + $0x10] ss:$32 sm:$0x1]  ;;  %v1962_v44 = vor.u32 %v5627_v17, %v5670_v22 }
 0x278   :  { %v1010_v47 = vadd.f32 1e-05, %v1008_v55  ;;  %v5672_v55 = vld [vmem:[#allocation2 + $0xc] ss:$32 sm:$0x1] }
 0x279   :  { %v5696_v46 = vld [vmem:[#allocation2 + $0x11] ss:$32 sm:$0x1]  ;;  %v5698_v40 = vld [vmem:[#allocation2 + $0x12] ss:$32 sm:$0x1]  ;;  %v2047_v24 = vor.u32 %v5629_v42, %v5672_v55 }
 0x27a   :  { %4863 = vrsqrt.f32 %v1010_v47  ;;  %v5674_v47 = vld [vmem:[#allocation2 + $0xd] ss:$32 sm:$0x1]  ;;  %6617 = vst [vmem:[#allocation22_spill] sm:$0xff] %v5696_v46  ;;  %6618 = vst [vmem:[#allocation23_spill] sm:$0xff] %v5698_v40 }
 0x27b   :  { %v5700_v16 = vld [vmem:[#allocation2 + $0x16] ss:$32 sm:$0x2]  ;;  %v5702_v13 = vld [vmem:[#allocation2 + $0x17] ss:$32 sm:$0x2]  ;;  %v2132_v18 = vor.u32 %v5631_v45, %v5674_v47  ;;  %v6628_v45 = vor.u32 %v5591_v30, %v5619_v60 }
 0x27c   :  { %v5712_v29 = vld [vmem:[#allocation2 + $0x13] ss:$32 sm:$0x1]  ;;  %v5714_v26 = vld [vmem:[#allocation2 + $0x14] ss:$32 sm:$0x1] }
 0x27d   :  { %6619 = vst [vmem:[#allocation24_spill] sm:$0xff] %v5714_v26  ;;  %v5716_v11 = vld [vmem:[#allocation2 + $0x15] ss:$32 sm:$0x1] }
 0x27e   :  { %6620 = vst [vmem:[#allocation25_spill] sm:$0xff] %v5716_v11  ;;  %v5718_v51 = vld [vmem:[#allocation2 + $0x18] ss:$32 sm:$0x2] }
 0x27f   :  { %v5720_v4 = vld [vmem:[#allocation2 + $0x19] ss:$32 sm:$0x2]  ;;  %v5730_v54 = vld [vmem:[#allocation2 + $0x16] ss:$32 sm:$0x1] }
 0x280   :  { %v5732_v34 = vld [vmem:[#allocation2 + $0x17] ss:$32 sm:$0x1]  ;;  %v5734_v33 = vld [vmem:[#allocation2 + $0x18] ss:$32 sm:$0x1] }
 0x281   :  { %6621 = vst [vmem:[#allocation26_spill] sm:$0xff] %v5732_v34  ;;  %v5736_v2 = vld [vmem:[#allocation2 + $0x19] ss:$32 sm:$0x1] }
 0x282   :  { %v5738_v6 = vld [vmem:[#allocation2 + $0x1a] ss:$32 sm:$0x2]  ;;  %v5740_v17 = vld [vmem:[#allocation2 + $0x1b] ss:$32 sm:$0x2] }
 0x283   :  { %6622 = vst [vmem:[#allocation27_spill] sm:$0xff] %v5740_v17  ;;  %v5750_v50 = vld [vmem:[#allocation2 + $0x1a] ss:$32 sm:$0x1]  ;;  %v6627_v17 = vor.u32 %v5577_v12, %v5601_v41  ;;  %v6631_v12 = vor.u32 %v5597_v39, %v5625_v58 }
 0x284   :  { %v4864_v22 = vpop.eup %4863  ;;  %v5754_v14 = vld [vmem:[#allocation2 + $0x1c] ss:$32 sm:$0x2]  ;;  %v5756_v38 = vld [vmem:[#allocation2 + $0x1d] ss:$32 sm:$0x2] }
 0x285   :  { %v1012_v1 = vmul.f32 %v4864_v22, %v1009_v56  ;;  %v5764_v46 = vld [vmem:[#allocation2 + $0x1c] ss:$32 sm:$0x1]  ;;  %v5766_v47 = vld [vmem:[#allocation2 + $0x1e] ss:$32 sm:$0x2]  ;;  %v6626_v56 = vor.u32 %v5575_v35, %v5599_v23  ;;  %v6630_v35 = vor.u32 %v5595_v20, %v5623_v32 }
 0x286   :  { %v5768_v40 = vld [vmem:[#allocation2 + $0x1f] ss:$32 sm:$0x2]  ;;  %v5781_v42 = vld [vmem:[#allocation2 + $0x1d] ss:$32 sm:$0x1] }
 0x287   :  { %6624 = vst [vmem:[#allocation29_spill] sm:$0xff] %v5781_v42  ;;  %v1014_v11 = vmul.f32 %v1012_v1, %v5501_v53  ;;  %v5785_v26 = vrot.slane %v1012_v1, %v6625_v61  ;;  %v5791_v22 = vld [vmem:[#allocation2 + $0x1e] ss:$32 sm:$0x1]  ;;  %v6629_v1 = vor.u32 %v5593_v37, %v5621_v25  ;;  %v6632_v37 = vor.u32 %v5589_v43, %v5607_v27 }
 0x288   :  { %v5793_v34 = vld [vmem:[#allocation2 + $0x1f] ss:$32 sm:$0x1]  ;;  %v3577_v53 = vor.u32 %v5766_v47, %v5791_v22  ;;  %v3851_v47 = vld [vmem:[%s6544_s11 + $0xd0] sm:$0xff] }
 0x289   :  { %v1015_v28 = vsub.f32 %v1013_v9, %v1014_v11  ;;  %v1041_v57 = vmul.f32 %v6626_v56, %v5785_v26  ;;  %v1025_v55 = vmul.f32 %v5785_v26, %v6627_v17  ;;  %v1198_v42 = vmul.f32 %v6628_v45, %v5785_v26  ;;  %v3852_v22 = vld [vmem:[%s6544_s11 + $0xd8] sm:$0xff] }
 0x28a   :  { %v1283_v11 = vmul.f32 %v6629_v1, %v5785_v26  ;;  %v1368_v23 = vmul.f32 %v6630_v35, %v5785_v26  ;;  %v1453_v41 = vmul.f32 %v6631_v12, %v5785_v26  ;;  %v1538_v9 = vmul.f32 %v1537_v48, %v5785_v26  ;;  %v6641_v12 = vld [vmem:[#allocation19_spill] sm:$0xff] }
 0x28b   :  { %v5829_v30 = vrot.slane %v1015_v28, %v6625_v61  ;;  %v1623_v60 = vmul.f32 %v1622_v15, %v5785_v26  ;;  %v1708_v25 = vmul.f32 %v6632_v37, %v5785_v26  ;;  %v1793_v20 = vmul.f32 %v1792_v31, %v5785_v26 }
 0x28c   :  { %v1878_v32 = vmul.f32 %v1877_v19, %v5785_v26  ;;  %v1963_v17 = vmul.f32 %v1962_v44, %v5785_v26  ;;  %v2048_v39 = vmul.f32 %v2047_v24, %v5785_v26  ;;  %v2133_v48 = vmul.f32 %v2132_v18, %v5785_v26 }
 0x28d   :  { %v1042_v58 = vadd.f32 %v1041_v57, %v5829_v30  ;;  %v1032_v61 = vadd.f32 %v5829_v30, %v1025_v55  ;;  %v1199_v15 = vadd.f32 %v1198_v42, %v5829_v30  ;;  %v1284_v28 = vadd.f32 %v1283_v11, %v5829_v30 }
 0x28e   :  { %v5846_v43 = vadd.f32 %v1368_v23, %v5829_v30  ;;  %v5849_v27 = vadd.f32 %v1453_v41, %v5829_v30  ;;  %v5852_v19 = vadd.f32 %v1538_v9, %v5829_v30  ;;  %v5855_v31 = vadd.f32 %v1623_v60, %v5829_v30 }
 0x28f   :  { %4231 = vmatmul.mubr.msk.f32.vlgmr.msra.gmra.mrb[14].mxu1 %vm426_vm2, %v1042_v58  ;;  %4242 = vmatmul.mubr.msk.f32.vlgmr.msra.gmra.mrb[12].mxu0 %vm426_vm2, %v1032_v61  ;;  %v5860_v57 = vadd.f32 %v1708_v25, %v5829_v30  ;;  %v5863_v44 = vadd.f32 %v1793_v20, %v5829_v30  ;;  %v5866_v24 = vadd.f32 %v1878_v32, %v5829_v30  ;;  %v6635_v1 = vmov 0.0|0.0   ;;  %v6646_v25 = vld [vmem:[#allocation24_spill] sm:$0xff] }
 0x290   :  { %v6633_v18 = vpack.c.bf16 %v5513_v3, %v5508_v62  ;;  %v6634_v42 = vpack.c.bf16 %v5523_v52, %v5518_v10  ;;  %v5875_v45 = vadd.f32 %v1963_v17, %v5829_v30  ;;  %v5878_v55 = vadd.f32 %v2048_v39, %v5829_v30  ;;  %4252 = vmatprep.mubr.msk.f32.mxu1 %vm4894_vm1, %v6593_v5  ;;  %v6648_v17 = vld [vmem:[#allocation7_spill] sm:$0xff]  ;;  %v6649_v39 = vld [vmem:[#allocation6_spill] sm:$0xff] }
 0x291   :  { %v5881_v56 = vadd.f32 %v2133_v48, %v5829_v30  ;;  %v6636_v62 = vor.u32 %v5633_v59, %v5676_v8  ;;  %v6637_v10 = vor.u32 %v5651_v7, %v5692_v21  ;;  %v6638_v11 = vor.u32 %v5653_v36, %v5694_v63  ;;  %4263 = vmatprep.mubr.msk.f32.mxu0 %vm4894_vm1, %v6593_v5  ;;  %v6639_v59 = vld [vmem:[#allocation22_spill] sm:$0xff]  ;;  %v6642_v21 = vld [vmem:[#allocation23_spill] sm:$0xff] }
 0x292   :  { %4596 = vmatpush3.bf16.msra.mxu1 %v6633_v18  ;;  %4602 = vmatpush3.bf16.msra.mxu0 %v6634_v42  ;;  %v6640_v8 = vor.u32 %v5655_v0, %v6639_v59  ;;  %v6643_v7 = vor.u32 %v6641_v12, %v6642_v21  ;;  %v6644_v36 = vor.u32 %v5678_v49, %v5712_v29  ;;  %v6645_v0 = vld [vmem:[#allocation20_spill] sm:$0xff]  ;;  %v6651_v29 = vld [vmem:[#allocation10_spill] sm:$0xff] }
 0x293   :  { %4597 = vmatprep.subr.bf16.mxu1 %v6635_v1  ;;  %4603 = vmatprep.subr.bf16.mxu0 %v6635_v1  ;;  %v2218_v3 = vmul.f32 %v6636_v62, %v5785_v26  ;;  %v2303_v52 = vmul.f32 %v6637_v10, %v5785_v26  ;;  %v2388_v35 = vmul.f32 %v6638_v11, %v5785_v26  ;;  %v6652_v49 = vld [vmem:[#allocation8_spill] sm:$0xff]  ;;  %v6655_v10 = vld [vmem:[#allocation25_spill] sm:$0xff] }
 0x294   :  { %v2473_v23 = vmul.f32 %v6640_v8, %v5785_v26  ;;  %v2558_v41 = vmul.f32 %v6643_v7, %v5785_v26  ;;  %v2643_v63 = vmul.f32 %v6644_v36, %v5785_v26  ;;  %v6647_v20 = vor.u32 %v6645_v0, %v6646_v25  ;;  %v6658_v8 = vld [vmem:[#allocation26_spill] sm:$0xff]  ;;  %v6667_v0 = vld [vmem:[#allocation11_spill] sm:$0xff]  ;;  %v6670_v25 = vld [vmem:[#allocation13_spill] sm:$0xff] }
 0x295   :  { %v5914_v9 = vadd.f32 %v2218_v3, %v5829_v30  ;;  %v5917_v60 = vadd.f32 %v2303_v52, %v5829_v30  ;;  %v5920_v37 = vadd.f32 %v2388_v35, %v5829_v30  ;;  %v6650_v48 = vpack.c.bf16 %v6648_v17, %v6649_v39  ;;  %v6654_v3 = vld [vmem:[#allocation21_spill] sm:$0xff]  ;;  %v3855_v39 = vld [vmem:[%s6544_s11 + $0xe8] sm:$0xff] }
 0x296   :  { %v2728_v32 = vmul.f32 %v6647_v20, %v5785_v26  ;;  %v6653_v58 = vpack.c.bf16 %v6651_v29, %v6652_v49  ;;  %v5933_v61 = vadd.f32 %v2473_v23, %v5829_v30  ;;  %v5936_v18 = vadd.f32 %v2558_v41, %v5829_v30  ;;  %v3854_v17 = vld [vmem:[%s6544_s11 + $0xe0] sm:$0xff] }
 0x297   :  { %4599 = vmatpush3.bf16.msra.mxu1 %v6650_v48  ;;  %v5939_v42 = vadd.f32 %v2643_v63, %v5829_v30  ;;  %v6656_v52 = vor.u32 %v6654_v3, %v6655_v10  ;;  %v6657_v35 = vor.u32 %v5700_v16, %v5730_v54  ;;  %v6659_v23 = vor.u32 %v5702_v13, %v6658_v8  ;;  %v3849_v13 = vld [vmem:[%s6544_s11 + $0xc0] sm:$0xff] }
 0x298   :  { %4605 = vmatpush3.bf16.msra.mxu0 %v6653_v58  ;;  %4606 = vmatprep.subr.bf16.mxu1 %v6635_v1  ;;  %v5944_v62 = vadd.f32 %v2728_v32, %v5829_v30  ;;  %v6660_v21 = vor.u32 %v5718_v51, %v5734_v33  ;;  %v6661_v41 = vor.u32 %v5720_v4, %v5736_v2  ;;  %v6663_v4 = vld [vmem:[#allocation27_spill] sm:$0xff]  ;;  %v6664_v2 = vld [vmem:[#allocation28_spill] sm:$0xff] }
 0x299   :  { %4612 = vmatprep.subr.bf16.mxu0 %v6635_v1  ;;  %v2813_v11 = vmul.f32 %v6656_v52, %v5785_v26  ;;  %v2898_v59 = vmul.f32 %v6657_v35, %v5785_v26  ;;  %v2983_v12 = vmul.f32 %v6659_v23, %v5785_v26  ;;  %v6662_v16 = vor.u32 %v5738_v6, %v5750_v50  ;;  %v6666_v50 = vld [vmem:[#allocation12_spill] sm:$0xff]  ;;  %v3850_v32 = vld [vmem:[%s6544_s11 + $0xc8] sm:$0xff] }
 0x29a   :  { %v3068_v7 = vmul.f32 %v6660_v21, %v5785_v26  ;;  %v3153_v36 = vmul.f32 %v6661_v41, %v5785_v26  ;;  %4253 = vmatmul.mubr.msk.f32.vlgmr.msra.gmra.mrb[16].mxu1 %vm426_vm2, %v1199_v15  ;;  %v6665_v63 = vor.u32 %v6663_v4, %v6664_v2  ;;  %v6668_v15 = vpack.c.bf16 %v6666_v50, %v6667_v0  ;;  %v6677_v41 = vld [vmem:[#allocation15_spill] sm:$0xff]  ;;  %v3859_v2 = vld [vmem:[%s6544_s11 + $0x100] sm:$0xff] }
 0x29b   :  { %v3238_v54 = vmul.f32 %v6662_v16, %v5785_v26  ;;  %4264 = vmatmul.mubr.msk.f32.vlgmr.msra.gmra.mrb[14].mxu0 %vm426_vm2, %v1284_v28  ;;  %v5976_v51 = vadd.f32 %v2813_v11, %v5829_v30  ;;  %v5979_v33 = vadd.f32 %v2898_v59, %v5829_v30  ;;  %v6669_v28 = vld [vmem:[#allocation14_spill] sm:$0xff]  ;;  %v6001_v48 = vadd.f32 %v2983_v12, %v5829_v30  ;;  %v6673_v11 = vld [vmem:[#allocation29_spill] sm:$0xff]  ;;  %v3861_v0 = vld [vmem:[%s6544_s11 + $0x110] sm:$0xff] }
 0x29c   :  { %v3323_v6 = vmul.f32 %v6665_v63, %v5785_v26  ;;  %4608 = vmatpush3.bf16.msra.mxu1 %v6668_v15  ;;  %v6671_v20 = vpack.c.bf16 %v6669_v28, %v6670_v25  ;;  %v6004_v29 = vadd.f32 %v3068_v7, %v5829_v30  ;;  %v6007_v49 = vadd.f32 %v3153_v36, %v5829_v30  ;;  %v6676_v7 = vld [vmem:[#allocation16_spill] sm:$0xff]  ;;  %v6680_v16 = vld [vmem:[#allocation17_spill] sm:$0xff]  ;;  %v3860_v63 = vld [vmem:[%s6544_s11 + $0x108] sm:$0xff] }
 0x29d   :  { %4609 = vmatprep.subr.bf16.mxu1 %v6635_v1  ;;  %v6012_v58 = vadd.f32 %v3238_v54, %v5829_v30  ;;  %v6672_v10 = vor.u32 %v5754_v14, %v5764_v46  ;;  %4274 = vmatprep.mubr.msk.f32.mxu1 %vm4894_vm1, %v6593_v5  ;;  %v6674_v35 = vor.u32 %v5756_v38, %v6673_v11  ;;  %v6679_v38 = vld [vmem:[#allocation18_spill] sm:$0xff]  ;;  %v3862_v15 = vld [vmem:[%s6544_s11 + $0x118] sm:$0xff]  ;;  %v3866_v28 = vld [vmem:[%s6544_s11 + $0x130] sm:$0xff] }
 0x29e   :  { %4614 = vmatpush3.bf16.msra.mxu0 %v6671_v20  ;;  %v6015_v3 = vadd.f32 %v3323_v6, %v5829_v30  ;;  %4285 = vmatprep.mubr.msk.f32.mxu0 %vm4894_vm1, %v6593_v5  ;;  %v3578_v8 = vmul.f32 %v3577_v53, %v5785_v26  ;;  %v6675_v14 = vor.u32 %v5768_v40, %v5793_v34  ;;  %v3856_v53 = vld [vmem:[%s6544_s11 + $0xf0] sm:$0xff]  ;;  %v3867_v25 = vld [vmem:[%s6544_s11 + $0x138] sm:$0xff] }
 0x29f   :  { %4615 = vmatprep.subr.bf16.mxu0 %v6635_v1  ;;  %v3408_v52 = vmul.f32 %v6672_v10, %v5785_v26  ;;  %v3493_v59 = vmul.f32 %v6674_v35, %v5785_v26  ;;  %v4619_v23 = vpack.c.bf16 %v3850_v32, %v3849_v13  ;;  %v4625_v12 = vpack.c.bf16 %v3855_v39, %v3854_v17  ;;  %v3857_v13 = vld [vmem:[%s6544_s11 + $0xf8] sm:$0xff]  ;;  %v3869_v17 = vld [vmem:[%s6544_s11 + $0x140] sm:$0xff]  ;;  %v3870_v39 = vld [vmem:[%s6544_s11 + $0x148] sm:$0xff] }
 0x2a0   :  { %v3663_v46 = vmul.f32 %v6675_v14, %v5785_v26  ;;  %v6678_v36 = vpack.c.bf16 %v6676_v7, %v6677_v41  ;;  %v6681_v54 = vpack.c.bf16 %v6679_v38, %v6680_v16  ;;  %v6053_v26 = vadd.f32 %v3578_v8, %v5829_v30  ;;  %v3871_v11 = vld [vmem:[%s6544_s11 + $0x150] sm:$0xff]  ;;  %v3872_v35 = vld [vmem:[%s6544_s11 + $0x158] sm:$0xff] }
 0x2a1   :  { %v6038_v21 = vadd.f32 %v3408_v52, %v5829_v30  ;;  %v6050_v40 = vadd.f32 %v3493_v59, %v5829_v30  ;;  %v4628_v4 = vpack.c.bf16 %v3857_v13, %v3856_v53  ;;  %v4631_v6 = vpack.c.bf16 %v3860_v63, %v3859_v2  ;;  %v3876_v59 = vld [vmem:[%s6544_s11 + $0x170] sm:$0xff]  ;;  %v3877_v8 = vld [vmem:[%s6544_s11 + $0x178] sm:$0xff]  ;;  %v3889_v53 = vld [vmem:[%s6544_s11 + $0x1c0] sm:$0xff] }
 0x2a2   :  { %4611 = vmatpush3.bf16.msra.mxu1 %v6678_v36  ;;  %4617 = vmatpush3.bf16.msra.mxu0 %v6681_v54  ;;  %v6056_v34 = vadd.f32 %v3663_v46, %v5829_v30  ;;  %v4622_v30 = vpack.c.bf16 %v3852_v22, %v3851_v47  ;;  %v4634_v20 = vpack.c.bf16 %v3862_v15, %v3861_v0  ;;  %v3881_v36 = vld [vmem:[%s6544_s11 + $0x190] sm:$0xff]  ;;  %v3882_v38 = vld [vmem:[%s6544_s11 + $0x198] sm:$0xff]  ;;  %v3890_v13 = vld [vmem:[%s6544_s11 + $0x1c8] sm:$0xff] }
 0x2a3   :  { %4618 = vmatprep.subr.bf16.mxu1 %v6635_v1  ;;  %4624 = vmatprep.subr.bf16.mxu0 %v6635_v1  ;;  %v4640_v32 = vpack.c.bf16 %v3867_v25, %v3866_v28  ;;  %v4643_v10 = vpack.c.bf16 %v3870_v39, %v3869_v17  ;;  %v4646_v14 = vpack.c.bf16 %v3872_v35, %v3871_v11  ;;  %v3886_v16 = vld [vmem:[%s6544_s11 + $0x1b0] sm:$0xff]  ;;  %v3887_v54 = vld [vmem:[%s6544_s11 + $0x1b8] sm:$0xff]  ;;  %v3899_v0 = vld [vmem:[%s6544_s11 + $0x200] sm:$0xff] }
 0x2a4   :  { %v4652_v46 = vpack.c.bf16 %v3877_v8, %v3876_v59  ;;  %v4658_v47 = vpack.c.bf16 %v3882_v38, %v3881_v36  ;;  %v4664_v22 = vpack.c.bf16 %v3887_v54, %v3886_v16  ;;  %v3891_v2 = vld [vmem:[%s6544_s11 + $0x1d0] sm:$0xff]  ;;  %v3892_v63 = vld [vmem:[%s6544_s11 + $0x1d8] sm:$0xff]  ;;  %v3900_v15 = vld [vmem:[%s6544_s11 + $0x208] sm:$0xff] }
 0x2a5   :  { %4275 = vmatmul.mubr.msk.f32.vlgmr.msra.gmra.mrb[18].mxu1 %vm426_vm2, %v5846_v43  ;;  %4286 = vmatmul.mubr.msk.f32.vlgmr.msra.gmra.mrb[16].mxu0 %vm426_vm2, %v5849_v27  ;;  %v3864_v43 = vld [vmem:[%s6544_s11 + $0x120] sm:$0xff]  ;;  %v3865_v27 = vld [vmem:[%s6544_s11 + $0x128] sm:$0xff]  ;;  %v4679_v28 = vpack.c.bf16 %v3900_v15, %v3899_v0  ;;  %v3906_v17 = vld [vmem:[%s6544_s11 + $0x230] sm:$0xff] }
 0x2a6   :  { %4620 = vmatpush3.bf16.msra.mxu1 %v4619_v23  ;;  %4626 = vmatpush3.bf16.msra.mxu0 %v4625_v12  ;;  %v4637_v50 = vpack.c.bf16 %v3865_v27, %v3864_v43  ;;  %v3879_v23 = vld [vmem:[%s6544_s11 + $0x180] sm:$0xff]  ;;  %v3880_v12 = vld [vmem:[%s6544_s11 + $0x188] sm:$0xff]  ;;  %v3896_v43 = vld [vmem:[%s6544_s11 + $0x1f0] sm:$0xff] }
 0x2a7   :  { %4621 = vmatprep.subr.bf16.mxu1 %v6635_v1  ;;  %4627 = vmatprep.subr.bf16.mxu0 %v6635_v1  ;;  %v4655_v7 = vpack.c.bf16 %v3880_v12, %v3879_v23  ;;  %v3897_v27 = vld [vmem:[%s6544_s11 + $0x1f8] sm:$0xff]  ;;  %v3911_v59 = vld [vmem:[%s6544_s11 + $0x250] sm:$0xff] }
 0x2a8   :  { %4296 = vmatprep.mubr.msk.f32.mxu1 %vm4894_vm1, %v6593_v5  ;;  %4307 = vmatprep.mubr.msk.f32.mxu0 %vm4894_vm1, %v6593_v5  ;;  %v3907_v39 = vld [vmem:[%s6544_s11 + $0x238] sm:$0xff]  ;;  %v3921_v36 = vld [vmem:[%s6544_s11 + $0x290] sm:$0xff] }
 0x2a9   :  { %v3912_v8 = vld [vmem:[%s6544_s11 + $0x258] sm:$0xff]  ;;  %v3926_v16 = vld [vmem:[%s6544_s11 + $0x2b0] sm:$0xff] }
 0x2aa   :  { %4623 = vmatpush3.bf16.msra.mxu1 %v4622_v30  ;;  %4629 = vmatpush3.bf16.msra.mxu0 %v4628_v4  ;;  %v4667_v30 = vpack.c.bf16 %v3890_v13, %v3889_v53  ;;  %v4694_v23 = vpack.c.bf16 %v3912_v8, %v3911_v59  ;;  %v3922_v38 = vld [vmem:[%s6544_s11 + $0x298] sm:$0xff]  ;;  %v3929_v53 = vld [vmem:[%s6544_s11 + $0x2c0] sm:$0xff]  ;;  %v3930_v13 = vld [vmem:[%s6544_s11 + $0x2c8] sm:$0xff] }
 0x2ab   :  { %4630 = vmatprep.subr.bf16.mxu1 %v6635_v1  ;;  %4636 = vmatprep.subr.bf16.mxu0 %v6635_v1  ;;  %v3927_v54 = vld [vmem:[%s6544_s11 + $0x2b8] sm:$0xff]  ;;  %v3959_v59 = vld [vmem:[%s6544_s11 + $0x380] sm:$0xff]  ;;  %v3960_v8 = vld [vmem:[%s6544_s11 + $0x388] sm:$0xff] }
 0x2ad   :  { %4297 = vmatmul.mubr.msk.f32.vlgmr.msra.gmra.mrb[20].mxu1 %vm426_vm2, %v5852_v19  ;;  %4308 = vmatmul.mubr.msk.f32.vlgmr.msra.gmra.mrb[18].mxu0 %vm426_vm2, %v5855_v31  ;;  %v3874_v19 = vld [vmem:[%s6544_s11 + $0x160] sm:$0xff]  ;;  %v3875_v31 = vld [vmem:[%s6544_s11 + $0x168] sm:$0xff] }
 0x2ae   :  { %4632 = vmatpush3.bf16.msra.mxu1 %v4631_v6  ;;  %4638 = vmatpush3.bf16.msra.mxu0 %v4637_v50  ;;  %v4649_v52 = vpack.c.bf16 %v3875_v31, %v3874_v19  ;;  %v4670_v6 = vpack.c.bf16 %v3892_v63, %v3891_v2  ;;  %v4676_v50 = vpack.c.bf16 %v3897_v27, %v3896_v43  ;;  %v3936_v2 = vld [vmem:[%s6544_s11 + $0x2f0] sm:$0xff]  ;;  %v3937_v63 = vld [vmem:[%s6544_s11 + $0x2f8] sm:$0xff] }
 0x2af   :  { %4633 = vmatprep.subr.bf16.mxu1 %v6635_v1  ;;  %4639 = vmatprep.subr.bf16.mxu0 %v6635_v1  ;;  %v4688_v31 = vpack.c.bf16 %v3907_v39, %v3906_v17  ;;  %v4724_v27 = vpack.c.bf16 %v3937_v63, %v3936_v2  ;;  %v3949_v17 = vld [vmem:[%s6544_s11 + $0x340] sm:$0xff]  ;;  %v3950_v39 = vld [vmem:[%s6544_s11 + $0x348] sm:$0xff] }
 0x2b0   :  { %4318 = vmatprep.mubr.msk.f32.mxu1 %vm4894_vm1, %v6593_v5  ;;  %4329 = vmatprep.mubr.msk.f32.mxu0 %vm4894_vm1, %v6593_v5 }
 0x2b2   :  { %4635 = vmatpush3.bf16.msra.mxu1 %v4634_v20  ;;  %4641 = vmatpush3.bf16.msra.mxu0 %v4640_v32  ;;  %v3901_v20 = vld [vmem:[%s6544_s11 + $0x210] sm:$0xff]  ;;  %v3902_v32 = vld [vmem:[%s6544_s11 + $0x218] sm:$0xff] }
 0x2b3   :  { %4642 = vmatprep.subr.bf16.mxu1 %v6635_v1  ;;  %4648 = vmatprep.subr.bf16.mxu0 %v6635_v1  ;;  %v4682_v19 = vpack.c.bf16 %v3902_v32, %v3901_v20 }
 0x2b5   :  { %4319 = vmatmul.mubr.msk.f32.vlgmr.msra.gmra.mrb[22].mxu1 %vm426_vm2, %v5860_v57  ;;  %4330 = vmatmul.mubr.msk.f32.vlgmr.msra.gmra.mrb[20].mxu0 %vm426_vm2, %v5863_v44  ;;  %v3884_v57 = vld [vmem:[%s6544_s11 + $0x1a0] sm:$0xff]  ;;  %v3885_v44 = vld [vmem:[%s6544_s11 + $0x1a8] sm:$0xff] }
 0x2b6   :  { %4644 = vmatpush3.bf16.msra.mxu1 %v4643_v10  ;;  %4650 = vmatpush3.bf16.msra.mxu0 %v4649_v52  ;;  %v4661_v41 = vpack.c.bf16 %v3885_v44, %v3884_v57  ;;  %v3909_v10 = vld [vmem:[%s6544_s11 + $0x240] sm:$0xff]  ;;  %v3910_v52 = vld [vmem:[%s6544_s11 + $0x248] sm:$0xff] }
 0x2b7   :  { %4645 = vmatprep.subr.bf16.mxu1 %v6635_v1  ;;  %4651 = vmatprep.subr.bf16.mxu0 %v6635_v1  ;;  %v4691_v11 = vpack.c.bf16 %v3910_v52, %v3909_v10  ;;  %v3919_v57 = vld [vmem:[%s6544_s11 + $0x280] sm:$0xff]  ;;  %v3920_v44 = vld [vmem:[%s6544_s11 + $0x288] sm:$0xff]  ;;  %v3951_v10 = vld [vmem:[%s6544_s11 + $0x350] sm:$0xff] }
 0x2b8   :  { %4340 = vmatprep.mubr.msk.f32.mxu1 %vm4894_vm1, %v6593_v5  ;;  %4351 = vmatprep.mubr.msk.f32.mxu0 %vm4894_vm1, %v6593_v5  ;;  %v3952_v52 = vld [vmem:[%s6544_s11 + $0x358] sm:$0xff] }
 0x2ba   :  { %4647 = vmatpush3.bf16.msra.mxu1 %v4646_v14  ;;  %4653 = vmatpush3.bf16.msra.mxu0 %v4652_v46  ;;  %v3916_v14 = vld [vmem:[%s6544_s11 + $0x270] sm:$0xff]  ;;  %v3917_v46 = vld [vmem:[%s6544_s11 + $0x278] sm:$0xff] }
 0x2bb   :  { %4654 = vmatprep.subr.bf16.mxu1 %v6635_v1  ;;  %4660 = vmatprep.subr.bf16.mxu0 %v6635_v1  ;;  %v4700_v12 = vpack.c.bf16 %v3917_v46, %v3916_v14  ;;  %v4751_v14 = vpack.c.bf16 %v3960_v8, %v3959_v59 }
 0x2bd   :  { %4341 = vmatmul.mubr.msk.f32.vlgmr.msra.gmra.mrb[24].mxu1 %vm426_vm2, %v5866_v24  ;;  %4352 = vmatmul.mubr.msk.f32.vlgmr.msra.gmra.mrb[22].mxu0 %vm426_vm2, %v5875_v45  ;;  %v3894_v24 = vld [vmem:[%s6544_s11 + $0x1e0] sm:$0xff]  ;;  %v3895_v45 = vld [vmem:[%s6544_s11 + $0x1e8] sm:$0xff] }
 0x2be   :  { %4656 = vmatpush3.bf16.msra.mxu1 %v4655_v7  ;;  %4662 = vmatpush3.bf16.msra.mxu0 %v4661_v41  ;;  %v4673_v4 = vpack.c.bf16 %v3895_v45, %v3894_v24  ;;  %v4703_v7 = vpack.c.bf16 %v3920_v44, %v3919_v57  ;;  %v4715_v24 = vpack.c.bf16 %v3930_v13, %v3929_v53  ;;  %v3966_v57 = vld [vmem:[%s6544_s11 + $0x3b0] sm:$0xff]  ;;  %v3967_v44 = vld [vmem:[%s6544_s11 + $0x3b8] sm:$0xff] }
 0x2bf   :  { %4657 = vmatprep.subr.bf16.mxu1 %v6635_v1  ;;  %4663 = vmatprep.subr.bf16.mxu0 %v6635_v1 }
 0x2c0   :  { %4362 = vmatprep.mubr.msk.f32.mxu1 %vm4894_vm1, %v6593_v5  ;;  %4373 = vmatprep.mubr.msk.f32.mxu0 %vm4894_vm1, %v6593_v5 }
 0x2c2   :  { %4659 = vmatpush3.bf16.msra.mxu1 %v4658_v47  ;;  %4665 = vmatpush3.bf16.msra.mxu0 %v4664_v22  ;;  %v4706_v47 = vpack.c.bf16 %v3922_v38, %v3921_v36  ;;  %v4712_v22 = vpack.c.bf16 %v3927_v54, %v3926_v16  ;;  %v3971_v16 = vld [vmem:[%s6544_s11 + $0x3d0] sm:$0xff]  ;;  %v3972_v54 = vld [vmem:[%s6544_s11 + $0x3d8] sm:$0xff] }
 0x2c3   :  { %4666 = vmatprep.subr.bf16.mxu1 %v6635_v1  ;;  %4672 = vmatprep.subr.bf16.mxu0 %v6635_v1  ;;  %v4766_v53 = vpack.c.bf16 %v3972_v54, %v3971_v16 }
 0x2c5   :  { %4363 = vmatmul.mubr.msk.f32.vlgmr.msra.gmra.mrb[26].mxu1 %vm426_vm2, %v5878_v55  ;;  %4374 = vmatmul.mubr.msk.f32.vlgmr.msra.gmra.mrb[24].mxu0 %vm426_vm2, %v5881_v56  ;;  %v3904_v55 = vld [vmem:[%s6544_s11 + $0x220] sm:$0xff]  ;;  %v3905_v56 = vld [vmem:[%s6544_s11 + $0x228] sm:$0xff] }
 0x2c6   :  { %4668 = vmatpush3.bf16.msra.mxu1 %v4667_v30  ;;  %4674 = vmatpush3.bf16.msra.mxu0 %v4673_v4  ;;  %v4685_v25 = vpack.c.bf16 %v3905_v56, %v3904_v55  ;;  %v3931_v30 = vld [vmem:[%s6544_s11 + $0x2d0] sm:$0xff]  ;;  %v3932_v4 = vld [vmem:[%s6544_s11 + $0x2d8] sm:$0xff] }
 0x2c7   :  { %4669 = vmatprep.subr.bf16.mxu1 %v6635_v1  ;;  %4675 = vmatprep.subr.bf16.mxu0 %v6635_v1  ;;  %v4718_v43 = vpack.c.bf16 %v3932_v4, %v3931_v30  ;;  %v3941_v55 = vld [vmem:[%s6544_s11 + $0x310] sm:$0xff]  ;;  %v3942_v56 = vld [vmem:[%s6544_s11 + $0x318] sm:$0xff] }
 0x2c8   :  { %4384 = vmatprep.mubr.msk.f32.mxu1 %vm4894_vm1, %v6593_v5  ;;  %4395 = vmatprep.mubr.msk.f32.mxu0 %vm4894_vm1, %v6593_v5  ;;  %v4730_v20 = vpack.c.bf16 %v3942_v56, %v3941_v55 }
 0x2ca   :  { %4671 = vmatpush3.bf16.msra.mxu1 %v4670_v6  ;;  %4677 = vmatpush3.bf16.msra.mxu0 %v4676_v50  ;;  %v3939_v6 = vld [vmem:[%s6544_s11 + $0x300] sm:$0xff]  ;;  %v3940_v50 = vld [vmem:[%s6544_s11 + $0x308] sm:$0xff] }
 0x2cb   :  { %4678 = vmatprep.subr.bf16.mxu1 %v6635_v1  ;;  %4684 = vmatprep.subr.bf16.mxu0 %v6635_v1  ;;  %v4727_v0 = vpack.c.bf16 %v3940_v50, %v3939_v6 }
 0x2cd   :  { %4385 = vmatmul.mubr.msk.f32.vlgmr.msra.gmra.mrb[28].mxu1 %vm426_vm2, %v5914_v9  ;;  %4396 = vmatmul.mubr.msk.f32.vlgmr.msra.gmra.mrb[26].mxu0 %vm426_vm2, %v5917_v60  ;;  %v3914_v9 = vld [vmem:[%s6544_s11 + $0x260] sm:$0xff]  ;;  %v3915_v60 = vld [vmem:[%s6544_s11 + $0x268] sm:$0xff] }
 0x2ce   :  { %4680 = vmatpush3.bf16.msra.mxu1 %v4679_v28  ;;  %4686 = vmatpush3.bf16.msra.mxu0 %v4685_v25  ;;  %v4697_v35 = vpack.c.bf16 %v3915_v60, %v3914_v9  ;;  %v3946_v28 = vld [vmem:[%s6544_s11 + $0x330] sm:$0xff]  ;;  %v3947_v25 = vld [vmem:[%s6544_s11 + $0x338] sm:$0xff] }
 0x2cf   :  { %4681 = vmatprep.subr.bf16.mxu1 %v6635_v1  ;;  %4687 = vmatprep.subr.bf16.mxu0 %v6635_v1  ;;  %v4736_v32 = vpack.c.bf16 %v3947_v25, %v3946_v28  ;;  %v3956_v9 = vld [vmem:[%s6544_s11 + $0x370] sm:$0xff]  ;;  %v3957_v60 = vld [vmem:[%s6544_s11 + $0x378] sm:$0xff] }
 0x2d0   :  { %4406 = vmatprep.mubr.msk.f32.mxu1 %vm4894_vm1, %v6593_v5  ;;  %4417 = vmatprep.mubr.msk.f32.mxu0 %vm4894_vm1, %v6593_v5 }
 0x2d2   :  { %4683 = vmatpush3.bf16.msra.mxu1 %v4682_v19  ;;  %4689 = vmatpush3.bf16.msra.mxu0 %v4688_v31  ;;  %v4739_v19 = vpack.c.bf16 %v3950_v39, %v3949_v17 }
 0x2d3   :  { %4690 = vmatprep.subr.bf16.mxu1 %v6635_v1  ;;  %4696 = vmatprep.subr.bf16.mxu0 %v6635_v1 }
 0x2d5   :  { %4407 = vmatmul.mubr.msk.f32.vlgmr.msra.gmra.mrb[30].mxu1 %vm426_vm2, %v5920_v37  ;;  %4418 = vmatmul.mubr.msk.f32.vlgmr.msra.gmra.mrb[28].mxu0 %vm426_vm2, %v5933_v61  ;;  %v3924_v37 = vld [vmem:[%s6544_s11 + $0x2a0] sm:$0xff]  ;;  %v3925_v61 = vld [vmem:[%s6544_s11 + $0x2a8] sm:$0xff] }
 0x2d6   :  { %4692 = vmatpush3.bf16.msra.mxu1 %v4691_v11  ;;  %4698 = vmatpush3.bf16.msra.mxu0 %v4697_v35  ;;  %v4709_v41 = vpack.c.bf16 %v3925_v61, %v3924_v37  ;;  %v4742_v11 = vpack.c.bf16 %v3952_v52, %v3951_v10  ;;  %v4748_v35 = vpack.c.bf16 %v3957_v60, %v3956_v9 }
 0x2d7   :  { %4693 = vmatprep.subr.bf16.mxu1 %v6635_v1  ;;  %4699 = vmatprep.subr.bf16.mxu0 %v6635_v1  ;;  %v4760_v61 = vpack.c.bf16 %v3967_v44, %v3966_v57 }
 0x2d8   :  { %4428 = vmatprep.mubr.msk.f32.mxu1 %vm4894_vm1, %v6593_v5  ;;  %4439 = vmatprep.mubr.msk.f32.mxu0 %vm4894_vm1, %v6593_v5 }
 0x2da   :  { %4695 = vmatpush3.bf16.msra.mxu1 %v4694_v23  ;;  %4701 = vmatpush3.bf16.msra.mxu0 %v4700_v12  ;;  %v3961_v23 = vld [vmem:[%s6544_s11 + $0x390] sm:$0xff]  ;;  %v3962_v12 = vld [vmem:[%s6544_s11 + $0x398] sm:$0xff] }
 0x2db   :  { %4702 = vmatprep.subr.bf16.mxu1 %v6635_v1  ;;  %4708 = vmatprep.subr.bf16.mxu0 %v6635_v1  ;;  %v4754_v37 = vpack.c.bf16 %v3962_v12, %v3961_v23 }
 0x2dd   :  { %4429 = vmatmul.mubr.msk.f32.vlgmr.msra.gmra.mrb[32].mxu1 %vm426_vm2, %v5936_v18  ;;  %4440 = vmatmul.mubr.msk.f32.vlgmr.msra.gmra.mrb[30].mxu0 %vm426_vm2, %v5939_v42  ;;  %v3934_v18 = vld [vmem:[%s6544_s11 + $0x2e0] sm:$0xff]  ;;  %v3935_v42 = vld [vmem:[%s6544_s11 + $0x2e8] sm:$0xff] }
 0x2de   :  { %4704 = vmatpush3.bf16.msra.mxu1 %v4703_v7  ;;  %4710 = vmatpush3.bf16.msra.mxu0 %v4709_v41  ;;  %v4721_v45 = vpack.c.bf16 %v3935_v42, %v3934_v18  ;;  %v3969_v7 = vld [vmem:[%s6544_s11 + $0x3c0] sm:$0xff]  ;;  %v3970_v41 = vld [vmem:[%s6544_s11 + $0x3c8] sm:$0xff] }
 0x2df   :  { %4705 = vmatprep.subr.bf16.mxu1 %v6635_v1  ;;  %4711 = vmatprep.subr.bf16.mxu0 %v6635_v1  ;;  %v4763_v36 = vpack.c.bf16 %v3970_v41, %v3969_v7 }
 0x2e0   :  { %4450 = vmatprep.mubr.msk.f32.mxu1 %vm4894_vm1, %v6593_v5  ;;  %4461 = vmatprep.mubr.msk.f32.mxu0 %vm4894_vm1, %v6593_v5 }
 0x2e2   :  { %4707 = vmatpush3.bf16.msra.mxu1 %v4706_v47  ;;  %4713 = vmatpush3.bf16.msra.mxu0 %v4712_v22  ;;  %v3976_v47 = vld [vmem:[%s6544_s11 + $0x3f0] sm:$0xff]  ;;  %v3977_v22 = vld [vmem:[%s6544_s11 + $0x3f8] sm:$0xff] }
 0x2e3   :  { %4714 = vmatprep.subr.bf16.mxu1 %v6635_v1  ;;  %4720 = vmatprep.subr.bf16.mxu0 %v6635_v1  ;;  %v4772_v13 = vpack.c.bf16 %v3977_v22, %v3976_v47 }
 0x2e5   :  { %4451 = vmatmul.mubr.msk.f32.vlgmr.msra.gmra.mrb[34].mxu1 %vm426_vm2, %v5944_v62  ;;  %4462 = vmatmul.mubr.msk.f32.vlgmr.msra.gmra.mrb[32].mxu0 %vm426_vm2, %v5976_v51  ;;  %v3944_v62 = vld [vmem:[%s6544_s11 + $0x320] sm:$0xff]  ;;  %v3945_v51 = vld [vmem:[%s6544_s11 + $0x328] sm:$0xff] }
 0x2e6   :  { %4716 = vmatpush3.bf16.msra.mxu1 %v4715_v24  ;;  %4722 = vmatpush3.bf16.msra.mxu0 %v4721_v45  ;;  %v4733_v15 = vpack.c.bf16 %v3945_v51, %v3944_v62 }
 0x2e7   :  { %4717 = vmatprep.subr.bf16.mxu1 %v6635_v1  ;;  %4723 = vmatprep.subr.bf16.mxu0 %v6635_v1 }
 0x2e8   :  { %4472 = vmatprep.mubr.msk.f32.mxu1 %vm4894_vm1, %v6593_v5  ;;  %4483 = vmatprep.mubr.msk.f32.mxu0 %vm4894_vm1, %v6593_v5 }
 0x2ea   :  { %4719 = vmatpush3.bf16.msra.mxu1 %v4718_v43  ;;  %4725 = vmatpush3.bf16.msra.mxu0 %v4724_v27 }
 0x2eb   :  { %4726 = vmatprep.subr.bf16.mxu1 %v6635_v1  ;;  %4732 = vmatprep.subr.bf16.mxu0 %v6635_v1 }
 0x2ed   :  { %4473 = vmatmul.mubr.msk.f32.vlgmr.msra.gmra.mrb[36].mxu1 %vm426_vm2, %v5979_v33  ;;  %4484 = vmatmul.mubr.msk.f32.vlgmr.msra.gmra.mrb[34].mxu0 %vm426_vm2, %v6001_v48  ;;  %v3954_v33 = vld [vmem:[%s6544_s11 + $0x360] sm:$0xff]  ;;  %v3955_v48 = vld [vmem:[%s6544_s11 + $0x368] sm:$0xff] }
 0x2ee   :  { %4728 = vmatpush3.bf16.msra.mxu1 %v4727_v0  ;;  %4734 = vmatpush3.bf16.msra.mxu0 %v4733_v15  ;;  %v4745_v31 = vpack.c.bf16 %v3955_v48, %v3954_v33 }
 0x2ef   :  { %4729 = vmatprep.subr.bf16.mxu1 %v6635_v1  ;;  %4735 = vmatprep.subr.bf16.mxu0 %v6635_v1 }
 0x2f0   :  { %4494 = vmatprep.mubr.msk.f32.mxu1 %vm4894_vm1, %v6593_v5  ;;  %4505 = vmatprep.mubr.msk.f32.mxu0 %vm4894_vm1, %v6593_v5 }
 0x2f2   :  { %4731 = vmatpush3.bf16.msra.mxu1 %v4730_v20  ;;  %4737 = vmatpush3.bf16.msra.mxu0 %v4736_v32 }
 0x2f3   :  { %4738 = vmatprep.subr.bf16.mxu1 %v6635_v1  ;;  %4744 = vmatprep.subr.bf16.mxu0 %v6635_v1 }
 0x2f5   :  { %4495 = vmatmul.mubr.msk.f32.vlgmr.msra.gmra.mrb[38].mxu1 %vm426_vm2, %v6004_v29  ;;  %4506 = vmatmul.mubr.msk.f32.vlgmr.msra.gmra.mrb[36].mxu0 %vm426_vm2, %v6007_v49  ;;  %v3964_v29 = vld [vmem:[%s6544_s11 + $0x3a0] sm:$0xff]  ;;  %v3965_v49 = vld [vmem:[%s6544_s11 + $0x3a8] sm:$0xff] }
 0x2f6   :  { %4740 = vmatpush3.bf16.msra.mxu1 %v4739_v19  ;;  %4746 = vmatpush3.bf16.msra.mxu0 %v4745_v31  ;;  %v4757_v46 = vpack.c.bf16 %v3965_v49, %v3964_v29 }
 0x2f7   :  { %4741 = vmatprep.subr.bf16.mxu1 %v6635_v1  ;;  %4747 = vmatprep.subr.bf16.mxu0 %v6635_v1 }
 0x2f8   :  { %4516 = vmatprep.mubr.msk.f32.mxu1 %vm4894_vm1, %v6593_v5  ;;  %4527 = vmatprep.mubr.msk.f32.mxu0 %vm4894_vm1, %v6593_v5 }
 0x2fa   :  { %4743 = vmatpush3.bf16.msra.mxu1 %v4742_v11  ;;  %4749 = vmatpush3.bf16.msra.mxu0 %v4748_v35 }
 0x2fb   :  { %4750 = vmatprep.subr.bf16.mxu1 %v6635_v1  ;;  %4756 = vmatprep.subr.bf16.mxu0 %v6635_v1 }
 0x2fd   :  { %4517 = vmatmul.mubr.msk.f32.vlgmr.msra.gmra.mrb[40].mxu1 %vm426_vm2, %v6012_v58  ;;  %4528 = vmatmul.mubr.msk.f32.vlgmr.msra.gmra.mrb[38].mxu0 %vm426_vm2, %v6015_v3  ;;  %v3974_v58 = vld [vmem:[%s6544_s11 + $0x3e0] sm:$0xff]  ;;  %v3975_v3 = vld [vmem:[%s6544_s11 + $0x3e8] sm:$0xff] }
 0x2fe   :  { %4752 = vmatpush3.bf16.msra.mxu1 %v4751_v14  ;;  %4758 = vmatpush3.bf16.msra.mxu0 %v4757_v46  ;;  %v4769_v38 = vpack.c.bf16 %v3975_v3, %v3974_v58 }
 0x2ff   :  { %4753 = vmatprep.subr.bf16.mxu1 %v6635_v1  ;;  %4759 = vmatprep.subr.bf16.mxu0 %v6635_v1 }
 0x300   :  { %4538 = vmatprep.mubr.msk.f32.mxu1 %vm4894_vm1, %v6593_v5  ;;  %4549 = vmatprep.mubr.msk.f32.mxu0 %vm4894_vm1, %v6593_v5 }
 0x302   :  { %4755 = vmatpush3.bf16.msra.mxu1 %v4754_v37  ;;  %4761 = vmatpush3.bf16.msra.mxu0 %v4760_v61 }
 0x303   :  { %4762 = vmatprep.subr.bf16.mxu1 %v6635_v1  ;;  %4768 = vmatprep.subr.bf16.mxu0 %v6635_v1 }
 0x305   :  { %4539 = vmatmul.mubr.msk.f32.vlgmr.msra.gmra.mrb[42].mxu1 %vm426_vm2, %v6038_v21  ;;  %4550 = vmatmul.mubr.msk.f32.vlgmr.msra.gmra.mrb[40].mxu0 %vm426_vm2, %v6050_v40 }
 0x306   :  { %4764 = vmatpush3.bf16.msra.mxu1 %v4763_v36  ;;  %4770 = vmatpush3.bf16.msra.mxu0 %v4769_v38 }
 0x307   :  { %4765 = vmatprep.subr.bf16.mxu1 %v6635_v1  ;;  %4771 = vmatprep.subr.bf16.mxu0 %v6635_v1 }
 0x308   :  { %4560 = vmatprep.mubr.msk.f32.mxu1 %vm4894_vm1, %v6593_v5  ;;  %4571 = vmatprep.mubr.msk.f32.mxu0 %vm4894_vm1, %v6593_v5 }
 0x30a   :  { %4767 = vmatpush3.bf16.msra.mxu1 %v4766_v53  ;;  %4773 = vmatpush3.bf16.msra.mxu0 %v4772_v13 }
 0x30d   :  { %4561 = vmatmul.mubr.msk.f32.vlgmr.msra.gmra.mrb[44].mxu1 %vm426_vm2, %v6053_v26  ;;  %4572 = vmatmul.mubr.msk.f32.vlgmr.msra.gmra.mrb[42].mxu0 %vm426_vm2, %v6056_v34 }
 0x362   :  { %v1117_v21 = vpop.f32.mrb[14].mxu1  ;;  %v1190_v40 = vpop.f32.mrb[12].mxu0 }
 0x363   :  { %v1191_v18 = vadd.f32 %v1190_v40, %v1117_v21  ;;  %v4232_v42 = vpop.f32.mrb[15].mxu1  ;;  %v4243_v24 = vpop.f32.mrb[13].mxu0 }
 0x36d   :  { %v1274_v1 = vpop.f32.mrb[16].mxu1 }
 0x36e   :  { %v1359_v45 = vpop.f32.mrb[14].mxu0  ;;  %v1278_v30 = vadd.f32 %v1274_v1, %v1191_v18  ;;  %v4254_v4 = vpop.f32.mrb[17].mxu1 }
 0x36f   :  { %v4265_v2 = vpop.f32.mrb[15].mxu0 }
 0x370   :  { %v1363_v63 = vadd.f32 %v1359_v45, %v1278_v30 }
 0x378   :  { %v1444_v5 = vpop.f32.mrb[18].mxu1  ;;  %v1529_v43 = vpop.f32.mrb[16].mxu0 }
 0x379   :  { %v1448_v27 = vadd.f32 %v1444_v5, %v1363_v63  ;;  %v4276_v6 = vpop.f32.mrb[19].mxu1  ;;  %v4287_v50 = vpop.f32.mrb[17].mxu0 }
 0x37b   :  { %v1533_v26 = vadd.f32 %v1529_v43, %v1448_v27 }
 0x380   :  { %v1614_v62 = vpop.f32.mrb[20].mxu1  ;;  %v1699_v51 = vpop.f32.mrb[18].mxu0 }
 0x381   :  { %v1618_v34 = vadd.f32 %v1614_v62, %v1533_v26  ;;  %v4298_v0 = vpop.f32.mrb[21].mxu1  ;;  %v4309_v15 = vpop.f32.mrb[19].mxu0 }
 0x383   :  { %v1703_v55 = vadd.f32 %v1699_v51, %v1618_v34 }
 0x388   :  { %v1784_v56 = vpop.f32.mrb[22].mxu1  ;;  %v1869_v28 = vpop.f32.mrb[20].mxu0 }
 0x389   :  { %v1788_v25 = vadd.f32 %v1784_v56, %v1703_v55  ;;  %v4320_v20 = vpop.f32.mrb[23].mxu1  ;;  %v4331_v32 = vpop.f32.mrb[21].mxu0 }
 0x38b   :  { %v1873_v17 = vadd.f32 %v1869_v28, %v1788_v25 }
 0x390   :  { %v1954_v39 = vpop.f32.mrb[24].mxu1  ;;  %v2039_v33 = vpop.f32.mrb[22].mxu0 }
 0x391   :  { %v1958_v48 = vadd.f32 %v1954_v39, %v1873_v17  ;;  %v4342_v19 = vpop.f32.mrb[25].mxu1  ;;  %v4353_v31 = vpop.f32.mrb[23].mxu0 }
 0x393   :  { %v2043_v10 = vadd.f32 %v2039_v33, %v1958_v48  ;;  %v3979_v33 = vld [vmem:[%s6545_s12] ss:$0 sm:$0xff]  ;;  %s4869_s12 = scalar_lea.vmem %s3772_s20, 32 }
 0x394   :  { %p4870_p0 = scmp.ne.s32.totalorder %s3772_s20, %s4869_s12  ;;  %p4875_p2 = scmp.lt.s32.totalorder %s4869_s12, %s4869_s12 }
 0x396   :  { %p4876_p3 = por %p4875_p2, %p4874_p1 }
 0x398   :  { %v2124_v52 = vpop.f32.mrb[26].mxu1  ;;  %v2209_v9 = vpop.f32.mrb[24].mxu0  ;;  %p4877_p4 = pnand %p4876_p3, %p4870_p0 }
 0x399   :  { %v2128_v60 = vadd.f32 %v2124_v52, %v2043_v10  ;;  %v4364_v11 = vpop.f32.mrb[27].mxu1  ;;  %v4375_v35 = vpop.f32.mrb[25].mxu0 }
 0x39b   :  { %v2213_v59 = vadd.f32 %v2209_v9, %v2128_v60 }
 0x3a0   :  { %v2294_v8 = vpop.f32.mrb[28].mxu1  ;;  %v2379_v29 = vpop.f32.mrb[26].mxu0 }
 0x3a1   :  { %v2298_v49 = vadd.f32 %v2294_v8, %v2213_v59  ;;  %v4386_v14 = vpop.f32.mrb[29].mxu1  ;;  %v4397_v46 = vpop.f32.mrb[27].mxu0 }
 0x3a3   :  { %v2383_v23 = vadd.f32 %v2379_v29, %v2298_v49 }
 0x3a8   :  { %v2464_v12 = vpop.f32.mrb[30].mxu1  ;;  %v2549_v57 = vpop.f32.mrb[28].mxu0 }
 0x3a9   :  { %v2468_v44 = vadd.f32 %v2464_v12, %v2383_v23  ;;  %v4408_v37 = vpop.f32.mrb[31].mxu1  ;;  %v4419_v61 = vpop.f32.mrb[29].mxu0 }
 0x3ab   :  { %v2553_v7 = vadd.f32 %v2549_v57, %v2468_v44 }
 0x3b0   :  { %v2634_v41 = vpop.f32.mrb[32].mxu1  ;;  %v2719_v58 = vpop.f32.mrb[30].mxu0 }
 0x3b1   :  { %v2638_v3 = vadd.f32 %v2634_v41, %v2553_v7  ;;  %v4430_v36 = vpop.f32.mrb[33].mxu1  ;;  %v4441_v38 = vpop.f32.mrb[31].mxu0 }
 0x3b3   :  { %v2723_v16 = vadd.f32 %v2719_v58, %v2638_v3 }
 0x3b8   :  { %v2804_v54 = vpop.f32.mrb[34].mxu1  ;;  %v2889_v47 = vpop.f32.mrb[32].mxu0 }
 0x3b9   :  { %v2808_v22 = vadd.f32 %v2804_v54, %v2723_v16  ;;  %v4452_v53 = vpop.f32.mrb[35].mxu1  ;;  %v4463_v13 = vpop.f32.mrb[33].mxu0 }
 0x3bb   :  { %v2893_v21 = vadd.f32 %v2889_v47, %v2808_v22 }
 0x3c0   :  { %v2974_v40 = vpop.f32.mrb[36].mxu1  ;;  %v3059_v18 = vpop.f32.mrb[34].mxu0 }
 0x3c1   :  { %v2978_v42 = vadd.f32 %v2974_v40, %v2893_v21  ;;  %v4474_v24 = vpop.f32.mrb[37].mxu1  ;;  %v4485_v1 = vpop.f32.mrb[35].mxu0 }
 0x3c3   :  { %v3063_v45 = vadd.f32 %v3059_v18, %v2978_v42 }
 0x3c8   :  { %v3144_v30 = vpop.f32.mrb[38].mxu1  ;;  %v3229_v4 = vpop.f32.mrb[36].mxu0 }
 0x3c9   :  { %v3148_v2 = vadd.f32 %v3144_v30, %v3063_v45  ;;  %v4496_v63 = vpop.f32.mrb[39].mxu1  ;;  %v4507_v5 = vpop.f32.mrb[37].mxu0 }
 0x3cb   :  { %v3233_v43 = vadd.f32 %v3229_v4, %v3148_v2 }
 0x3d0   :  { %v3314_v27 = vpop.f32.mrb[40].mxu1  ;;  %v3399_v6 = vpop.f32.mrb[38].mxu0 }
 0x3d1   :  { %v3318_v50 = vadd.f32 %v3314_v27, %v3233_v43  ;;  %v4518_v26 = vpop.f32.mrb[41].mxu1  ;;  %v4529_v62 = vpop.f32.mrb[39].mxu0 }
 0x3d3   :  { %v3403_v51 = vadd.f32 %v3399_v6, %v3318_v50 }
 0x3d8   :  { %v3484_v34 = vpop.f32.mrb[42].mxu1  ;;  %v3569_v0 = vpop.f32.mrb[40].mxu0 }
 0x3d9   :  { %v3488_v15 = vadd.f32 %v3484_v34, %v3403_v51  ;;  %v4540_v55 = vpop.f32.mrb[43].mxu1  ;;  %v4551_v56 = vpop.f32.mrb[41].mxu0 }
 0x3db   :  { %v3573_v28 = vadd.f32 %v3569_v0, %v3488_v15 }
 0x3e0   :  { %v3654_v25 = vpop.f32.mrb[44].mxu1  ;;  %v3739_v20 = vpop.f32.mrb[42].mxu0 }
 0x3e1   :  { %v3658_v32 = vadd.f32 %v3654_v25, %v3573_v28  ;;  %v4562_v17 = vpop.f32.mrb[45].mxu1  ;;  %v4573_v39 = vpop.f32.mrb[43].mxu0 }
 0x3e3   :  { %v3743_v48 = vadd.f32 %v3739_v20, %v3658_v32 }
 0x3e5   :  { %v3751_v19 = vadd.f32 %v3979_v33, %v3743_v48 }
 0x3e7   :  { %v3753_v31 = vsel %vm3752_vm13, %v3751_v19, -inf }
 0x3e8   :  { %3754 = vmax.xlane.f32.xlu0 %v3753_v31 }
 0x475   :  { %v3755_v10 = vpop.xlane.xlu0 %3754 }
 0x476   :  { %v3756_v52 = vsub.f32 %v3751_v19, %v3755_v10 }
 0x478   :  { %v3757_v9 = vmul.f32 1.442695, %v3756_v52 }
 0x47a   :  { %4865 = vpow2.f32 %v3757_v9 }
 0x484   :  { %v4866_v60 = vpop.eup %4865 }
 0x485   :  { %v3759_v11 = vsel %vm3752_vm13, %v4866_v60, 0.0 }
 0x486   :  { %3760 = vadd.xlane.f32.xlu1 %v3759_v11 }
 0x513   :  { %v3761_v35 = vpop.xlane.xlu1 %3760 }
 0x514   :  { %4867 = vrcp.f32 %v3761_v35 }
 0x51e   :  { %v4868_v59 = vpop.eup %4867 }
 0x51f   :  { %v3763_v8 = vmul.f32 %v4868_v59, %v4866_v60 }
 0x521   :  { %3764 = vst.msk [vmem:[#allocation3] sm:$0x3] %vm3752_vm13, %v3763_v8 }
 0x522   :  { %4880 = shalt.err (!%p4877_p4)
}
 0x523   :  { %s4881_s23 = scalar_lea.hbm %s6546_s13, 32 }
 0x524   :  { %p4882_p5 = scmp.ne.s32.totalorder %s6546_s13, %s4881_s23  ;;  %p4885_p6 = scmp.lt.u32.totalorder %s4881_s23, %s6546_s13 }
 0x526   :  { %p4887_p7 = pnand %p4885_p6, %p4882_p5 }
 0x528   :  { %4890 = shalt.err (!%p4887_p7)
}
 0x529   :  { %3774 = dma.vmem_to_hbm [thread:$0]  %s3772_s20, 32, %s6546_s13, [#allocation4]  }
 0x52a   :  { %4891 = dma.done.wait [#allocation4], 32  }
 0x52b   :  { %4892 = vsyncadd [#allocation4], 4294967264 }
 0x52c   :  { %3778 = vsyncpa [#allocation4], 1 }

</bundles_post_ra>
